<compile_context>
chip_gen: v7x
topology: tpu7x:2x2x1
jax: 0.10.0
libtpu: 0.0.40
codegen_flags: <defaults>
</compile_context>

<pallas_src>
import numpy as np
import jax
import jax.numpy as jnp
from jax.experimental import pallas as pl
from jax.experimental.pallas import tpu as pltpu

STEPS = 5          # GatedGraphConv num_layers
LN_EPS = 1e-5      # torch.nn.LayerNorm default eps


def _layernorm(x, w, b):
    mu = jnp.mean(x, axis=-1, keepdims=True)
    var = jnp.mean((x - mu) ** 2, axis=-1, keepdims=True)
    return (x - mu) * jax.lax.rsqrt(var + LN_EPS) * w + b


def _round_up(x, m):
    return (x + m - 1) // m * m


def method_encoder(x, edge_index, batch, num_graphs, params, *, tile=256,
                   adj_cache_budget_bytes=16 * 1024 * 1024):
    """MethodEncoder forward pass. Graph-structure preprocessing is host-side (numpy)."""
    n_nodes, in_dim = x.shape
    hidden = params["lnw"].shape[-1]
    steps = params["wgg"].shape[0]

    T = tile
    n_pad = _round_up(n_nodes, T)
    g_pad = _round_up(max(int(num_graphs), 1), 8)
    rt = n_pad // T
    H = hidden
    last_s = steps - 1

    f32, bf16 = jnp.float32, jnp.bfloat16

    # ---------------- host-side graph structure: dense adjacency + compacted tile list ----
    ei = np.asarray(edge_index)
    src_np, dst_np = ei[0], ei[1]

    # A[dst, src] += 1 : PyG 'add' aggregation, source->target flow.
    adj = jnp.zeros((n_pad, n_pad), f32).at[jnp.asarray(dst_np), jnp.asarray(src_np)].add(1.0)
    # int8 adjacency in HBM: exact for edge multiplicities <= 127 (simple graphs are 0/1).
    adj_i8 = jnp.clip(adj, 0, 127).astype(jnp.int8)
    adj_tiles = adj_i8.reshape(rt, T, rt, T).transpose(0, 2, 1, 3)      # [rt, rt, T, T]

    nz = np.zeros((rt, rt), dtype=bool)
    if src_np.size:
        nz[dst_np // T, src_np // T] = True
    row_ids, col_ids, firsts, lasts = [], [], [], []
    for i in range(rt):
        cols = np.nonzero(nz[i])[0]
        if cols.size == 0:
            cols = np.array([0])     # dummy all-zero tile: the row still needs its GRU update
        for k, c in enumerate(cols):
            row_ids.append(i)
            col_ids.append(int(c))
            firsts.append(1 if k == 0 else 0)
            lasts.append(1 if k == cols.size - 1 else 0)
    n_work = len(row_ids)
    row_np = np.asarray(row_ids, np.int32)
    col_np = np.asarray(col_ids, np.int32)

    adj_comp = adj_tiles[row_np, col_np]                                 # [n_work, T, T] int8

    cache_adj = n_work * T * T <= adj_cache_budget_bytes                 # resident VMEM cache?
    n_cache = n_work if cache_adj else 1

    row_ids = jnp.asarray(row_np)
    col_ids = jnp.asarray(col_np)
    firsts = jnp.asarray(firsts, jnp.int32)
    lasts = jnp.asarray(lasts, jnp.int32)

    # ---------------- pooling matrix with the mean (1/|V_g|) pre-folded --------------------
    onehot = jax.nn.one_hot(batch, g_pad, dtype=f32)                     # [N, Gp]
    onehot = jnp.pad(onehot, ((0, n_pad - n_nodes), (0, 0)))
    counts = jnp.sum(onehot, axis=0)
    pool = (onehot * (1.0 / jnp.maximum(counts, 1.0))[None, :]).T.astype(bf16)   # [Gp, Np]

    # ---------------- parameters: bf16 MXU operands, concatenated GRU weights --------------
    x_p = jnp.pad(x, ((0, n_pad - n_nodes), (0, 0))).astype(bf16)
    wlin = params["wlin"].astype(bf16)                                   # [IN, H]
    blin = params["blin"].reshape(1, hidden).astype(f32)
    lnw = params["lnw"].reshape(1, hidden).astype(f32)
    lnb = params["lnb"].reshape(1, hidden).astype(f32)
    wgg = params["wgg"].astype(bf16)                                     # [S, H, H]
    wi_cat = jnp.concatenate([params["wi"][k] for k in range(3)], axis=1).astype(bf16)  # [H,3H]
    wh_cat = jnp.concatenate([params["wh"][k] for k in range(3)], axis=1).astype(bf16)  # [H,3H]
    bi = params["bi"].reshape(3, hidden).astype(f32)
    bh = params["bh"].reshape(3, hidden).astype(f32)
    b_all = jnp.concatenate([bi[0] + bh[0], bi[1] + bh[1], bi[2]]).reshape(1, 3 * hidden)
    b_hn = bh[2].reshape(1, hidden)

    # ---------------- kernel ----------------------------------------------------------------
    def ggc_kernel(rid_ref, cid_ref, fst_ref, lst_ref,        # scalar prefetch (SMEM)
                   x_ref, wlin_ref, blin_ref, lnw_ref, lnb_ref,
                   wgg_ref, wi_ref, wh_ref, ball_ref, bhn_ref,
                   adj_ref, pool_ref,
                   out_ref,
                   h_vmem, m_vmem, agg_vmem, adj_cache):
        s = pl.program_id(0)
        t = pl.program_id(1)
        row = pl.multiple_of(rid_ref[t] * T, T)
        col = pl.multiple_of(cid_ref[t] * T, T)

        # --- one-time setup: zero pooled output; fused Linear -> ReLU -> LayerNorm => h0 ---
        @pl.when((s == 0) & (t == 0))
        def _():
            out_ref[...] = jnp.zeros_like(out_ref)

            def init_tile(i, carry):
                r0 = pl.multiple_of(i * T, T)
                h = jnp.dot(x_ref[pl.ds(r0, T), :], wlin_ref[...],
                            preferred_element_type=jnp.float32) + blin_ref[...]
                h = jnp.maximum(h, 0.0)
                # TODO(synk): training-mode dropout (p=0.1) not implemented — eval semantics.
                h_vmem[pl.ds(r0, T), :] = _layernorm(h, lnw_ref[...], lnb_ref[...])
                return carry

            jax.lax.fori_loop(0, rt, init_tile, 0)

        # --- per step: materialize m = h @ W_s for all source tiles (step-s input h) -------
        @pl.when(t == 0)
        def _():
            def msg_tile(c, carry):
                c0 = pl.multiple_of(c * T, T)
                hc = h_vmem[pl.ds(c0, T), :].astype(jnp.bfloat16)
                m_vmem[pl.ds(c0, T), :] = jnp.dot(
                    hc, wgg_ref[0], preferred_element_type=jnp.float32).astype(jnp.bfloat16)
                return carry

            jax.lax.fori_loop(0, rt, msg_tile, 0)

        # --- adjacency: stream from HBM during step 0 only, reuse the VMEM cache afterwards -
        if cache_adj:
            @pl.when(s == 0)
            def _():
                adj_cache[t] = adj_ref[0]
            a_tile = adj_cache[t]
        else:
            a_tile = adj_ref[0]

        @pl.when(fst_ref[t] == 1)
        def _():
            agg_vmem[...] = jnp.zeros_like(agg_vmem)

        # edge scatter-add aggregation == A_tile @ m_tile  (int8 -> bf16 upcast on the VPU)
        agg_vmem[...] += jnp.dot(a_tile.astype(jnp.float32).astype(jnp.bfloat16),
                                 m_vmem[pl.ds(col, T), :],
                                 preferred_element_type=jnp.float32)

        # --- GRUCell update once this row tile's aggregation is complete --------------------
        @pl.when(lst_ref[t] == 1)
        def _():
            h_i = h_vmem[pl.ds(row, T), :]                              # f32 [T, H]
            gi = jnp.dot(agg_vmem[...].astype(jnp.bfloat16), wi_ref[...],
                         preferred_element_type=jnp.float32) + ball_ref[...]
            gh = jnp.dot(h_i.astype(jnp.bfloat16), wh_ref[...],
                         preferred_element_type=jnp.float32)
            rz = jax.nn.sigmoid(gi[:, :2 * H] + gh[:, :2 * H])          # r/z biases pre-summed
            r, z = rz[:, :H], rz[:, H:]
            n = jnp.tanh(gi[:, 2 * H:] + r * (gh[:, 2 * H:] + bhn_ref[...]))
            h_vmem[pl.ds(row, T), :] = (1.0 - z) * n + z * h_i

        # --- last step: final LayerNorm + (pre-scaled) mean-pool accumulation ---------------
        @pl.when((s == last_s) & (lst_ref[t] == 1))
        def _():
            hn = _layernorm(h_vmem[pl.ds(row, T), :], lnw_ref[...], lnb_ref[...])
            out_ref[...] += jnp.dot(pool_ref[...], hn.astype(jnp.bfloat16),
                                    preferred_element_type=jnp.float32)

    # ---------------- BlockSpecs / grid ------------------------------------------------------
    def const(s, t, rid, cid, fst, lst):
        return (0, 0)

    def wgg_map(s, t, rid, cid, fst, lst):
        return (s, 0, 0)

    if cache_adj:
        def adj_map(s, t, rid, cid, fst, lst):
            # Step 0 walks the compacted nonzero-tile list; later steps pin the block index
            # so the pipeline never re-issues the DMA (tiles are served from the VMEM cache).
            return (jnp.where(s == 0, t, n_work - 1), 0, 0)
    else:
        def adj_map(s, t, rid, cid, fst, lst):
            return (t, 0, 0)

    def pool_map(s, t, rid, cid, fst, lst):
        # Only fetched per row tile during the last step; pinned to block 0 otherwise.
        return (0, jnp.where(s == last_s, rid[t], 0))

    adj_reads = 1 if cache_adj else steps
    flops = int(steps * (2 * n_work * T * T * H              # A_tile @ m_tile (nonzero tiles)
                         + 2 * n_pad * H * H                 # h @ W_s
                         + 2 * 2 * n_pad * H * 3 * H)        # GRU matmuls
                + 2 * n_pad * in_dim * H                     # fused init linear
                + 2 * g_pad * n_pad * H)                     # pooling
    cost = pl.CostEstimate(
        flops=flops,
        transcendentals=int(steps * n_pad * 3 * H),
        bytes_accessed=int(adj_reads * n_work * T * T        # int8 adjacency, read once if cached
                           + n_pad * in_dim * 2              # x
                           + in_dim * H * 2 + steps * H * H * 2 + 2 * H * 3 * H * 2
                           + g_pad * n_pad * 2 + g_pad * H * 4))

    grid_spec = pltpu.PrefetchScalarGridSpec(
        num_scalar_prefetch=4,
        grid=(steps, n_work),
        in_specs=[
            pl.BlockSpec((n_pad, in_dim), const),            # x (resident, prefetched by pipeline)
            pl.BlockSpec((in_dim, hidden), const),           # wlin
            pl.BlockSpec((1, hidden), const),                # blin
            pl.BlockSpec((1, hidden), const),                # lnw
            pl.BlockSpec((1, hidden), const),                # lnb
            pl.BlockSpec((1, hidden, hidden), wgg_map),      # wgg[s]
            pl.BlockSpec((hidden, 3 * hidden), const),       # wi_cat
            pl.BlockSpec((hidden, 3 * hidden), const),       # wh_cat
            pl.BlockSpec((1, 3 * hidden), const),            # b_all
            pl.BlockSpec((1, hidden), const),                # b_hn
            pl.BlockSpec((1, T, T), adj_map),                # compacted adjacency tile (int8)
            pl.BlockSpec((g_pad, T), pool_map),              # pooling tile (pre-scaled, gated)
        ],
        out_specs=pl.BlockSpec((g_pad, hidden), const),      # resident pooled accumulator
        scratch_shapes=[
            pltpu.VMEM((n_pad, hidden), f32),                # node state h (resident)
            pltpu.VMEM((n_pad, hidden), bf16),               # per-step messages m = h @ W_s
            pltpu.VMEM((T, hidden), f32),                    # aggregation accumulator
            pltpu.VMEM((n_cache, T, T), jnp.int8),           # adjacency tile cache
        ],
    )

    out = pl.pallas_call(
        ggc_kernel,
        grid_spec=grid_spec,
        out_shape=jax.ShapeDtypeStruct((g_pad, hidden), f32),
        compiler_params=pltpu.CompilerParams(
            # GGC steps and row tiles share the resident h/m/adjacency scratch -> sequential.
            dimension_semantics=("arbitrary", "arbitrary"),
            vmem_limit_bytes=48 * 1024 * 1024),              # stays under v7x's 64 MiB physical
        cost_estimate=cost,
    )(row_ids, col_ids, firsts, lasts,
      x_p, wlin, blin, lnw, lnb, wgg, wi_cat, wh_cat, b_all, b_hn, adj_comp, pool)

    return out[:num_graphs]


if __name__ == "__main__":
    IN_DIM, HIDDEN = 256, 128     # small, lane-dense stand-ins for (384, 256)
    N, G, E = 512, 2, 1024        # 2 graphs x 256 nodes, 1024 edges

    key = jax.random.PRNGKey(0)
    ks = jax.random.split(key, 12)

    params = dict(
        wlin=jax.random.normal(ks[0], (IN_DIM, HIDDEN), jnp.float32) / jnp.sqrt(IN_DIM),
        blin=jax.random.normal(ks[1], (HIDDEN,), jnp.float32) * 0.02,
        lnw=jnp.ones((HIDDEN,), jnp.float32),
        lnb=jnp.zeros((HIDDEN,), jnp.float32),
        # GatedGraphConv per-step weights [steps, H, H] (right-multiply layout)
        wgg=jax.random.normal(ks[2], (STEPS, HIDDEN, HIDDEN), jnp.float32) / jnp.sqrt(HIDDEN),
        # GRUCell weights in right-multiply layout, gate order (r, z, n)
        wi=jax.random.normal(ks[3], (3, HIDDEN, HIDDEN), jnp.float32) / jnp.sqrt(HIDDEN),
        bi=jax.random.normal(ks[4], (3, HIDDEN), jnp.float32) * 0.02,
        wh=jax.random.normal(ks[5], (3, HIDDEN, HIDDEN), jnp.float32) / jnp.sqrt(HIDDEN),
        bh=jax.random.normal(ks[6], (3, HIDDEN), jnp.float32) * 0.02,
    )

    x = jax.random.normal(ks[7], (N, IN_DIM), jnp.float32)

    # Edges stay within each graph (nodes 0..255 -> graph 0, 256..511 -> graph 1).
    half = N // 2
    src0 = jax.random.randint(ks[8], (E // 2,), 0, half)
    dst0 = jax.random.randint(ks[9], (E // 2,), 0, half)
    src1 = jax.random.randint(ks[10], (E // 2,), half, N)
    dst1 = jax.random.randint(ks[11], (E // 2,), half, N)
    edge_index = jnp.stack([jnp.concatenate([src0, src1]),
                            jnp.concatenate([dst0, dst1])]).astype(jnp.int32)
    batch = jnp.concatenate([jnp.zeros(half, jnp.int32),
                             jnp.ones(half, jnp.int32)])

    # tile=128 keeps the toy problem multi-tile (exercises cross-tile aggregation and the
    # first/last-of-row work-list paths); the production default is tile=256 for v6e/v7x.
    out = method_encoder(x, edge_index, batch, G, params, tile=128)
    jax.block_until_ready(out)
    assert out.shape == (G, HIDDEN) and out.dtype == jnp.float32
    assert bool(jnp.all(jnp.isfinite(out)))
    print("KERNEL_OK")
</pallas_src>

<mosaic_0001>
module attributes {stable_mosaic.version = 11 : i64} {
  func.func @ggc_kernel(%arg0: i32, %arg1: i32, %arg2: memref<8xi32, #tpu.memory_space<smem>>, %arg3: memref<8xi32, #tpu.memory_space<smem>>, %arg4: memref<8xi32, #tpu.memory_space<smem>>, %arg5: memref<8xi32, #tpu.memory_space<smem>>, %arg6: memref<512x256xbf16, #tpu.memory_space<vmem>>, %arg7: memref<256x128xbf16, #tpu.memory_space<vmem>>, %arg8: memref<1x128xf32, #tpu.memory_space<vmem>>, %arg9: memref<1x128xf32, #tpu.memory_space<vmem>>, %arg10: memref<1x128xf32, #tpu.memory_space<vmem>>, %arg11: memref<1x128x128xbf16, #tpu.memory_space<vmem>>, %arg12: memref<128x384xbf16, #tpu.memory_space<vmem>>, %arg13: memref<128x384xbf16, #tpu.memory_space<vmem>>, %arg14: memref<1x384xf32, #tpu.memory_space<vmem>>, %arg15: memref<1x128xf32, #tpu.memory_space<vmem>>, %arg16: memref<1x128x128xi8, #tpu.memory_space<vmem>>, %arg17: memref<8x128xbf16, #tpu.memory_space<vmem>>, %arg18: memref<8x128xf32, #tpu.memory_space<vmem>>, %arg19: memref<512x128xf32, #tpu.memory_space<vmem>>, %arg20: memref<512x128xbf16, #tpu.memory_space<vmem>>, %arg21: memref<128x128xf32, #tpu.memory_space<vmem>>, %arg22: memref<8x128x128xi8, #tpu.memory_space<vmem>>) attributes {dimension_semantics = [#tpu.dimension_semantics<arbitrary>, #tpu.dimension_semantics<arbitrary>], iteration_bounds = array<i64: 5, 8>, scalar_prefetch = 4 : i64, scratch_operands = 4 : i64, tpu.core_type = #tpu.core_type<tc>, window_params = [{pipeline_mode = #tpu.pipeline_mode<synchronous>, transform_indices = @transform_0, window_bounds = array<i64: 512, 256>}, {pipeline_mode = #tpu.pipeline_mode<synchronous>, transform_indices = @transform_1, window_bounds = array<i64: 256, 128>}, {pipeline_mode = #tpu.pipeline_mode<synchronous>, transform_indices = @transform_2, window_bounds = array<i64: 1, 128>}, {pipeline_mode = #tpu.pipeline_mode<synchronous>, transform_indices = @transform_3, window_bounds = array<i64: 1, 128>}, {pipeline_mode = #tpu.pipeline_mode<synchronous>, transform_indices = @transform_4, window_bounds = array<i64: 1, 128>}, {transform_indices = @transform_5, window_bounds = array<i64: 1, 128, 128>}, {pipeline_mode = #tpu.pipeline_mode<synchronous>, transform_indices = @transform_6, window_bounds = array<i64: 128, 384>}, {pipeline_mode = #tpu.pipeline_mode<synchronous>, transform_indices = @transform_7, window_bounds = array<i64: 128, 384>}, {pipeline_mode = #tpu.pipeline_mode<synchronous>, transform_indices = @transform_8, window_bounds = array<i64: 1, 384>}, {pipeline_mode = #tpu.pipeline_mode<synchronous>, transform_indices = @transform_9, window_bounds = array<i64: 1, 128>}, {transform_indices = @transform_10, window_bounds = array<i64: 1, 128, 128>}, {transform_indices = @transform_11, window_bounds = array<i64: 8, 128>}, {pipeline_mode = #tpu.pipeline_mode<synchronous>, transform_indices = @transform_12, window_bounds = array<i64: 8, 128>}]} {
    %0 = arith.index_cast %arg1 : i32 to index
    %1 = memref.load %arg2[%0] : memref<8xi32, #tpu.memory_space<smem>>
    %c128_i32 = arith.constant 128 : i32
    %2 = arith.muli %1, %c128_i32 : i32
    %3 = tpu.assume_multiple %2, 128 : i32
    %4 = arith.index_cast %arg1 : i32 to index
    %5 = memref.load %arg3[%4] : memref<8xi32, #tpu.memory_space<smem>>
    %c128_i32_0 = arith.constant 128 : i32
    %6 = arith.muli %5, %c128_i32_0 : i32
    %7 = tpu.assume_multiple %6, 128 : i32
    %c0_i32 = arith.constant 0 : i32
    %8 = arith.cmpi eq, %arg0, %c0_i32 : i32
    %c0_i32_1 = arith.constant 0 : i32
    %9 = arith.cmpi eq, %arg1, %c0_i32_1 : i32
    %10 = arith.andi %8, %9 : i1
    %11 = arith.extui %10 : i1 to i32
    %c0_i32_2 = arith.constant 0 : i32
    %12 = arith.cmpi ne, %11, %c0_i32_2 : i32
    scf.if %12 {
      %cst_18 = arith.constant 0.000000e+00 : f32
      %47 = vector.broadcast %cst_18 : f32 to vector<8x128xf32>
      %c0_19 = arith.constant 0 : index
      %c0_20 = arith.constant 0 : index
      %48 = vector.load %arg18[%c0_19, %c0_20] : memref<8x128xf32, #tpu.memory_space<vmem>>, vector<8x128xf32>
      tpu.vector_store %arg18[%c0_19, %c0_20], %47 {strides = array<i32>} : memref<8x128xf32, #tpu.memory_space<vmem>>, vector<8x128xf32>,
      %c0_i32_21 = arith.constant 0 : i32
      %c4_i32_22 = arith.constant 4 : i32
      %49 = arith.addi %c0_i32_21, %c4_i32_22 : i32
      %c1_i32_23 = arith.constant 1 : i32
      scf.for %arg23 = %c0_i32_21 to %49 step %c1_i32_23  : i32 {
        %c128_i32_25 = arith.constant 128 : i32
        %50 = arith.muli %arg23, %c128_i32_25 : i32
        %51 = tpu.assume_multiple %50, 128 : i32
        %52 = arith.index_cast %51 : i32 to index
        %c0_26 = arith.constant 0 : index
        %53 = vector.load %arg6[%52, %c0_26] : memref<512x256xbf16, #tpu.memory_space<vmem>>, vector<128x256xbf16>
        %c0_27 = arith.constant 0 : index
        %c0_28 = arith.constant 0 : index
        %54 = vector.load %arg7[%c0_27, %c0_28] : memref<256x128xbf16, #tpu.memory_space<vmem>>, vector<256x128xbf16>
        %cst_29 = arith.constant dense<0.000000e+00> : vector<128x128xf32>
        %55 = tpu.matmul %53, %54, %cst_29 {dimension_numbers = #tpu.dot_dimension_numbers<[1], [0], [0], [1], [0, 0, 1, 1], [], []>} : vector<128x256xbf16>, vector<256x128xbf16>, vector<128x128xf32> -> vector<128x128xf32>
        %c0_30 = arith.constant 0 : index
        %c0_31 = arith.constant 0 : index
        %56 = vector.load %arg8[%c0_30, %c0_31] : memref<1x128xf32, #tpu.memory_space<vmem>>, vector<1x128xf32>
        %57 = vector.broadcast %56 : vector<1x128xf32> to vector<128x128xf32>
        %58 = arith.addf %55, %57 : vector<128x128xf32>
        %cst_32 = arith.constant 0.000000e+00 : f32
        %59 = vector.broadcast %cst_32 : f32 to vector<128x128xf32>
        %60 = arith.maximumf %58, %59 : vector<128x128xf32>
        %c0_33 = arith.constant 0 : index
        %c0_34 = arith.constant 0 : index
        %61 = vector.load %arg9[%c0_33, %c0_34] : memref<1x128xf32, #tpu.memory_space<vmem>>, vector<1x128xf32>
        %c0_35 = arith.constant 0 : index
        %c0_36 = arith.constant 0 : index
        %62 = vector.load %arg10[%c0_35, %c0_36] : memref<1x128xf32, #tpu.memory_space<vmem>>, vector<1x128xf32>
        %cst_37 = arith.constant dense<0.000000e+00> : vector<128xf32>
        %63 = vector.multi_reduction <add>, %60, %cst_37 [1] : vector<128x128xf32> to vector<128xf32>
        %64 = vector.shape_cast %63 : vector<128xf32> to vector<128x1xf32>
        %cst_38 = arith.constant 1.280000e+02 : f32
        %65 = vector.broadcast %cst_38 : f32 to vector<128x1xf32>
        %66 = arith.divf %64, %65 : vector<128x1xf32>
        %67 = vector.broadcast %66 : vector<128x1xf32> to vector<128x128xf32>
        %68 = arith.subf %60, %67 : vector<128x128xf32>
        %69 = arith.mulf %68, %68 : vector<128x128xf32>
        %cst_39 = arith.constant dense<0.000000e+00> : vector<128xf32>
        %70 = vector.multi_reduction <add>, %69, %cst_39 [1] : vector<128x128xf32> to vector<128xf32>
        %71 = vector.shape_cast %70 : vector<128xf32> to vector<128x1xf32>
        %cst_40 = arith.constant 1.280000e+02 : f32
        %72 = vector.broadcast %cst_40 : f32 to vector<128x1xf32>
        %73 = arith.divf %71, %72 : vector<128x1xf32>
        %74 = vector.broadcast %66 : vector<128x1xf32> to vector<128x128xf32>
        %75 = arith.subf %60, %74 : vector<128x128xf32>
        %cst_41 = arith.constant 9.99999974E-6 : f32
        %76 = vector.broadcast %cst_41 : f32 to vector<128x1xf32>
        %77 = arith.addf %73, %76 : vector<128x1xf32>
        %78 = math.rsqrt %77 : vector<128x1xf32>
        %79 = vector.broadcast %78 : vector<128x1xf32> to vector<128x128xf32>
        %80 = arith.mulf %75, %79 : vector<128x128xf32>
        %81 = vector.broadcast %61 : vector<1x128xf32> to vector<128x128xf32>
        %82 = arith.mulf %80, %81 : vector<128x128xf32>
        %83 = vector.broadcast %62 : vector<1x128xf32> to vector<128x128xf32>
        %84 = arith.addf %82, %83 : vector<128x128xf32>
        %85 = arith.index_cast %51 : i32 to index
        %c0_42 = arith.constant 0 : index
        %86 = vector.load %arg19[%85, %c0_42] : memref<512x128xf32, #tpu.memory_space<vmem>>, vector<128x128xf32>
        tpu.vector_store %arg19[%85, %c0_42], %84 {strides = array<i32>} : memref<512x128xf32, #tpu.memory_space<vmem>>, vector<128x128xf32>,
      }
      %c4_i32_24 = arith.constant 4 : i32
    } else {
    }
    %c0_i32_3 = arith.constant 0 : i32
    %13 = arith.cmpi eq, %arg1, %c0_i32_3 : i32
    %14 = arith.extui %13 : i1 to i32
    %c0_i32_4 = arith.constant 0 : i32
    %15 = arith.cmpi ne, %14, %c0_i32_4 : i32
    scf.if %15 {
      %c0_i32_18 = arith.constant 0 : i32
      %c4_i32_19 = arith.constant 4 : i32
      %47 = arith.addi %c0_i32_18, %c4_i32_19 : i32
      %c1_i32_20 = arith.constant 1 : i32
      scf.for %arg23 = %c0_i32_18 to %47 step %c1_i32_20  : i32 {
        %c128_i32_22 = arith.constant 128 : i32
        %48 = arith.muli %arg23, %c128_i32_22 : i32
        %49 = tpu.assume_multiple %48, 128 : i32
        %50 = arith.index_cast %49 : i32 to index
        %c0_23 = arith.constant 0 : index
        %51 = vector.load %arg19[%50, %c0_23] : memref<512x128xf32, #tpu.memory_space<vmem>>, vector<128x128xf32>
        %52 = arith.truncf %51 : vector<128x128xf32> to vector<128x128xbf16>
        %c0_24 = arith.constant 0 : index
        %c0_25 = arith.constant 0 : index
        %c0_26 = arith.constant 0 : index
        %53 = vector.load %arg11[%c0_24, %c0_25, %c0_26] : memref<1x128x128xbf16, #tpu.memory_space<vmem>>, vector<1x128x128xbf16>
        %54 = vector.shape_cast %53 : vector<1x128x128xbf16> to vector<128x128xbf16>
        %cst_27 = arith.constant dense<0.000000e+00> : vector<128x128xf32>
        %55 = tpu.matmul %52, %54, %cst_27 {dimension_numbers = #tpu.dot_dimension_numbers<[1], [0], [0], [1], [0, 0, 1, 1], [], []>} : vector<128x128xbf16>, vector<128x128xbf16>, vector<128x128xf32> -> vector<128x128xf32>
        %56 = arith.truncf %55 : vector<128x128xf32> to vector<128x128xbf16>
        %57 = arith.index_cast %49 : i32 to index
        %c0_28 = arith.constant 0 : index
        %58 = vector.load %arg20[%57, %c0_28] : memref<512x128xbf16, #tpu.memory_space<vmem>>, vector<128x128xbf16>
        tpu.vector_store %arg20[%57, %c0_28], %56 {strides = array<i32>} : memref<512x128xbf16, #tpu.memory_space<vmem>>, vector<128x128xbf16>,
      }
      %c4_i32_21 = arith.constant 4 : i32
    } else {
    }
    %c0_i32_5 = arith.constant 0 : i32
    %16 = arith.cmpi eq, %arg0, %c0_i32_5 : i32
    %17 = arith.extui %16 : i1 to i32
    %c0_i32_6 = arith.constant 0 : i32
    %18 = arith.cmpi ne, %17, %c0_i32_6 : i32
    scf.if %18 {
      %c0_18 = arith.constant 0 : index
      %c0_19 = arith.constant 0 : index
      %c0_20 = arith.constant 0 : index
      %47 = vector.load %arg16[%c0_18, %c0_19, %c0_20] : memref<1x128x128xi8, #tpu.memory_space<vmem>>, vector<1x128x128xi8>
      %48 = vector.shape_cast %47 : vector<1x128x128xi8> to vector<128x128xi8>
      %49 = arith.index_cast %arg1 : i32 to index
      %c0_21 = arith.constant 0 : index
      %c0_22 = arith.constant 0 : index
      %50 = vector.load %arg22[%49, %c0_21, %c0_22] : memref<8x128x128xi8, #tpu.memory_space<vmem>>, vector<1x128x128xi8>
      %51 = vector.shape_cast %50 : vector<1x128x128xi8> to vector<128x128xi8>
      %52 = vector.shape_cast %48 : vector<128x128xi8> to vector<1x128x128xi8>
      tpu.vector_store %arg22[%49, %c0_21, %c0_22], %52 {strides = array<i32>} : memref<8x128x128xi8, #tpu.memory_space<vmem>>, vector<1x128x128xi8>,
    } else {
    }
    %19 = arith.index_cast %arg1 : i32 to index
    %c0 = arith.constant 0 : index
    %c0_7 = arith.constant 0 : index
    %20 = vector.load %arg22[%19, %c0, %c0_7] : memref<8x128x128xi8, #tpu.memory_space<vmem>>, vector<1x128x128xi8>
    %21 = vector.shape_cast %20 : vector<1x128x128xi8> to vector<128x128xi8>
    %22 = arith.index_cast %arg1 : i32 to index
    %23 = memref.load %arg4[%22] : memref<8xi32, #tpu.memory_space<smem>>
    %c1_i32 = arith.constant 1 : i32
    %24 = arith.cmpi eq, %23, %c1_i32 : i32
    %25 = arith.extui %24 : i1 to i32
    %c0_i32_8 = arith.constant 0 : i32
    %26 = arith.cmpi ne, %25, %c0_i32_8 : i32
    scf.if %26 {
      %cst_18 = arith.constant 0.000000e+00 : f32
      %47 = vector.broadcast %cst_18 : f32 to vector<128x128xf32>
      %c0_19 = arith.constant 0 : index
      %c0_20 = arith.constant 0 : index
      %48 = vector.load %arg21[%c0_19, %c0_20] : memref<128x128xf32, #tpu.memory_space<vmem>>, vector<128x128xf32>
      tpu.vector_store %arg21[%c0_19, %c0_20], %47 {strides = array<i32>} : memref<128x128xf32, #tpu.memory_space<vmem>>, vector<128x128xf32>,
    } else {
    }
    %c0_9 = arith.constant 0 : index
    %c0_10 = arith.constant 0 : index
    %27 = vector.load %arg21[%c0_9, %c0_10] : memref<128x128xf32, #tpu.memory_space<vmem>>, vector<128x128xf32>
    %28 = arith.sitofp %21 : vector<128x128xi8> to vector<128x128xf32>
    %29 = arith.truncf %28 : vector<128x128xf32> to vector<128x128xbf16>
    %30 = arith.index_cast %7 : i32 to index
    %c0_11 = arith.constant 0 : index
    %31 = vector.load %arg20[%30, %c0_11] : memref<512x128xbf16, #tpu.memory_space<vmem>>, vector<128x128xbf16>
    %cst = arith.constant dense<0.000000e+00> : vector<128x128xf32>
    %32 = tpu.matmul %29, %31, %cst {dimension_numbers = #tpu.dot_dimension_numbers<[1], [0], [0], [1], [0, 0, 1, 1], [], []>} : vector<128x128xbf16>, vector<128x128xbf16>, vector<128x128xf32> -> vector<128x128xf32>
    %33 = arith.addf %27, %32 : vector<128x128xf32>
    %c0_12 = arith.constant 0 : index
    %c0_13 = arith.constant 0 : index
    %34 = vector.load %arg21[%c0_12, %c0_13] : memref<128x128xf32, #tpu.memory_space<vmem>>, vector<128x128xf32>
    tpu.vector_store %arg21[%c0_12, %c0_13], %33 {strides = array<i32>} : memref<128x128xf32, #tpu.memory_space<vmem>>, vector<128x128xf32>,
    %35 = arith.index_cast %arg1 : i32 to index
    %36 = memref.load %arg5[%35] : memref<8xi32, #tpu.memory_space<smem>>
    %c1_i32_14 = arith.constant 1 : i32
    %37 = arith.cmpi eq, %36, %c1_i32_14 : i32
    %38 = arith.extui %37 : i1 to i32
    %c0_i32_15 = arith.constant 0 : i32
    %39 = arith.cmpi ne, %38, %c0_i32_15 : i32
    scf.if %39 {
      %47 = arith.index_cast %3 : i32 to index
      %c0_18 = arith.constant 0 : index
      %48 = vector.load %arg19[%47, %c0_18] : memref<512x128xf32, #tpu.memory_space<vmem>>, vector<128x128xf32>
      %c0_19 = arith.constant 0 : index
      %c0_20 = arith.constant 0 : index
      %49 = vector.load %arg21[%c0_19, %c0_20] : memref<128x128xf32, #tpu.memory_space<vmem>>, vector<128x128xf32>
      %50 = arith.truncf %49 : vector<128x128xf32> to vector<128x128xbf16>
      %c0_21 = arith.constant 0 : index
      %c0_22 = arith.constant 0 : index
      %51 = vector.load %arg12[%c0_21, %c0_22] : memref<128x384xbf16, #tpu.memory_space<vmem>>, vector<128x384xbf16>
      %cst_23 = arith.constant dense<0.000000e+00> : vector<128x384xf32>
      %52 = tpu.matmul %50, %51, %cst_23 {dimension_numbers = #tpu.dot_dimension_numbers<[1], [0], [0], [1], [0, 0, 1, 1], [], []>} : vector<128x128xbf16>, vector<128x384xbf16>, vector<128x384xf32> -> vector<128x384xf32>
      %c0_24 = arith.constant 0 : index
      %c0_25 = arith.constant 0 : index
      %53 = vector.load %arg14[%c0_24, %c0_25] : memref<1x384xf32, #tpu.memory_space<vmem>>, vector<1x384xf32>
      %54 = vector.broadcast %53 : vector<1x384xf32> to vector<128x384xf32>
      %55 = arith.addf %52, %54 : vector<128x384xf32>
      %56 = arith.truncf %48 : vector<128x128xf32> to vector<128x128xbf16>
      %c0_26 = arith.constant 0 : index
      %c0_27 = arith.constant 0 : index
      %57 = vector.load %arg13[%c0_26, %c0_27] : memref<128x384xbf16, #tpu.memory_space<vmem>>, vector<128x384xbf16>
      %cst_28 = arith.constant dense<0.000000e+00> : vector<128x384xf32>
      %58 = tpu.matmul %56, %57, %cst_28 {dimension_numbers = #tpu.dot_dimension_numbers<[1], [0], [0], [1], [0, 0, 1, 1], [], []>} : vector<128x128xbf16>, vector<128x384xbf16>, vector<128x384xf32> -> vector<128x384xf32>
      %59 = vector.extract_strided_slice %55 {offsets = [0, 0], sizes = [128, 256], strides = [1, 1]} : vector<128x384xf32> to vector<128x256xf32>
      %60 = vector.extract_strided_slice %58 {offsets = [0, 0], sizes = [128, 256], strides = [1, 1]} : vector<128x384xf32> to vector<128x256xf32>
      %61 = arith.addf %59, %60 : vector<128x256xf32>
      %62 = arith.negf %61 : vector<128x256xf32>
      %63 = math.exp %62 : vector<128x256xf32>
      %cst_29 = arith.constant 1.000000e+00 : f32
      %64 = vector.broadcast %cst_29 : f32 to vector<128x256xf32>
      %65 = arith.addf %64, %63 : vector<128x256xf32>
      %66 = arith.divf %64, %65 : vector<128x256xf32>
      %67 = vector.extract_strided_slice %66 {offsets = [0, 0], sizes = [128, 128], strides = [1, 1]} : vector<128x256xf32> to vector<128x128xf32>
      %68 = vector.extract_strided_slice %66 {offsets = [0, 128], sizes = [128, 128], strides = [1, 1]} : vector<128x256xf32> to vector<128x128xf32>
      %69 = vector.extract_strided_slice %55 {offsets = [0, 256], sizes = [128, 128], strides = [1, 1]} : vector<128x384xf32> to vector<128x128xf32>
      %70 = vector.extract_strided_slice %58 {offsets = [0, 256], sizes = [128, 128], strides = [1, 1]} : vector<128x384xf32> to vector<128x128xf32>
      %c0_30 = arith.constant 0 : index
      %c0_31 = arith.constant 0 : index
      %71 = vector.load %arg15[%c0_30, %c0_31] : memref<1x128xf32, #tpu.memory_space<vmem>>, vector<1x128xf32>
      %72 = vector.broadcast %71 : vector<1x128xf32> to vector<128x128xf32>
      %73 = arith.addf %70, %72 : vector<128x128xf32>
      %74 = arith.mulf %67, %73 : vector<128x128xf32>
      %75 = arith.addf %69, %74 : vector<128x128xf32>
      %76 = math.tanh %75 : vector<128x128xf32>
      %cst_32 = arith.constant 1.000000e+00 : f32
      %77 = vector.broadcast %cst_32 : f32 to vector<128x128xf32>
      %78 = arith.subf %77, %68 : vector<128x128xf32>
      %79 = arith.mulf %78, %76 : vector<128x128xf32>
      %80 = arith.mulf %68, %48 : vector<128x128xf32>
      %81 = arith.addf %79, %80 : vector<128x128xf32>
      %82 = arith.index_cast %3 : i32 to index
      %c0_33 = arith.constant 0 : index
      %83 = vector.load %arg19[%82, %c0_33] : memref<512x128xf32, #tpu.memory_space<vmem>>, vector<128x128xf32>
      tpu.vector_store %arg19[%82, %c0_33], %81 {strides = array<i32>} : memref<512x128xf32, #tpu.memory_space<vmem>>, vector<128x128xf32>,
    } else {
    }
    %c4_i32 = arith.constant 4 : i32
    %40 = arith.cmpi eq, %arg0, %c4_i32 : i32
    %41 = arith.index_cast %arg1 : i32 to index
    %42 = memref.load %arg5[%41] : memref<8xi32, #tpu.memory_space<smem>>
    %c1_i32_16 = arith.constant 1 : i32
    %43 = arith.cmpi eq, %42, %c1_i32_16 : i32
    %44 = arith.andi %40, %43 : i1
    %45 = arith.extui %44 : i1 to i32
    %c0_i32_17 = arith.constant 0 : i32
    %46 = arith.cmpi ne, %45, %c0_i32_17 : i32
    scf.if %46 {
      %47 = arith.index_cast %3 : i32 to index
      %c0_18 = arith.constant 0 : index
      %48 = vector.load %arg19[%47, %c0_18] : memref<512x128xf32, #tpu.memory_space<vmem>>, vector<128x128xf32>
      %c0_19 = arith.constant 0 : index
      %c0_20 = arith.constant 0 : index
      %49 = vector.load %arg9[%c0_19, %c0_20] : memref<1x128xf32, #tpu.memory_space<vmem>>, vector<1x128xf32>
      %c0_21 = arith.constant 0 : index
      %c0_22 = arith.constant 0 : index
      %50 = vector.load %arg10[%c0_21, %c0_22] : memref<1x128xf32, #tpu.memory_space<vmem>>, vector<1x128xf32>
      %cst_23 = arith.constant dense<0.000000e+00> : vector<128xf32>
      %51 = vector.multi_reduction <add>, %48, %cst_23 [1] : vector<128x128xf32> to vector<128xf32>
      %52 = vector.shape_cast %51 : vector<128xf32> to vector<128x1xf32>
      %cst_24 = arith.constant 1.280000e+02 : f32
      %53 = vector.broadcast %cst_24 : f32 to vector<128x1xf32>
      %54 = arith.divf %52, %53 : vector<128x1xf32>
      %55 = vector.broadcast %54 : vector<128x1xf32> to vector<128x128xf32>
      %56 = arith.subf %48, %55 : vector<128x128xf32>
      %57 = arith.mulf %56, %56 : vector<128x128xf32>
      %cst_25 = arith.constant dense<0.000000e+00> : vector<128xf32>
      %58 = vector.multi_reduction <add>, %57, %cst_25 [1] : vector<128x128xf32> to vector<128xf32>
      %59 = vector.shape_cast %58 : vector<128xf32> to vector<128x1xf32>
      %cst_26 = arith.constant 1.280000e+02 : f32
      %60 = vector.broadcast %cst_26 : f32 to vector<128x1xf32>
      %61 = arith.divf %59, %60 : vector<128x1xf32>
      %62 = vector.broadcast %54 : vector<128x1xf32> to vector<128x128xf32>
      %63 = arith.subf %48, %62 : vector<128x128xf32>
      %cst_27 = arith.constant 9.99999974E-6 : f32
      %64 = vector.broadcast %cst_27 : f32 to vector<128x1xf32>
      %65 = arith.addf %61, %64 : vector<128x1xf32>
      %66 = math.rsqrt %65 : vector<128x1xf32>
      %67 = vector.broadcast %66 : vector<128x1xf32> to vector<128x128xf32>
      %68 = arith.mulf %63, %67 : vector<128x128xf32>
      %69 = vector.broadcast %49 : vector<1x128xf32> to vector<128x128xf32>
      %70 = arith.mulf %68, %69 : vector<128x128xf32>
      %71 = vector.broadcast %50 : vector<1x128xf32> to vector<128x128xf32>
      %72 = arith.addf %70, %71 : vector<128x128xf32>
      %c0_28 = arith.constant 0 : index
      %c0_29 = arith.constant 0 : index
      %73 = vector.load %arg18[%c0_28, %c0_29] : memref<8x128xf32, #tpu.memory_space<vmem>>, vector<8x128xf32>
      %c0_30 = arith.constant 0 : index
      %c0_31 = arith.constant 0 : index
      %74 = vector.load %arg17[%c0_30, %c0_31] : memref<8x128xbf16, #tpu.memory_space<vmem>>, vector<8x128xbf16>
      %75 = arith.truncf %72 : vector<128x128xf32> to vector<128x128xbf16>
      %cst_32 = arith.constant dense<0.000000e+00> : vector<8x128xf32>
      %76 = tpu.matmul %74, %75, %cst_32 {dimension_numbers = #tpu.dot_dimension_numbers<[1], [0], [0], [1], [0, 0, 1, 1], [], []>} : vector<8x128xbf16>, vector<128x128xbf16>, vector<8x128xf32> -> vector<8x128xf32>
      %77 = arith.addf %73, %76 : vector<8x128xf32>
      %c0_33 = arith.constant 0 : index
      %c0_34 = arith.constant 0 : index
      %78 = vector.load %arg18[%c0_33, %c0_34] : memref<8x128xf32, #tpu.memory_space<vmem>>, vector<8x128xf32>
      tpu.vector_store %arg18[%c0_33, %c0_34], %77 {strides = array<i32>} : memref<8x128xf32, #tpu.memory_space<vmem>>, vector<8x128xf32>,
    } else {
    }
    return
  }
  func.func @transform_0(%arg0: i32, %arg1: i32, %arg2: memref<8xi32, #tpu.memory_space<smem>>, %arg3: memref<8xi32, #tpu.memory_space<smem>>, %arg4: memref<8xi32, #tpu.memory_space<smem>>, %arg5: memref<8xi32, #tpu.memory_space<smem>>) -> (i32, i32) {
    %c0_i32 = arith.constant 0 : i32
    %c0_i32_0 = arith.constant 0 : i32
    %c0_i32_1 = arith.constant 0 : i32
    return %c0_i32, %c0_i32_0 : i32, i32
  }
  func.func @transform_1(%arg0: i32, %arg1: i32, %arg2: memref<8xi32, #tpu.memory_space<smem>>, %arg3: memref<8xi32, #tpu.memory_space<smem>>, %arg4: memref<8xi32, #tpu.memory_space<smem>>, %arg5: memref<8xi32, #tpu.memory_space<smem>>) -> (i32, i32) {
    %c0_i32 = arith.constant 0 : i32
    %c0_i32_0 = arith.constant 0 : i32
    %c0_i32_1 = arith.constant 0 : i32
    return %c0_i32, %c0_i32_0 : i32, i32
  }
  func.func @transform_2(%arg0: i32, %arg1: i32, %arg2: memref<8xi32, #tpu.memory_space<smem>>, %arg3: memref<8xi32, #tpu.memory_space<smem>>, %arg4: memref<8xi32, #tpu.memory_space<smem>>, %arg5: memref<8xi32, #tpu.memory_space<smem>>) -> (i32, i32) {
    %c0_i32 = arith.constant 0 : i32
    %c0_i32_0 = arith.constant 0 : i32
    %c0_i32_1 = arith.constant 0 : i32
    return %c0_i32, %c0_i32_0 : i32, i32
  }
  func.func @transform_3(%arg0: i32, %arg1: i32, %arg2: memref<8xi32, #tpu.memory_space<smem>>, %arg3: memref<8xi32, #tpu.memory_space<smem>>, %arg4: memref<8xi32, #tpu.memory_space<smem>>, %arg5: memref<8xi32, #tpu.memory_space<smem>>) -> (i32, i32) {
    %c0_i32 = arith.constant 0 : i32
    %c0_i32_0 = arith.constant 0 : i32
    %c0_i32_1 = arith.constant 0 : i32
    return %c0_i32, %c0_i32_0 : i32, i32
  }
  func.func @transform_4(%arg0: i32, %arg1: i32, %arg2: memref<8xi32, #tpu.memory_space<smem>>, %arg3: memref<8xi32, #tpu.memory_space<smem>>, %arg4: memref<8xi32, #tpu.memory_space<smem>>, %arg5: memref<8xi32, #tpu.memory_space<smem>>) -> (i32, i32) {
    %c0_i32 = arith.constant 0 : i32
    %c0_i32_0 = arith.constant 0 : i32
    %c0_i32_1 = arith.constant 0 : i32
    return %c0_i32, %c0_i32_0 : i32, i32
  }
  func.func @transform_5(%arg0: i32, %arg1: i32, %arg2: memref<8xi32, #tpu.memory_space<smem>>, %arg3: memref<8xi32, #tpu.memory_space<smem>>, %arg4: memref<8xi32, #tpu.memory_space<smem>>, %arg5: memref<8xi32, #tpu.memory_space<smem>>) -> (i32, i32, i32) {
    %c0_i32 = arith.constant 0 : i32
    %c0_i32_0 = arith.constant 0 : i32
    %c0_i32_1 = arith.constant 0 : i32
    return %arg0, %c0_i32, %c0_i32_0 : i32, i32, i32
  }
  func.func @transform_6(%arg0: i32, %arg1: i32, %arg2: memref<8xi32, #tpu.memory_space<smem>>, %arg3: memref<8xi32, #tpu.memory_space<smem>>, %arg4: memref<8xi32, #tpu.memory_space<smem>>, %arg5: memref<8xi32, #tpu.memory_space<smem>>) -> (i32, i32) {
    %c0_i32 = arith.constant 0 : i32
    %c0_i32_0 = arith.constant 0 : i32
    %c0_i32_1 = arith.constant 0 : i32
    return %c0_i32, %c0_i32_0 : i32, i32
  }
  func.func @transform_7(%arg0: i32, %arg1: i32, %arg2: memref<8xi32, #tpu.memory_space<smem>>, %arg3: memref<8xi32, #tpu.memory_space<smem>>, %arg4: memref<8xi32, #tpu.memory_space<smem>>, %arg5: memref<8xi32, #tpu.memory_space<smem>>) -> (i32, i32) {
    %c0_i32 = arith.constant 0 : i32
    %c0_i32_0 = arith.constant 0 : i32
    %c0_i32_1 = arith.constant 0 : i32
    return %c0_i32, %c0_i32_0 : i32, i32
  }
  func.func @transform_8(%arg0: i32, %arg1: i32, %arg2: memref<8xi32, #tpu.memory_space<smem>>, %arg3: memref<8xi32, #tpu.memory_space<smem>>, %arg4: memref<8xi32, #tpu.memory_space<smem>>, %arg5: memref<8xi32, #tpu.memory_space<smem>>) -> (i32, i32) {
    %c0_i32 = arith.constant 0 : i32
    %c0_i32_0 = arith.constant 0 : i32
    %c0_i32_1 = arith.constant 0 : i32
    return %c0_i32, %c0_i32_0 : i32, i32
  }
  func.func @transform_9(%arg0: i32, %arg1: i32, %arg2: memref<8xi32, #tpu.memory_space<smem>>, %arg3: memref<8xi32, #tpu.memory_space<smem>>, %arg4: memref<8xi32, #tpu.memory_space<smem>>, %arg5: memref<8xi32, #tpu.memory_space<smem>>) -> (i32, i32) {
    %c0_i32 = arith.constant 0 : i32
    %c0_i32_0 = arith.constant 0 : i32
    %c0_i32_1 = arith.constant 0 : i32
    return %c0_i32, %c0_i32_0 : i32, i32
  }
  func.func @transform_10(%arg0: i32, %arg1: i32, %arg2: memref<8xi32, #tpu.memory_space<smem>>, %arg3: memref<8xi32, #tpu.memory_space<smem>>, %arg4: memref<8xi32, #tpu.memory_space<smem>>, %arg5: memref<8xi32, #tpu.memory_space<smem>>) -> (i32, i32, i32) {
    %c0_i32 = arith.constant 0 : i32
    %0 = arith.cmpi eq, %arg0, %c0_i32 : i32
    %c7_i32 = arith.constant 7 : i32
    %1 = arith.select %0, %arg1, %c7_i32 : i32
    %c0_i32_0 = arith.constant 0 : i32
    %c0_i32_1 = arith.constant 0 : i32
    %c0_i32_2 = arith.constant 0 : i32
    return %1, %c0_i32_0, %c0_i32_1 : i32, i32, i32
  }
  func.func @transform_11(%arg0: i32, %arg1: i32, %arg2: memref<8xi32, #tpu.memory_space<smem>>, %arg3: memref<8xi32, #tpu.memory_space<smem>>, %arg4: memref<8xi32, #tpu.memory_space<smem>>, %arg5: memref<8xi32, #tpu.memory_space<smem>>) -> (i32, i32) {
    %c4_i32 = arith.constant 4 : i32
    %0 = arith.cmpi eq, %arg0, %c4_i32 : i32
    %1 = arith.index_cast %arg1 : i32 to index
    %2 = memref.load %arg2[%1] : memref<8xi32, #tpu.memory_space<smem>>
    %c0_i32 = arith.constant 0 : i32
    %3 = arith.select %0, %2, %c0_i32 : i32
    %c0_i32_0 = arith.constant 0 : i32
    %c0_i32_1 = arith.constant 0 : i32
    return %c0_i32_0, %3 : i32, i32
  }
  func.func @transform_12(%arg0: i32, %arg1: i32, %arg2: memref<8xi32, #tpu.memory_space<smem>>, %arg3: memref<8xi32, #tpu.memory_space<smem>>, %arg4: memref<8xi32, #tpu.memory_space<smem>>, %arg5: memref<8xi32, #tpu.memory_space<smem>>) -> (i32, i32) {
    %c0_i32 = arith.constant 0 : i32
    %c0_i32_0 = arith.constant 0 : i32
    %c0_i32_1 = arith.constant 0 : i32
    return %c0_i32, %c0_i32_0 : i32, i32
  }
}

</mosaic_0001>

<bundles_post_ra>
// kernel: tpu_custom_call.1
= control target key start
LH: loop header
LB: loop body
LE: loop exit
PB: predicated region body
PF: predicated region fallthrough
CT: control target
= control target key end

     0   :  { %s6249_s0 = inlined_call_operand.hbm [shape: s32[8], index: 0, kind: input, shape index: {}]   ;;  %s6250_s4 = inlined_call_operand.hbm [shape: bf16[512,256], index: 4, kind: input, shape index: {}]   ;;  %s6251_s5 = inlined_call_operand.hbm [shape: bf16[256,128], index: 5, kind: input, shape index: {}]   ;;  %s6252_s6 = inlined_call_operand.vmem [shape: f32[1,128], index: 6, kind: input, shape index: {}]   ;;  %s6253_s7 = inlined_call_operand.vmem [shape: f32[1,128], index: 7, kind: input, shape index: {}]   ;;  %s6254_s8 = inlined_call_operand.vmem [shape: f32[1,128], index: 8, kind: input, shape index: {}]   ;;  %s6255_s9 = inlined_call_operand.hbm [shape: bf16[5,128,128], index: 9, kind: input, shape index: {}]   ;;  %s6256_s10 = inlined_call_operand.hbm [shape: bf16[128,384], index: 10, kind: input, shape index: {}]   ;;  %s6257_s11 = inlined_call_operand.hbm [shape: bf16[128,384], index: 11, kind: input, shape index: {}]   ;;  %s6258_s12 = inlined_call_operand.vmem [shape: f32[1,384], index: 12, kind: input, shape index: {}]   ;;  %s6259_s13 = inlined_call_operand.vmem [shape: f32[1,128], index: 13, kind: input, shape index: {}]   ;;  %s6260_s14 = inlined_call_operand.hbm [shape: s8[8,128,128], index: 14, kind: input, shape index: {}]   ;;  %s6261_s15 = inlined_call_operand.vmem [shape: bf16[8,512], index: 15, kind: input, shape index: {}]   ;;  %s6262_s16 = inlined_call_operand.hbm [shape: f32[8,128], index: 16, kind: output, shape index: {}]   ;;  %s6263_s1 = inlined_call_operand.vmem [shape: s32[8], index: 1, kind: input, shape index: {}]   ;;  %s6264_s2 = inlined_call_operand.vmem [shape: s32[8], index: 2, kind: input, shape index: {}]   ;;  %s6265_s3 = inlined_call_operand.vmem [shape: s32[8], index: 3, kind: input, shape index: {}]  }
   0x1   :  { %6293 = sst [smem:[#allocation45_spill]] %s6249_s0 }
   0x2   :  { %6294 = sst [smem:[#allocation46_spill]] %s6250_s4  ;;  %s6305_s23 = sld [smem:[#allocation45_spill]] }
   0x3   :  { %6295 = sst [smem:[#allocation47_spill]] %s6251_s5 }
   0x4   :  { %6296 = sst [smem:[#allocation48_spill]] %s6252_s6 }
   0x5   :  { %6297 = sst [smem:[#allocation49_spill]] %s6253_s7 }
   0x6   :  { %6298 = sst [smem:[#allocation50_spill]] %s6254_s8 }
   0x7   :  { %6299 = sst [smem:[#allocation51_spill]] %s6255_s9 }
   0x8   :  { %6300 = sst [smem:[#allocation52_spill]] %s6256_s10 }
   0x9   :  { %6301 = sst [smem:[#allocation53_spill]] %s6258_s12 }
   0xa   :  { %6302 = sst [smem:[#allocation54_spill]] %s6259_s13  ;;  %s4374_s13 = scalar_lea.hbm %s6305_s23, 16 }
   0xb   :  { %6303 = sst [smem:[#allocation55_spill]] %s6261_s15  ;;  %p4375_p0 = scmp.ne.s32.totalorder %s6305_s23, %s4374_s13 }
   0xc   :  { %6304 = sst [smem:[#allocation56_spill]] %s6262_s16  ;;  %p4378_p1 = scmp.lt.u32.totalorder %s4374_s13, %s6305_s23 }
   0xe   :  { %p4380_p2 = pnand %p4378_p1, %p4375_p0 }
  0x10   :  { %4383 = shalt.err (!%p4380_p2)  }
  0x11   :  { %s4752_s28 = smov [#allocation7]   ;;  %s23_s18 = sshll.u32 %s6263_s1, 4  ;;  %s24_s18 = int_to_ptr.vmem [resolvable:$true] %s23_s18 }
  0x12   :  { %22 = dma.hbm_to_smem %s6305_s23, 16, %s4752_s28, [#allocation6] }
  0x13   :  { %s27_s21 = sshll.u32 %s6264_s2, 4  ;;  %s4384_s22 = scalar_lea.vmem %s24_s18, 16  ;;  %s28_s21 = int_to_ptr.vmem [resolvable:$true] %s27_s21 }
  0x14   :  { %p4385_p3 = scmp.ne.s32.totalorder %s24_s18, %s4384_s22  ;;  %p4389_p4 = scmp.lt.s32.totalorder %s24_s18, %s24_s18 }
  0x15   :  { %p4390_p5 = scmp.lt.s32.totalorder %s4384_s22, %s4384_s22 }
  0x17   :  { %p4391_p6 = por %p4390_p5, %p4389_p4 }
  0x19   :  { %p4392_p7 = pnand %p4391_p6, %p4385_p3 }
  0x1b   :  { %4395 = shalt.err (!%p4392_p7)  }
  0x1c   :  { %s4753_s13 = smov [#allocation8]   ;;  %s31_s25 = sshll.u32 %s6265_s3, 4  ;;  %s32_s25 = int_to_ptr.vmem [resolvable:$true] %s31_s25 }
  0x1d   :  { %26 = dma.vmem_to_smem %s24_s18, 16, %s4753_s13, [#allocation6] }
  0x1e   :  { %s4396_s1 = scalar_lea.vmem %s28_s21, 16  ;;  %p4401_p9 = scmp.lt.s32.totalorder %s28_s21, %s28_s21 }
  0x1f   :  { %p4397_p8 = scmp.ne.s32.totalorder %s28_s21, %s4396_s1  ;;  %p4402_p10 = scmp.lt.s32.totalorder %s4396_s1, %s4396_s1 }
  0x21   :  { %p4403_p11 = por %p4402_p10, %p4401_p9 }
  0x23   :  { %p4404_p12 = pnand %p4403_p11, %p4397_p8 }
  0x25   :  { %4407 = shalt.err (!%p4404_p12)  }
  0x26   :  { %s4754_s2 = smov [#allocation9]   ;;  %s4408_s26 = scalar_lea.vmem %s32_s25, 16 }
  0x27   :  { %30 = dma.vmem_to_smem %s28_s21, 16, %s4754_s2, [#allocation6] }
  0x28   :  { %p4409_p13 = scmp.ne.s32.totalorder %s32_s25, %s4408_s26  ;;  %p4413_p0 = scmp.lt.s32.totalorder %s32_s25, %s32_s25 }
  0x29   :  { %p4414_p1 = scmp.lt.s32.totalorder %s4408_s26, %s4408_s26 }
  0x2b   :  { %p4415_p2 = por %p4414_p1, %p4413_p0 }
  0x2d   :  { %p4416_p3 = pnand %p4415_p2, %p4409_p13 }
  0x2f   :  { %4419 = shalt.err (!%p4416_p3)  }
  0x30   :  { %s4755_s27 = smov [#allocation10]  }
  0x31   :  { %34 = dma.vmem_to_smem %s32_s25, 16, %s4755_s27, [#allocation6] }
  0x32   :  { %4670 = dma.done.wait [#allocation6], 64 }
  0x33   :  { %4671 = vsyncadd [#allocation6], 4294967232 }
  0x34   :  { %36 = sfence }
  0x35   :  { %37 = vsyncpa [#allocation12], 0 }
  0x36   :  { %38 = vsyncpa [#allocation15], 0 }
  0x37   :  { %39 = vsyncpa [#allocation19], 0 }
  0x38   :  { %40 = vsyncpa [#allocation13], 0  ;;  %s4880_s3 = smov 0   ;;  %s4882_s28 = smov 0  }
  0x39   :  { %s4884_s29 = smov 0   ;;  %s4886_s30 = smov 0  }
  0x3a   :  { %s4888_s0 = smov 0   ;;  %s4890_s17 = smov 0  }
  0x3b   :  { %s4892_s18 = smov 0   ;;  %s4894_s19 = smov 0  }
  0x3c   :  { %s4896_s20 = smov 0   ;;  %s4898_s21 = smov 0  }
  0x3d   :  { %s4900_s22 = smov 0  }
  0x3e LB: > { %6306 = sst [smem:[#allocation30_spill]] %s4726_s18  ;;  %s4932_s13 = sadd.s32 4294967295, %s4742_s22   ;;  %s4742_s22 = sphi %s4900_s22, %s46_s22   ;;  %s4738_s21 = sphi %s4898_s21, %s6392_s21   ;;  %s4734_s20 = sphi %s4896_s20, %s6391_s20   ;;  %s4730_s19 = sphi %s4894_s19, %s6390_s19   ;;  %s4726_s18 = sphi %s4892_s18, %s6389_s18   ;;  %s4722_s17 = sphi %s4890_s17, %s6388_s17   ;;  %s4718_s0 = sphi %s4888_s0, %s6387_s0   ;;  %s4714_s30 = sphi %s4886_s30, %s6386_s30   ;;  %s4710_s29 = sphi %s4884_s29, %s6385_s29   ;;  %s4706_s28 = sphi %s4882_s28, %s6384_s28   ;;  %s4702_s3 = sphi %s4880_s3, %s6383_s3  }
  0x3f   : > { %6307 = sst [smem:[#allocation31_spill]] %s4730_s19  ;;  %p183_p4 = scmp.ne.s32.totalorder %s4718_s0, %s4714_s30 }
  0x40   : > { %p6268_p5 = scmp.eq.s32.totalorder %s4932_s13, 0  ;;  %p297_p6 = scmp.ne.s32.totalorder %s4706_s28, %s4702_s3 }
  0x41   : > { %p3275_p7 = scmp.ge.s32.totalorder %s4742_s22, 1  ;;  %p361_p8 = scmp.lt.s32.totalorder %s4742_s22, 41 }
  0x42   : > { %p4941_p9 = por %p6268_p5, %p183_p4  ;;  %p4947_p10 = por %p297_p6, %p6268_p5 }
  0x43   : > { %p4951_p11 = pnand %p3275_p7, %p361_p8  ;;  %s4756_s1 = smov [#allocation11]  }
  0x44   : > { %s6308_s23 = scalar_select %p4941_p9, 1, 0 }
  0x45   : > { %s6309_s24 = scalar_select %p4947_p10, 1, 0 }
  0x46   : > { %s6311_s25 = scalar_select %p4951_p11, 1, 0 }
  0x47   : > { %6310 = sst [smem:[#allocation32_spill]] %s6309_s24  ;;  %p3883_p12 = pneg %p4951_p11 }
  0x48   : > { %s373_s2 = sshll.u32 %s4756_s1, 4  ;;  %s4757_s27 = smov [#allocation14]   ;;  %s374_s2 = int_to_ptr.vmem [resolvable:$true] %s373_s2 }
  0x49   : > { %p4959_p13 = pnand %p3883_p12, %p6268_p5  ;;  %s386_s3 = sshll.u32 %s4757_s27, 4  ;;  %s387_s3 = int_to_ptr.vmem [resolvable:$true] %s386_s3 }
  0x4a   : > { %s6313_s4 = sld [smem:[#allocation46_spill]] }
  0x4b   : > { %s6312_s26 = scalar_select %p4959_p13, 1, 0 }
  0x4c   : > { %p4971_p1 = pneg %p4959_p13 }
  0x50   : > { %s4420_s12 = scalar_lea.hbm %s6313_s4, 8192 }
  0x51   : > { %p4421_p0 = scmp.ne.s32.totalorder %s6313_s4, %s4420_s12  ;;  %p4427_p4 = scmp.lt.u32.totalorder %s4420_s12, %s6313_s4 }
  0x53   : > { %p4423_p2 = pnand %p4971_p1, %p4421_p0 }
  0x55   : > { %p4424_p3 = pneg %p4423_p2 }
  0x57   : > { %p4429_p6 = pnand %p4427_p4, %p4424_p3 }
  0x59   : > { %4432 = shalt.err (!%p4429_p6)
}
  0x5a   : > { %s4433_s16 = scalar_lea.vmem %s374_s2, 8192  ;;  %p4441_p5 = scmp.lt.s32.totalorder %s374_s2, %s374_s2 }
  0x5b   : > { %p4434_p7 = scmp.ne.s32.totalorder %s374_s2, %s4433_s16  ;;  %p4442_p10 = scmp.lt.s32.totalorder %s4433_s16, %s4433_s16 }
  0x5d   : > { %p4436_p8 = pnand %p4434_p7, %p4971_p1  ;;  %p4443_p9 = por %p4442_p10, %p4441_p5 }
  0x5f   : > { %p4437_p12 = pneg %p4436_p8 }
  0x61   : > { %p4444_p11 = pnand %p4443_p9, %p4437_p12 }
  0x63   : > { %4447 = shalt.err (!%p4444_p11)
}
  0x64   : > { %s6277_s7 = smov 128   ;;  %s6278_s8 = smov 8  }
  0x65   : > { %3886 = dma.hbm_to_vmem [thread:$0]  (!%p4959_p13), %s6313_s4, 8192, %s374_s2, [#allocation12], %s6277_s7, %s6277_s7, %s6278_s8  }
  0x66   : > { %s6315_s5 = sld [smem:[#allocation47_spill]] }
  0x6c   : > { %s4448_s30 = scalar_lea.hbm %s6315_s5, 2048 }
  0x6d   : > { %p4449_p5 = scmp.ne.s32.totalorder %s6315_s5, %s4448_s30  ;;  %p4455_p11 = scmp.lt.u32.totalorder %s4448_s30, %s6315_s5 }
  0x6f   : > { %p4451_p9 = pnand %p4449_p5, %p4971_p1 }
  0x71   : > { %p4452_p10 = pneg %p4451_p9 }
  0x73   : > { %p4457_p0 = pnand %p4455_p11, %p4452_p10 }
  0x75   : > { %4460 = shalt.err (!%p4457_p0)
}
  0x76   : > { %s4461_s6 = scalar_lea.vmem %s387_s3, 2048  ;;  %p4469_p6 = scmp.lt.s32.totalorder %s387_s3, %s387_s3 }
  0x77   : > { %p4462_p2 = scmp.ne.s32.totalorder %s387_s3, %s4461_s6  ;;  %p4470_p7 = scmp.lt.s32.totalorder %s4461_s6, %s4461_s6 }
  0x79   : > { %p4464_p3 = pnand %p4462_p2, %p4971_p1  ;;  %p4471_p8 = por %p4470_p7, %p4469_p6 }
  0x7b   : > { %p4465_p4 = pneg %p4464_p3 }
  0x7d   : > { %p4472_p12 = pnand %p4471_p8, %p4465_p4 }
  0x7f   : > { %4475 = shalt.err (!%p4472_p12)
}
  0x80   : > { %s6279_s18 = smov 64   ;;  %s6280_s19 = smov 4  }
  0x81   : > { %3889 = dma.hbm_to_vmem [thread:$0]  (!%p4959_p13), %s6315_s5, 2048, %s387_s3, [#allocation15], %s6279_s18, %s6279_s18, %s6280_s19  }
  0x82   : > { %p177_p5 = scmp.ne.s32.totalorder %s4722_s17, %s4718_s0  ;;  %p6282_p9 = scmp.eq.s32.totalorder %s4742_s22, 0 }
  0x83   : > { %p6281_p10 = scmp.lt.s32.totalorder %s4742_s22, 40  ;;  %s441_s12 = sand.u32 1, %s4742_s22  }
  0x84   : > { %s443_s15 = sand.u32 1, %s4722_s17   ;;  %p179_p11 = por %p6282_p9, %p177_p5 }
  0x85   : > { %s3281_s27 = sshll.u32 %s443_s15, 6  ;;  %s3441_s30 = sshll.u32 %s4738_s21, 10 }
  0x86   : > { %s6316_s9 = sld [smem:[#allocation51_spill]]  ;;  %s445_s8 = scalar_lea.vmem [#allocation16], %s3281_s27 }
  0x87   : > { %s452_s3 = sshll.u32 %s445_s8, 4  ;;  %p5027_p0 = pnand %p6281_p10, %p179_p11  ;;  %s5031_s3 = int_to_ptr.vmem [resolvable:$true] %s452_s3 }
  0x88   : > { %s4762_s2 = smov [#allocation17]  }
  0x89   : > { %s5033_s15 = sshll.u32 %s4762_s2, 4  ;;  %p4478_p3 = pneg %p5027_p0  ;;  %s409_s15 = int_to_ptr.vmem [resolvable:$true] %s5033_s15 }
  0x8c   : > { %s5023_s7 = scalar_lea.hbm %s6316_s9, %s3441_s30  ;;  %s5035_s30 = scalar_lea.sflag [#allocation12], %s441_s12 }
  0x8d   : > { %s4476_s16 = scalar_lea.hbm %s5023_s7, 1024  ;;  %s4481_s6 = scalar_lea.hbm %s6316_s9, 5120 }
  0x8e   : > { %p4477_p2 = scmp.ne.s32.totalorder %s5023_s7, %s4476_s16  ;;  %p4482_p7 = scmp.lt.u32.totalorder %s5023_s7, %s6316_s9 }
  0x8f   : > { %p4483_p8 = scmp.lt.u32.totalorder %s4481_s6, %s4476_s16  ;;  %p4485_p5 = scmp.lt.u32.totalorder %s4476_s16, %s5023_s7 }
  0x90   : > { %p4479_p4 = pnand %p4478_p3, %p4477_p2 }
  0x91   : > { %p4484_p12 = por %p4483_p8, %p4482_p7 }
  0x92   : > { %p4480_p6 = pneg %p4479_p4 }
  0x93   : > { %p4486_p11 = por %p4485_p5, %p4484_p12 }
  0x95   : > { %p4487_p10 = pnand %p4486_p11, %p4480_p6 }
  0x97   : > { %4490 = shalt.err (!%p4487_p10)
}
  0x98   : > { %s4491_s12 = scalar_lea.vmem %s5031_s3, 1024  ;;  %s4763_s2 = smov [#allocation16]  }
  0x99   : > { %p4492_p2 = scmp.ne.s32.totalorder %s5031_s3, %s4491_s12  ;;  %s4496_s8 = sshll.u32 %s4763_s2, 4  ;;  %s4497_s8 = int_to_ptr.vmem [resolvable:$false] %s4496_s8 }
  0x9a   : > { %s4498_s18 = scalar_lea.vmem %s4497_s8, 2048  ;;  %p4499_p13 = scmp.lt.s32.totalorder %s5031_s3, %s4497_s8 }
  0x9b   : > { %p4494_p4 = pnand %p4492_p2, %p4478_p3  ;;  %p4500_p7 = scmp.lt.s32.totalorder %s4498_s18, %s4491_s12 }
  0x9d   : > { %p4495_p9 = pneg %p4494_p4  ;;  %p4501_p8 = por %p4500_p7, %p4499_p13 }
  0x9f   : > { %p4502_p12 = pnand %p4501_p8, %p4495_p9 }
  0xa1   : > { %4505 = shalt.err (!%p4502_p12)
}
  0xa2   : > { %s6318_s19 = smov 4   ;;  %s6319_s16 = smov 64  }
  0xa3   : > { %3899 = dma.hbm_to_vmem [thread:$0]  (!%p5027_p0), %s5023_s7, 1024, %s5031_s3, %s5035_s30, %s6319_s16, %s6319_s16, %s6318_s19  }
  0xa4   : > { %s6320_s10 = sld [smem:[#allocation52_spill]] }
  0xaa   : > { %s4506_s2 = scalar_lea.hbm %s6320_s10, 3072 }
  0xab   : > { %p4507_p13 = scmp.ne.s32.totalorder %s6320_s10, %s4506_s2  ;;  %p4513_p3 = scmp.lt.u32.totalorder %s4506_s2, %s6320_s10 }
  0xad   : > { %p4509_p9 = pnand %p4507_p13, %p4971_p1 }
  0xaf   : > { %p4510_p10 = pneg %p4509_p9 }
  0xb1   : > { %p4515_p6 = pnand %p4513_p3, %p4510_p10 }
  0xb3   : > { %4518 = shalt.err (!%p4515_p6)
}
  0xb4   : > { %s4519_s4 = scalar_lea.vmem %s409_s15, 3072  ;;  %p4527_p2 = scmp.lt.s32.totalorder %s409_s15, %s409_s15 }
  0xb5   : > { %p4520_p0 = scmp.ne.s32.totalorder %s409_s15, %s4519_s4  ;;  %p4528_p4 = scmp.lt.s32.totalorder %s4519_s4, %s4519_s4 }
  0xb7   : > { %p4522_p5 = pnand %p4520_p0, %p4971_p1  ;;  %p4529_p7 = por %p4528_p4, %p4527_p2 }
  0xb9   : > { %p4523_p11 = pneg %p4522_p5 }
  0xbb   : > { %p4530_p8 = pnand %p4529_p7, %p4523_p11 }
  0xbd   : > { %4533 = shalt.err (!%p4530_p8)
}
  0xbe   : > { %s4764_s7 = smov 192   ;;  %s4765_s3 = smov 12  }
  0xbf   : > { %p6321_p12 = scmp.ne.s32.totalorder %s6312_s26, 0  ;;  %s4766_s27 = smov [#allocation18]  }
  0xc0   : > { %s421_s6 = sshll.u32 %s4766_s27, 4  ;;  %s4534_s8 = scalar_lea.hbm %s6257_s11, 3072  ;;  %s422_s6 = int_to_ptr.vmem [resolvable:$true] %s421_s6 }
  0xc1   : > { %3892 = dma.hbm_to_vmem [thread:$0]  (!%p6321_p12), %s6320_s10, 3072, %s409_s15, [#allocation15], %s4764_s7, %s4764_s7, %s4765_s3  }
  0xc2   : > { %p4535_p13 = scmp.ne.s32.totalorder %s6257_s11, %s4534_s8  ;;  %p4541_p3 = scmp.lt.u32.totalorder %s4534_s8, %s6257_s11 }
  0xc4   : > { %p4537_p9 = pnand %p4535_p13, %p4971_p1 }
  0xc6   : > { %p4538_p10 = pneg %p4537_p9 }
  0xc8   : > { %p4543_p6 = pnand %p4541_p3, %p4538_p10 }
  0xca   : > { %4546 = shalt.err (!%p4543_p6)
}
  0xcb   : > { %s4547_s15 = scalar_lea.vmem %s422_s6, 3072  ;;  %p4555_p2 = scmp.lt.s32.totalorder %s422_s6, %s422_s6 }
  0xcc   : > { %p4548_p0 = scmp.ne.s32.totalorder %s422_s6, %s4547_s15  ;;  %p4556_p4 = scmp.lt.s32.totalorder %s4547_s15, %s4547_s15 }
  0xce   : > { %p4550_p5 = pnand %p4548_p0, %p4971_p1  ;;  %p4557_p7 = por %p4556_p4, %p4555_p2 }
  0xd0   : > { %p4551_p11 = pneg %p4550_p5 }
  0xd2   : > { %p4558_p8 = pnand %p4557_p7, %p4551_p11 }
  0xd4   : > { %4561 = shalt.err (!%p4558_p8)
}
  0xd5   : > { %3895 = dma.hbm_to_vmem [thread:$0]  (!%p6321_p12), %s6257_s11, 3072, %s422_s6, [#allocation19], %s4764_s7, %s4764_s7, %s4765_s3  }
  0xd6   : > { %s55_s5 = sadd.s32 1, %s4734_s20  ;;  %s58_s1 = sadd.s32 1, %s4738_s21 }
  0xd7   : > { %p56_p1 = scmp.ge.s32.totalorder %s55_s5, 8  ;;  %p277_p13 = scmp.eq.s32.totalorder %s4738_s21, 0 }
  0xd8   : > { %s170_s26 = sadd.s32 1, %s4722_s17  ;;  %p291_p9 = scmp.ne.s32.totalorder %s4710_s29, %s4706_s28 }
  0xd9   : > { %s6394_s5 = smov (%p56_p1, %s55_s5), 0  ;;  %s6396_s1 = smov (!%p56_p1, %s58_s1), %s4738_s21 }
  0xda   : > { %s278_s27 = scalar_select %p277_p13, %s4734_s20, 7 }
  0xdb   : > { %p60_p10 = scmp.ge.s32.totalorder %s6396_s1, 5  ;;  %s284_s2 = sadd.s32 1, %s4710_s29 }
  0xdc   : > { %p6322_p3 = scmp.eq.s32.totalorder %s4742_s22, 0  ;;  %s464_s7 = sand.u32 1, %s4710_s29  }
  0xdd   : > { %s6398_s1 = smov (%p60_p10, %s6396_s1), 0  ;;  %s3284_s3 = sshll.u32 %s464_s7, 5 }
  0xde   : > { %p5116_p6 = por %p291_p9, %p6322_p3  ;;  %s3442_s6 = sshll.u32 %s278_s27, 9 }
  0xdf   : > { %s167_s8 = ssub.s32 %s4738_s21, %s6398_s1  ;;  %p279_p12 = scmp.eq.s32.totalorder %s6398_s1, 0 }
  0xe0   : > { %p168_p0 = scmp.eq.s32.totalorder %s167_s8, 0  ;;  %s466_s15 = scalar_lea.vmem [#allocation20], %s3284_s3 }
  0xe1   : > { %s280_s4 = scalar_select %p279_p12, %s6394_s5, 7 }
  0xe2   : > { %s5128_s24 = scalar_select %p168_p0, %s4722_s17, %s170_s26  }
  0xe3   : > { %s281_s18 = ssub.s32 %s278_s27, %s280_s4  ;;  %s475_s19 = sshll.u32 %s466_s15, 4  ;;  %s5135_s19 = int_to_ptr.vmem [resolvable:$true] %s475_s19 }
  0xe4   : > { %p282_p5 = scmp.eq.s32.totalorder %s281_s18, 0  ;;  %s5133_s10 = scalar_lea.hbm %s6260_s14, %s3442_s6 }
  0xe5   : > { %p6324_p11 = scmp.lt.s32.totalorder %s4742_s22, 40  ;;  %s4562_s7 = scalar_lea.hbm %s5133_s10, 512 }
  0xe6   : > { %s5146_s27 = scalar_select %p282_p5, %s4710_s29, %s284_s2  }
  0xe7   : > { %p5141_p2 = pnand %p6324_p11, %p5116_p6  ;;  %p4563_p4 = scmp.ne.s32.totalorder %s5133_s10, %s4562_s7 }
  0xe8   : > { %s4567_s12 = scalar_lea.hbm %s6260_s14, 4096  ;;  %p4568_p13 = scmp.lt.u32.totalorder %s5133_s10, %s6260_s14 }
  0xe9   : > { %p4564_p7 = pneg %p5141_p2  ;;  %p4569_p9 = scmp.lt.u32.totalorder %s4567_s12, %s4562_s7 }
  0xea   : > { %p4571_p3 = scmp.lt.u32.totalorder %s4562_s7, %s5133_s10 }
  0xeb   : > { %p4565_p8 = pnand %p4564_p7, %p4563_p4  ;;  %p4570_p10 = por %p4569_p9, %p4568_p13 }
  0xed   : > { %p4566_p1 = pneg %p4565_p8  ;;  %p4572_p6 = por %p4571_p3, %p4570_p10 }
  0xef   : > { %p4573_p12 = pnand %p4572_p6, %p4566_p1 }
  0xf1   : > { %4576 = shalt.err (!%p4573_p12)
}
  0xf2   : > { %s4577_s2 = scalar_lea.vmem %s5135_s19, 512  ;;  %s4767_s4 = smov [#allocation20]  }
  0xf3   : > { %p4578_p0 = scmp.ne.s32.totalorder %s5135_s19, %s4577_s2  ;;  %s4582_s18 = sshll.u32 %s4767_s4, 4  ;;  %s4583_s18 = int_to_ptr.vmem [resolvable:$false] %s4582_s18 }
  0xf4   : > { %s4584_s15 = scalar_lea.vmem %s4583_s18, 1024  ;;  %p4585_p4 = scmp.lt.s32.totalorder %s5135_s19, %s4583_s18 }
  0xf5   : > { %p4580_p5 = pnand %p4578_p0, %p4564_p7  ;;  %p4586_p8 = scmp.lt.s32.totalorder %s4584_s15, %s4577_s2 }
  0xf7   : > { %p4581_p11 = pneg %p4580_p5  ;;  %p4587_p13 = por %p4586_p8, %p4585_p4 }
  0xf9   : > { %p4588_p9 = pnand %p4587_p13, %p4581_p11 }
  0xfb   : > { %4591 = shalt.err (!%p4588_p9)
}
  0xfc   : > { %s6326_s16 = smov 8   ;;  %s6327_s7 = smov 128  }
  0xfd   : > { %3902 = dma.hbm_to_vmem [thread:$0]  (!%p5141_p2), %s5133_s10, 512, %s5135_s19, %s5035_s30, %s6327_s7, %s6327_s7, %s6326_s16  }
  0xfe   : > { %p6328_p7 = scmp.ne.s32.totalorder %s6311_s25, 0 }
  0xff   : > { %p6329_p1 = scmp.eq.s32.totalorder (!%p6328_p7), %s4932_s13, 0 }
 0x100   : > { %500 = sbr.rel (%p6328_p7) target bundleno = 2488 (0x9b8), region = 68 }
 0x107   : > { %4673 = dma.done.wait (%p6329_p1), [#allocation12], 8192   ;;  %p6330_p10 = pmov %p6329_p1 }
 0x108   : > { %p6331_p3 = pmov %p6329_p1 }
 0x109   : > { %4675 = vsyncadd (%p6330_p10), [#allocation12], 4294959104 }
 0x10a   : > { %4677 = dma.done.wait (%p6331_p3), [#allocation15], 2048   ;;  %p6332_p6 = pmov %p6329_p1 }
 0x10b   : > { %s510_s26 = sand.u32 1, %s4932_s13   ;;  %s512_s10 = sand.u32 1, %s4718_s0  }
 0x10c   : > { %4679 = vsyncadd (%p6332_p6), [#allocation15], 4294965248  ;;  %s3290_s30 = sshll.u32 %s512_s10, 6  ;;  %s511_s25 = scalar_lea.sflag [#allocation12], %s510_s26 }
 0x10d   : > { %s5189_s19 = scalar_lea.vmem [#allocation16], %s3290_s30  ;;  %p6333_p2 = scmp.ne.s32.totalorder %s6308_s23, 0 }
 0x10f   : > { %4681 = dma.done.wait (%p6333_p2), %s511_s25, 1024  }
 0x110   : > { %4683 = vsyncadd (%p6333_p2), %s511_s25, 4294966272  ;;  %p6334_p12 = pmov %p6329_p1 }
 0x111   : > { %p6335_p0 = pmov %p6329_p1 }
 0x112   : > { %4685 = dma.done.wait (%p6334_p12), [#allocation15], 3072  }
 0x113   : > { %4687 = vsyncadd (%p6335_p0), [#allocation15], 4294964224  ;;  %p6336_p5 = pmov %p6335_p0 }
 0x114   : > { %p6337_p11 = pmov %p6335_p0 }
 0x115   : > { %4689 = dma.done.wait (%p6336_p5), [#allocation19], 3072  }
 0x116   : > { %4691 = vsyncadd (%p6337_p11), [#allocation19], 4294964224  ;;  %s6338_s9 = sld [smem:[#allocation32_spill]]  ;;  %s529_s3 = sand.u32 1, %s4706_s28  }
 0x117   : > { %s3293_s12 = sshll.u32 %s529_s3, 5 }
 0x118   : > { %s5204_s6 = scalar_lea.vmem [#allocation20], %s3293_s12 }
 0x11c   : > { %p6339_p4 = scmp.ne.s32.totalorder %s6338_s9, 0 }
 0x11e   : > { %4693 = dma.done.wait (%p6339_p4), %s511_s25, 512  }
 0x11f   : > { %4695 = vsyncadd (%p6339_p4), %s511_s25, 4294966784  ;;  %s6340_s23 = sld [smem:[#allocation31_spill]]  ;;  %s6341_s8 = sld [smem:[#allocation30_spill]] }
 0x120   : > { %s6342_s30 = sld [smem:[#allocation55_spill]] }
 0x125   : > { %p596_p8 = scmp.eq.s32.totalorder %s6340_s23, 0  ;;  %s582_s2 = sld [smem:[#allocation7 + %s6341_s8]] }
 0x126   : > { %s5213_s4 = sld [smem:[#allocation7 + %s6341_s8]]  ;;  %p597_p13 = scmp.eq.s32.totalorder %s6341_s8, 0 }
 0x127   : > { %s5216_s18 = sld [smem:[#allocation8 + %s6341_s8]]  ;;  %p581_p9 = scmp.eq.s32.totalorder %s6340_s23, 4 }
 0x128   : > { %p598_p7 = pnand %p597_p13, %p596_p8 }
 0x129   : > { %v4768_v0 = vmov (!%p598_p7), 0.0   ;;  %s5229_s9 = smov (!%p598_p7), 0  }
 0x12a   : > { %601 = sbr.rel (%p598_p7) target bundleno = 905 (0x389), region = 96  ;;  %602 = vst [vmem:[#allocation21] sm:$0xff] (!%p598_p7), %v4768_v0 }
 0x12b   : > { %s6400_s2 = smov (!%p581_p9, %s582_s2), 0 }
 0x12c   : > { %s3295_s15 = sshll.u32 %s5213_s4, 7  ;;  %p584_p1 = scmp.lt.s32.totalorder %s6400_s2, 3 }
 0x12d   : > { %s3296_s16 = sshll.u32 %s5216_s18, 7 }
 0x12e   : > { %s6402_s2 = smov (!%p584_p1, %s6400_s2), 3 }
 0x12f   : > { %s3294_s7 = sshll.u32 %s6402_s2, 2 }
 0x130   : > { %s5227_s25 = scalar_lea.vmem %s6342_s30, %s3294_s7 }
 0x131 LB: >> { %v4038_v1 = vld [vmem:[#allocation14 + $0x40] sm:$0xff]   ;;  %v4040_v3 = vld [vmem:[#allocation14 + $0x48] sm:$0xff]   ;;  %v4042_v5 = vld [vmem:[#allocation14 + $0x50] sm:$0xff]   ;;  %s3297_s3 = sshll.u32 %s4746_s9, 7  ;;  %s6343_s2 = sld [smem:[#allocation48_spill]]  ;;  %s4746_s9 = sphi %s5229_s9, %s608_s9  }
 0x132   : >> { %v4039_v2 = vld [vmem:[#allocation14] sm:$0xff]   ;;  %3446 = vmatprep.subr.bf16.mxu0 %v4038_v1  ;;  %3731 = vmatprep.subr.bf16.mxu1 %v4038_v1  ;;  %v4041_v4 = vld [vmem:[#allocation14 + $0x8] sm:$0xff]   ;;  %v4043_v6 = vld [vmem:[#allocation14 + $0x10] sm:$0xff]   ;;  %s5237_s12 = scalar_lea.vmem [#allocation11], %s3297_s3  ;;  %s6344_s10 = sld [smem:[#allocation49_spill]] }
 0x133   : >> { %3447 = vmatpush3.bf16.msra.mxu0 %v4039_v2  ;;  %3739 = vmatpush3.bf16.msra.mxu1 %v4039_v2  ;;  %v4044_v7 = vld [vmem:[#allocation14 + $0x58] sm:$0xff]   ;;  %v4046_v9 = vld [vmem:[#allocation14 + $0x60] sm:$0xff]   ;;  %v4048_v11 = vld [vmem:[#allocation14 + $0x68] sm:$0xff]   ;;  %s6345_s23 = sld [smem:[#allocation50_spill]]  ;;  %s5468_s8 = scalar_lea.vmem [#allocation2], %s3297_s3 }
 0x134   : >> { %3448 = vmatprep.subr.bf16.mxu0 %v4040_v3  ;;  %3732 = vmatprep.subr.bf16.mxu1 %v4040_v3  ;;  %v4045_v8 = vld [vmem:[#allocation14 + $0x18] sm:$0xff]   ;;  %v4047_v10 = vld [vmem:[#allocation14 + $0x20] sm:$0xff]   ;;  %v4056_v12 = vld [vmem:[%s5237_s12 + $0x4] ss:$8 sps:$4 sm:$0xff]   ;;  %s608_s9 = sadd.s32 1, %s4746_s9  }
 0x135   : >> { %v4059_v13 = vld [vmem:[%s5237_s12 + $0x44] ss:$8 sps:$4 sm:$0xff]   ;;  %878 = vmatprep.mubr.bf16.mxu0 %v4056_v12  ;;  %v4052_v17 = vld [vmem:[#allocation14 + $0x78] sm:$0xff]   ;;  %v4054_v19 = vld [vmem:[%s5237_s12] ss:$8 sps:$4 sm:$0xff]   ;;  %p605_p10 = scmp.ge.s32.totalorder %s608_s9, 4  }
 0x136   : >> { %v4049_v14 = vld [vmem:[#allocation14 + $0x28] sm:$0xff]   ;;  %v4050_v15 = vld [vmem:[#allocation14 + $0x70] sm:$0xff]   ;;  %910 = vmatprep.mubr.bf16.mxu1 %v4059_v13  ;;  %v4053_v18 = vld [vmem:[#allocation14 + $0x38] sm:$0xff]  }
 0x137   : >> { %3449 = vmatpush3.bf16.msra.mxu0 %v4041_v4  ;;  %3740 = vmatpush3.bf16.msra.mxu1 %v4041_v4  ;;  %v4051_v16 = vld [vmem:[#allocation14 + $0x30] sm:$0xff]   ;;  %v4060_v21 = vld [vmem:[%s5237_s12 + $0x14] ss:$8 sps:$4 sm:$0xff]   ;;  %v4062_v23 = vld [vmem:[%s5237_s12 + $0x10] ss:$8 sps:$4 sm:$0xff]  }
 0x138   : >> { %3450 = vmatprep.subr.bf16.mxu0 %v4042_v5  ;;  %3733 = vmatprep.subr.bf16.mxu1 %v4042_v5  ;;  %v4057_v20 = vld [vmem:[%s5237_s12 + $0x40] ss:$8 sps:$4 sm:$0xff]   ;;  %v4063_v22 = vld [vmem:[%s5237_s12 + $0x54] ss:$8 sps:$4 sm:$0xff]   ;;  %v4065_v24 = vld [vmem:[%s5237_s12 + $0x50] ss:$8 sps:$4 sm:$0xff]  }
 0x139   : >> { %v4066_v25 = vld [vmem:[%s5237_s12 + $0x24] ss:$8 sps:$4 sm:$0xff]   ;;  %v4068_v27 = vld [vmem:[%s5237_s12 + $0x20] ss:$8 sps:$4 sm:$0xff]   ;;  %v4072_v29 = vld [vmem:[%s5237_s12 + $0x34] ss:$8 sps:$4 sm:$0xff]  }
 0x13a   : >> { %v4069_v26 = vld [vmem:[%s5237_s12 + $0x64] ss:$8 sps:$4 sm:$0xff]   ;;  %v4071_v28 = vld [vmem:[%s5237_s12 + $0x60] ss:$8 sps:$4 sm:$0xff]   ;;  %v4075_v30 = vld [vmem:[%s5237_s12 + $0x74] ss:$8 sps:$4 sm:$0xff]  }
 0x13b   : >> { %3451 = vmatpush3.bf16.msra.mxu0 %v4043_v6  ;;  %3741 = vmatpush3.bf16.msra.mxu1 %v4043_v6  ;;  %v4074_v31 = vld [vmem:[%s5237_s12 + $0x30] ss:$8 sps:$4 sm:$0xff]   ;;  %v5258_v37 = vld [vmem:[%s6343_s2] ss:$0 sm:$0xff] }
 0x13c   : >> { %3452 = vmatprep.subr.bf16.mxu0 %v4044_v7  ;;  %3734 = vmatprep.subr.bf16.mxu1 %v4044_v7  ;;  %v4077_v32 = vld [vmem:[%s5237_s12 + $0x70] ss:$8 sps:$4 sm:$0xff]  }
 0x13f   : >> { %3453 = vmatpush3.bf16.msra.mxu0 %v4045_v8  ;;  %3742 = vmatpush3.bf16.msra.mxu1 %v4045_v8 }
 0x140   : >> { %3454 = vmatprep.subr.bf16.mxu0 %v4046_v9  ;;  %3735 = vmatprep.subr.bf16.mxu1 %v4046_v9 }
 0x143   : >> { %3455 = vmatpush3.bf16.msra.mxu0 %v4047_v10  ;;  %3743 = vmatpush3.bf16.msra.mxu1 %v4047_v10 }
 0x144   : >> { %3456 = vmatprep.subr.bf16.mxu0 %v4048_v11  ;;  %3736 = vmatprep.subr.bf16.mxu1 %v4048_v11 }
 0x147   : >> { %3457 = vmatpush3.bf16.msra.mxu0 %v4049_v14  ;;  %3744 = vmatpush3.bf16.msra.mxu1 %v4049_v14 }
 0x148   : >> { %3458 = vmatprep.subr.bf16.mxu0 %v4050_v15  ;;  %3737 = vmatprep.subr.bf16.mxu1 %v4050_v15 }
 0x14b   : >> { %3459 = vmatpush3.bf16.msra.mxu0 %v4051_v16  ;;  %3745 = vmatpush3.bf16.msra.mxu1 %v4051_v16 }
 0x14c   : >> { %3460 = vmatprep.subr.bf16.mxu0 %v4052_v17  ;;  %3738 = vmatprep.subr.bf16.mxu1 %v4052_v17 }
 0x14f   : >> { %3461 = vmatpush3.bf16.msra.mxu0 %v4053_v18  ;;  %3746 = vmatpush3.bf16.msra.mxu1 %v4053_v18 }
 0x152   : >> { %879 = vmatmul.mubr.bf16.vlgmr.msra.gmra.mrb[0].mxu0 %v4054_v19  ;;  %911 = vmatmul.mubr.bf16.vlgmr.msra.gmra.mrb[0].mxu1 %v4057_v20 }
 0x153   : >> { %886 = vmatprep.mubr.bf16.mxu0 %v4060_v21  ;;  %918 = vmatprep.mubr.bf16.mxu1 %v4063_v22 }
 0x15a   : >> { %887 = vmatmul.mubr.bf16.gmra.mrb[4].mxu0 %v4062_v23  ;;  %919 = vmatmul.mubr.bf16.gmra.mrb[4].mxu1 %v4065_v24 }
 0x15b   : >> { %894 = vmatprep.mubr.bf16.mxu0 %v4066_v25  ;;  %926 = vmatprep.mubr.bf16.mxu1 %v4069_v26 }
 0x162   : >> { %895 = vmatmul.mubr.bf16.gmra.mrb[8].mxu0 %v4068_v27  ;;  %927 = vmatmul.mubr.bf16.gmra.mrb[8].mxu1 %v4071_v28 }
 0x163   : >> { %902 = vmatprep.mubr.bf16.mxu0 %v4072_v29  ;;  %934 = vmatprep.mubr.bf16.mxu1 %v4075_v30 }
 0x16a   : >> { %903 = vmatmul.mubr.bf16.gmra.mrb[12].mxu0 %v4074_v31  ;;  %935 = vmatmul.mubr.bf16.gmra.mrb[12].mxu1 %v4077_v32 }
 0x225   : >> { %v3462_v33 = vpop.f32.mrb[0].mxu0  ;;  %v3486_v34 = vpop.f32.mrb[0].mxu1 }
 0x226   : >> { %v3463_v35 = vpop.f32.mrb[1].mxu0  ;;  %v3487_v36 = vpop.f32.mrb[1].mxu1 }
 0x227   : >> { %v3464_v38 = vadd.f32 %v3463_v35, %v3462_v33  ;;  %v3488_v39 = vadd.f32 %v3487_v36, %v3486_v34  ;;  %v3465_v40 = vpop.f32.mrb[2].mxu0  ;;  %v3489_v41 = vpop.f32.mrb[2].mxu1 }
 0x228   : >> { %v3466_v42 = vpop.f32.mrb[3].mxu0  ;;  %v3490_v43 = vpop.f32.mrb[3].mxu1 }
 0x229   : >> { %v3467_v44 = vadd.f32 %v3466_v42, %v3465_v40  ;;  %v3491_v45 = vadd.f32 %v3490_v43, %v3489_v41  ;;  %v5261_v46 = vadd.f32 %v3464_v38, %v5258_v37  ;;  %v5264_v47 = vadd.f32 %v3488_v39, %v5258_v37 }
 0x22b   : >> { %v943_v48 = vmax.f32 %v5261_v46, 0.0  ;;  %v5268_v49 = vadd.f32 %v3491_v45, %v5258_v37  ;;  %v951_v53 = vmax.f32 %v5264_v47, 0.0  ;;  %v5277_v60 = vadd.f32 %v3467_v44, %v5258_v37 }
 0x22d   : >> { %v3468_v50 = vpop.f32.mrb[4].mxu0  ;;  %961 = vadd.xlane.f32.xlu0 %v943_v48  ;;  %v952_v51 = vmax.f32 %v5268_v49, 0.0  ;;  %v3492_v52 = vpop.f32.mrb[4].mxu1  ;;  %v944_v4 = vmax.f32 %v5277_v60, 0.0 }
 0x22e   : >> { %v3469_v54 = vpop.f32.mrb[5].mxu0  ;;  %v3493_v55 = vpop.f32.mrb[5].mxu1 }
 0x22f   : >> { %v3470_v56 = vadd.f32 %v3469_v54, %v3468_v50  ;;  %979 = vadd.xlane.f32.xlu1 %v952_v51  ;;  %v3471_v57 = vpop.f32.mrb[6].mxu0  ;;  %v3494_v58 = vadd.f32 %v3493_v55, %v3492_v52  ;;  %v3495_v59 = vpop.f32.mrb[6].mxu1 }
 0x230   : >> { %v3472_v61 = vpop.f32.mrb[7].mxu0  ;;  %v3496_v62 = vpop.f32.mrb[7].mxu1 }
 0x231   : >> { %v3473_v63 = vadd.f32 %v3472_v61, %v3471_v57  ;;  %977 = vadd.xlane.f32.xlu0 %v951_v53  ;;  %v5282_v0 = vadd.f32 %v3470_v56, %v5258_v37  ;;  %v3497_v1 = vadd.f32 %v3496_v62, %v3495_v59  ;;  %v5285_v2 = vadd.f32 %v3494_v58, %v5258_v37 }
 0x233   : >> { %v945_v3 = vmax.f32 %v5282_v0, 0.0  ;;  %v5290_v5 = vadd.f32 %v3473_v63, %v5258_v37  ;;  %v953_v9 = vmax.f32 %v5285_v2, 0.0  ;;  %v5299_v10 = vadd.f32 %v3497_v1, %v5258_v37 }
 0x235   : >> { %v3474_v6 = vpop.f32.mrb[8].mxu0  ;;  %965 = vadd.xlane.f32.xlu1 %v945_v3  ;;  %963 = vadd.xlane.f32.xlu0 %v944_v4  ;;  %v3498_v7 = vpop.f32.mrb[8].mxu1  ;;  %v946_v8 = vmax.f32 %v5290_v5, 0.0  ;;  %v954_v20 = vmax.f32 %v5299_v10, 0.0 }
 0x236   : >> { %v3475_v11 = vpop.f32.mrb[9].mxu0  ;;  %v3499_v12 = vpop.f32.mrb[9].mxu1 }
 0x237   : >> { %v3476_v13 = vadd.f32 %v3475_v11, %v3474_v6  ;;  %v3477_v14 = vpop.f32.mrb[10].mxu0  ;;  %v3500_v15 = vadd.f32 %v3499_v12, %v3498_v7  ;;  %v3501_v16 = vpop.f32.mrb[10].mxu1 }
 0x238   : >> { %v3478_v17 = vpop.f32.mrb[11].mxu0  ;;  %v3502_v18 = vpop.f32.mrb[11].mxu1 }
 0x239   : >> { %967 = vadd.xlane.f32.xlu1 %v946_v8  ;;  %981 = vadd.xlane.f32.xlu0 %v953_v9  ;;  %v3479_v19 = vadd.f32 %v3478_v17, %v3477_v14  ;;  %v5307_v21 = vadd.f32 %v3476_v13, %v5258_v37  ;;  %v3503_v22 = vadd.f32 %v3502_v18, %v3501_v16 }
 0x23a   : >> { %v5310_v23 = vadd.f32 %v3500_v15, %v5258_v37 }
 0x23b   : >> { %v947_v24 = vmax.f32 %v5307_v21, 0.0  ;;  %v5314_v25 = vadd.f32 %v3479_v19, %v5258_v37  ;;  %v5323_v30 = vadd.f32 %v3503_v22, %v5258_v37 }
 0x23c   : >> { %v955_v29 = vmax.f32 %v5310_v23, 0.0 }
 0x23d   : >> { %v3480_v26 = vpop.f32.mrb[12].mxu0  ;;  %983 = vadd.xlane.f32.xlu1 %v954_v20  ;;  %969 = vadd.xlane.f32.xlu0 %v947_v24  ;;  %v3504_v27 = vpop.f32.mrb[12].mxu1  ;;  %v948_v28 = vmax.f32 %v5314_v25, 0.0  ;;  %v956_v41 = vmax.f32 %v5323_v30, 0.0 }
 0x23e   : >> { %v3481_v31 = vpop.f32.mrb[13].mxu0  ;;  %v3505_v32 = vpop.f32.mrb[13].mxu1 }
 0x23f   : >> { %v3482_v33 = vadd.f32 %v3481_v31, %v3480_v26  ;;  %v3483_v34 = vpop.f32.mrb[14].mxu0  ;;  %v3506_v35 = vadd.f32 %v3505_v32, %v3504_v27  ;;  %v3507_v36 = vpop.f32.mrb[14].mxu1 }
 0x240   : >> { %v3484_v38 = vpop.f32.mrb[15].mxu0  ;;  %v3508_v39 = vpop.f32.mrb[15].mxu1 }
 0x241   : >> { %971 = vadd.xlane.f32.xlu1 %v948_v28  ;;  %985 = vadd.xlane.f32.xlu0 %v955_v29  ;;  %v3485_v40 = vadd.f32 %v3484_v38, %v3483_v34  ;;  %v5331_v42 = vadd.f32 %v3482_v33, %v5258_v37  ;;  %v3509_v43 = vadd.f32 %v3508_v39, %v3507_v36 }
 0x242   : >> { %v5334_v44 = vadd.f32 %v3506_v35, %v5258_v37 }
 0x243   : >> { %v949_v45 = vmax.f32 %v5331_v42, 0.0  ;;  %v5338_v50 = vadd.f32 %v3485_v40, %v5258_v37  ;;  %v5347_v55 = vadd.f32 %v3509_v43, %v5258_v37 }
 0x244   : >> { %v957_v54 = vmax.f32 %v5334_v44, 0.0 }
 0x245   : >> { %987 = vadd.xlane.f32.xlu1 %v956_v41  ;;  %973 = vadd.xlane.f32.xlu0 %v949_v45  ;;  %v950_v52 = vmax.f32 %v5338_v50, 0.0  ;;  %v958_v56 = vmax.f32 %v5347_v55, 0.0 }
 0x249   : >> { %975 = vadd.xlane.f32.xlu1 %v950_v52  ;;  %989 = vadd.xlane.f32.xlu0 %v957_v54 }
 0x24d   : >> { %991 = vadd.xlane.f32.xlu1 %v958_v56 }
 0x2ba   : >> { %v962_v57 = vpop.xlane.xlu0 %961 }
 0x2bb   : >> { %v994_v58 = vmul.f32 0.0078125, %v962_v57 }
 0x2bc   : >> { %v980_v61 = vpop.xlane.xlu1 %979 }
 0x2bd   : >> { %v5358_v59 = vsub.f32 %v943_v48, %v994_v58  ;;  %v1003_v6 = vmul.f32 0.0078125, %v980_v61 }
 0x2be   : >> { %v978_v37 = vpop.xlane.xlu0 %977 }
 0x2bf   : >> { %v1002_v62 = vmul.f32 0.0078125, %v978_v37  ;;  %v1026_v63 = vmul.f32 %v5358_v59, %v5358_v59  ;;  %v5378_v47 = vsub.f32 %v952_v51, %v1003_v6 }
 0x2c1   : >> { %v5364_v1 = vsub.f32 %v951_v53, %v1002_v62  ;;  %1042 = vadd.xlane.f32.xlu0 %v1026_v63  ;;  %v1035_v22 = vmul.f32 %v5378_v47, %v5378_v47 }
 0x2c2   : >> { %v966_v7 = vpop.xlane.xlu1 %965  ;;  %v964_v11 = vpop.xlane.xlu0 %963 }
 0x2c3   : >> { %v996_v12 = vmul.f32 0.0078125, %v966_v7  ;;  %v995_v13 = vmul.f32 0.0078125, %v964_v11  ;;  %v1034_v46 = vmul.f32 %v5364_v1, %v5364_v1 }
 0x2c5   : >> { %v5370_v48 = vsub.f32 %v945_v3, %v996_v12  ;;  %v5374_v14 = vsub.f32 %v944_v4, %v995_v13  ;;  %1058 = vadd.xlane.f32.xlu0 %v1034_v46 }
 0x2c6   : >> { %v968_v53 = vpop.xlane.xlu1 %967  ;;  %v982_v15 = vpop.xlane.xlu0 %981 }
 0x2c7   : >> { %v997_v16 = vmul.f32 0.0078125, %v968_v53  ;;  %v1004_v17 = vmul.f32 0.0078125, %v982_v15  ;;  %v1028_v18 = vmul.f32 %v5370_v48, %v5370_v48  ;;  %v1027_v0 = vmul.f32 %v5374_v14, %v5374_v14 }
 0x2c9   : >> { %v5386_v60 = vsub.f32 %v953_v9, %v1004_v17  ;;  %1046 = vadd.xlane.f32.xlu0 %v1028_v18  ;;  %1044 = vadd.xlane.f32.xlu1 %v1027_v0  ;;  %v5390_v49 = vsub.f32 %v946_v8, %v997_v16  ;;  %v5455_v0 = vld [vmem:[%s6344_s10] ss:$0 sm:$0xff] }
 0x2ca   : >> { %v984_v51 = vpop.xlane.xlu1 %983  ;;  %v970_v3 = vpop.xlane.xlu0 %969 }
 0x2cb   : >> { %v1005_v4 = vmul.f32 0.0078125, %v984_v51  ;;  %v998_v19 = vmul.f32 0.0078125, %v970_v3  ;;  %v1036_v26 = vmul.f32 %v5386_v60, %v5386_v60  ;;  %v1029_v8 = vmul.f32 %v5390_v49, %v5390_v49 }
 0x2cd   : >> { %v5398_v2 = vsub.f32 %v947_v24, %v998_v19  ;;  %1060 = vadd.xlane.f32.xlu1 %v1035_v22  ;;  %1062 = vadd.xlane.f32.xlu0 %v1036_v26  ;;  %v5404_v27 = vsub.f32 %v954_v20, %v1005_v4  ;;  %v5461_v26 = vld [vmem:[%s6345_s23] ss:$0 sm:$0xff] }
 0x2ce   : >> { %v972_v9 = vpop.xlane.xlu1 %971  ;;  %v986_v5 = vpop.xlane.xlu0 %985 }
 0x2cf   : >> { %v999_v31 = vmul.f32 0.0078125, %v972_v9  ;;  %v1006_v32 = vmul.f32 0.0078125, %v986_v5  ;;  %v1030_v33 = vmul.f32 %v5398_v2, %v5398_v2  ;;  %v1037_v36 = vmul.f32 %v5404_v27, %v5404_v27 }
 0x2d1   : >> { %v5410_v21 = vsub.f32 %v955_v29, %v1006_v32  ;;  %1048 = vadd.xlane.f32.xlu1 %v1029_v8  ;;  %1050 = vadd.xlane.f32.xlu0 %v1030_v33  ;;  %v5414_v24 = vsub.f32 %v948_v28, %v999_v31 }
 0x2d2   : >> { %v988_v34 = vpop.xlane.xlu1 %987  ;;  %v974_v35 = vpop.xlane.xlu0 %973 }
 0x2d3   : >> { %v1007_v10 = vmul.f32 0.0078125, %v988_v34  ;;  %v1000_v20 = vmul.f32 0.0078125, %v974_v35  ;;  %v1038_v38 = vmul.f32 %v5410_v21, %v5410_v21  ;;  %v1031_v28 = vmul.f32 %v5414_v24, %v5414_v24 }
 0x2d5   : >> { %v5422_v23 = vsub.f32 %v949_v45, %v1000_v20  ;;  %1064 = vadd.xlane.f32.xlu1 %v1037_v36  ;;  %1066 = vadd.xlane.f32.xlu0 %v1038_v38  ;;  %v5428_v39 = vsub.f32 %v956_v41, %v1007_v10 }
 0x2d6   : >> { %v976_v29 = vpop.xlane.xlu1 %975  ;;  %v990_v25 = vpop.xlane.xlu0 %989 }
 0x2d7   : >> { %v1001_v40 = vmul.f32 0.0078125, %v976_v29  ;;  %v1008_v43 = vmul.f32 0.0078125, %v990_v25  ;;  %v1032_v57 = vmul.f32 %v5422_v23, %v5422_v23  ;;  %v1039_v30 = vmul.f32 %v5428_v39, %v5428_v39 }
 0x2d9   : >> { %v5434_v42 = vsub.f32 %v957_v54, %v1008_v43  ;;  %1052 = vadd.xlane.f32.xlu1 %v1031_v28  ;;  %1054 = vadd.xlane.f32.xlu0 %v1032_v57  ;;  %v5438_v58 = vsub.f32 %v950_v52, %v1001_v40 }
 0x2da   : >> { %v992_v45 = vpop.xlane.xlu1 %991 }
 0x2db   : >> { %v1009_v61 = vmul.f32 0.0078125, %v992_v45  ;;  %v1040_v41 = vmul.f32 %v5434_v42, %v5434_v42  ;;  %v1033_v54 = vmul.f32 %v5438_v58, %v5438_v58 }
 0x2dd   : >> { %1068 = vadd.xlane.f32.xlu1 %v1039_v30  ;;  %1070 = vadd.xlane.f32.xlu0 %v1040_v41  ;;  %v5446_v44 = vsub.f32 %v958_v56, %v1009_v61 }
 0x2df   : >> { %v1041_v50 = vmul.f32 %v5446_v44, %v5446_v44 }
 0x2e1   : >> { %1056 = vadd.xlane.f32.xlu1 %v1033_v54 }
 0x2e5   : >> { %1072 = vadd.xlane.f32.xlu1 %v1041_v50 }
 0x34e   : >> { %v1043_v52 = vpop.xlane.xlu0 %1042 }
 0x34f   : >> { %v1074_v37 = vmul.f32 0.0078125, %v1043_v52 }
 0x351   : >> { %v1090_v62 = vadd.f32 1e-05, %v1074_v37 }
 0x352   : >> { %v1059_v63 = vpop.xlane.xlu0 %1058 }
 0x353   : >> { %4078 = vrsqrt.f32 %v1090_v62  ;;  %v1082_v6 = vmul.f32 0.0078125, %v1059_v63 }
 0x355   : >> { %v1098_v7 = vadd.f32 1e-05, %v1082_v6 }
 0x356   : >> { %v1045_v11 = vpop.xlane.xlu1 %1044  ;;  %v1047_v12 = vpop.xlane.xlu0 %1046 }
 0x357   : >> { %4080 = vrsqrt.f32 %v1098_v7  ;;  %v1075_v55 = vmul.f32 0.0078125, %v1045_v11  ;;  %v1076_v56 = vmul.f32 0.0078125, %v1047_v12 }
 0x359   : >> { %v1091_v13 = vadd.f32 1e-05, %v1075_v55  ;;  %v1092_v46 = vadd.f32 1e-05, %v1076_v56 }
 0x35a   : >> { %v1061_v53 = vpop.xlane.xlu1 %1060  ;;  %v1063_v15 = vpop.xlane.xlu0 %1062 }
 0x35b   : >> { %4082 = vrsqrt.f32 %v1091_v13  ;;  %v1083_v16 = vmul.f32 0.0078125, %v1061_v53  ;;  %v1084_v17 = vmul.f32 0.0078125, %v1063_v15 }
 0x35c   : >> { %4084 = vrsqrt.f32 %v1092_v46 }
 0x35d   : >> { %v4079_v18 = vpop.eup %4078  ;;  %v1099_v51 = vadd.f32 1e-05, %v1083_v16  ;;  %v1100_v3 = vadd.f32 1e-05, %v1084_v17 }
 0x35e   : >> { %v1122_v4 = vmul.f32 %v4079_v18, %v5358_v59  ;;  %v1049_v19 = vpop.xlane.xlu1 %1048  ;;  %v1051_v22 = vpop.xlane.xlu0 %1050 }
 0x35f   : >> { %4086 = vrsqrt.f32 %v1099_v51  ;;  %v1077_v9 = vmul.f32 0.0078125, %v1049_v19  ;;  %v1078_v5 = vmul.f32 0.0078125, %v1051_v22 }
 0x360   : >> { %v1144_v8 = vmul.f32 %v5455_v0, %v1122_v4  ;;  %4088 = vrsqrt.f32 %v1100_v3 }
 0x361   : >> { %v4081_v31 = vpop.eup %4080  ;;  %v1093_v32 = vadd.f32 1e-05, %v1077_v9  ;;  %v1094_v33 = vadd.f32 1e-05, %v1078_v5 }
 0x362   : >> { %v1166_v34 = vadd.f32 %v5461_v26, %v1144_v8  ;;  %v1130_v59 = vmul.f32 %v4081_v31, %v5364_v1  ;;  %v1065_v35 = vpop.xlane.xlu1 %1064  ;;  %v1067_v10 = vpop.xlane.xlu0 %1066 }
 0x363   : >> { %4090 = vrsqrt.f32 %v1093_v32  ;;  %v1085_v20 = vmul.f32 0.0078125, %v1065_v35  ;;  %v1086_v36 = vmul.f32 0.0078125, %v1067_v10 }
 0x364   : >> { %1183 = vst [vmem:[%s5468_s8] sm:$0xff] %v1166_v34  ;;  %v1152_v38 = vmul.f32 %v5455_v0, %v1130_v59  ;;  %4092 = vrsqrt.f32 %v1094_v33 }
 0x365   : >> { %v4083_v29 = vpop.eup %4082  ;;  %v1101_v25 = vadd.f32 1e-05, %v1085_v20  ;;  %v1102_v28 = vadd.f32 1e-05, %v1086_v36 }
 0x366   : >> { %v4085_v40 = vpop.eup %4084  ;;  %v1174_v1 = vadd.f32 %v5461_v26, %v1152_v38  ;;  %v1123_v43 = vmul.f32 %v4083_v29, %v5374_v14  ;;  %v1053_v57 = vpop.xlane.xlu1 %1052 }
 0x367   : >> { %v1055_v45 = vpop.xlane.xlu0 %1054  ;;  %v1124_v61 = vmul.f32 %v4085_v40, %v5370_v48  ;;  %4094 = vrsqrt.f32 %v1101_v25  ;;  %v1079_v30 = vmul.f32 0.0078125, %v1053_v57 }
 0x368   : >> { %v1080_v41 = vmul.f32 0.0078125, %v1055_v45  ;;  %1191 = vst [vmem:[%s5468_s8 + $0x40] sm:$0xff] %v1174_v1  ;;  %v1145_v54 = vmul.f32 %v5455_v0, %v1123_v43  ;;  %4096 = vrsqrt.f32 %v1102_v28 }
 0x369   : >> { %v4087_v50 = vpop.eup %4086  ;;  %v1146_v52 = vmul.f32 %v5455_v0, %v1124_v61  ;;  %v1095_v37 = vadd.f32 1e-05, %v1079_v30 }
 0x36a   : >> { %v1096_v62 = vadd.f32 1e-05, %v1080_v41  ;;  %v4089_v63 = vpop.eup %4088  ;;  %v1167_v14 = vadd.f32 %v5461_v26, %v1145_v54  ;;  %v1131_v6 = vmul.f32 %v4087_v50, %v5378_v47  ;;  %v1069_v48 = vpop.xlane.xlu1 %1068 }
 0x36b   : >> { %v1071_v7 = vpop.xlane.xlu0 %1070  ;;  %v1168_v11 = vadd.f32 %v5461_v26, %v1146_v52  ;;  %v1132_v12 = vmul.f32 %v4089_v63, %v5386_v60  ;;  %4098 = vrsqrt.f32 %v1095_v37  ;;  %v1087_v55 = vmul.f32 0.0078125, %v1069_v48 }
 0x36c   : >> { %1184 = vst [vmem:[%s5468_s8 + $0x8] sm:$0xff] %v1167_v14  ;;  %v1153_v56 = vmul.f32 %v5455_v0, %v1131_v6  ;;  %4100 = vrsqrt.f32 %v1096_v62  ;;  %v1088_v13 = vmul.f32 0.0078125, %v1071_v7 }
 0x36d   : >> { %v4091_v46 = vpop.eup %4090  ;;  %1185 = vst [vmem:[%s5468_s8 + $0x10] sm:$0xff] %v1168_v11  ;;  %v1154_v53 = vmul.f32 %v5455_v0, %v1132_v12  ;;  %v1103_v47 = vadd.f32 1e-05, %v1087_v55 }
 0x36e   : >> { %v4093_v15 = vpop.eup %4092  ;;  %v1175_v16 = vadd.f32 %v5461_v26, %v1153_v56  ;;  %v1125_v17 = vmul.f32 %v4091_v46, %v5390_v49  ;;  %v1104_v60 = vadd.f32 1e-05, %v1088_v13  ;;  %v1057_v18 = vpop.xlane.xlu1 %1056 }
 0x36f   : >> { %v1176_v51 = vadd.f32 %v5461_v26, %v1154_v53  ;;  %v1126_v3 = vmul.f32 %v4093_v15, %v5398_v2  ;;  %4102 = vrsqrt.f32 %v1103_v47  ;;  %v1081_v4 = vmul.f32 0.0078125, %v1057_v18 }
 0x370   : >> { %1192 = vst [vmem:[%s5468_s8 + $0x48] sm:$0xff] %v1175_v16  ;;  %v1147_v19 = vmul.f32 %v5455_v0, %v1125_v17  ;;  %4104 = vrsqrt.f32 %v1104_v60 }
 0x371   : >> { %v4095_v22 = vpop.eup %4094  ;;  %1193 = vst [vmem:[%s5468_s8 + $0x50] sm:$0xff] %v1176_v51  ;;  %v1148_v9 = vmul.f32 %v5455_v0, %v1126_v3  ;;  %v1097_v5 = vadd.f32 1e-05, %v1081_v4 }
 0x372   : >> { %v4097_v49 = vpop.eup %4096  ;;  %v1169_v8 = vadd.f32 %v5461_v26, %v1147_v19  ;;  %v1133_v31 = vmul.f32 %v4095_v22, %v5404_v27  ;;  %v1073_v32 = vpop.xlane.xlu1 %1072 }
 0x373   : >> { %v1170_v2 = vadd.f32 %v5461_v26, %v1148_v9  ;;  %v1134_v33 = vmul.f32 %v4097_v49, %v5410_v21  ;;  %4106 = vrsqrt.f32 %v1097_v5  ;;  %v1089_v34 = vmul.f32 0.0078125, %v1073_v32 }
 0x374   : >> { %1186 = vst [vmem:[%s5468_s8 + $0x18] sm:$0xff] %v1169_v8  ;;  %v1155_v59 = vmul.f32 %v5455_v0, %v1133_v31 }
 0x375   : >> { %v4099_v35 = vpop.eup %4098  ;;  %1187 = vst [vmem:[%s5468_s8 + $0x20] sm:$0xff] %v1170_v2  ;;  %v1156_v10 = vmul.f32 %v5455_v0, %v1134_v33  ;;  %v1105_v20 = vadd.f32 1e-05, %v1089_v34 }
 0x376   : >> { %v4101_v36 = vpop.eup %4100  ;;  %v1177_v27 = vadd.f32 %v5461_v26, %v1155_v59  ;;  %v1127_v38 = vmul.f32 %v4099_v35, %v5414_v24 }
 0x377   : >> { %v1178_v29 = vadd.f32 %v5461_v26, %v1156_v10  ;;  %v1128_v21 = vmul.f32 %v4101_v36, %v5422_v23  ;;  %4108 = vrsqrt.f32 %v1105_v20 }
 0x378   : >> { %1194 = vst [vmem:[%s5468_s8 + $0x58] sm:$0xff] %v1177_v27  ;;  %v1149_v25 = vmul.f32 %v5455_v0, %v1127_v38 }
 0x379   : >> { %v4103_v28 = vpop.eup %4102  ;;  %1195 = vst [vmem:[%s5468_s8 + $0x60] sm:$0xff] %v1178_v29  ;;  %v1150_v40 = vmul.f32 %v5455_v0, %v1128_v21 }
 0x37a   : >> { %v4105_v1 = vpop.eup %4104  ;;  %v1171_v43 = vadd.f32 %v5461_v26, %v1149_v25  ;;  %v1135_v24 = vmul.f32 %v4103_v28, %v5428_v39 }
 0x37b   : >> { %v1172_v57 = vadd.f32 %v5461_v26, %v1150_v40  ;;  %v1136_v23 = vmul.f32 %v4105_v1, %v5434_v42 }
 0x37c   : >> { %1188 = vst [vmem:[%s5468_s8 + $0x28] sm:$0xff] %v1171_v43  ;;  %v1157_v45 = vmul.f32 %v5455_v0, %v1135_v24 }
 0x37d   : >> { %v4107_v61 = vpop.eup %4106  ;;  %1189 = vst [vmem:[%s5468_s8 + $0x30] sm:$0xff] %v1172_v57  ;;  %v1158_v30 = vmul.f32 %v5455_v0, %v1136_v23 }
 0x37e   : >> { %v1179_v41 = vadd.f32 %v5461_v26, %v1157_v45  ;;  %v1129_v54 = vmul.f32 %v4107_v61, %v5438_v58 }
 0x37f   : >> { %v1180_v50 = vadd.f32 %v5461_v26, %v1158_v30 }
 0x380   : >> { %1196 = vst [vmem:[%s5468_s8 + $0x68] sm:$0xff] %v1179_v41  ;;  %v1151_v39 = vmul.f32 %v5455_v0, %v1129_v54 }
 0x381   : >> { %v4109_v52 = vpop.eup %4108  ;;  %1197 = vst [vmem:[%s5468_s8 + $0x70] sm:$0xff] %v1180_v50 }
 0x382   : >> { %v1173_v42 = vadd.f32 %v5461_v26, %v1151_v39  ;;  %v1137_v37 = vmul.f32 %v4109_v52, %v5446_v44  ;;  %607 = sbr.rel (!%p605_p10) target bundleno = 305 (0x131), region = 181 }
 0x384   : >> { %1190 = vst [vmem:[%s5468_s8 + $0x38] sm:$0xff] %v1173_v42  ;;  %v1159_v62 = vmul.f32 %v5455_v0, %v1137_v37 }
 0x386   : >> { %v1181_v63 = vadd.f32 %v5461_v26, %v1159_v62 }
 0x388   : >> { %1198 = vst [vmem:[%s5468_s8 + $0x78] sm:$0xff] %v1181_v63 }
 0x389 PF: > { %s6346_s3 = sld [smem:[#allocation30_spill]] }
 0x38f   : > { %p3335_p3 = scmp.ne.s32.totalorder %s6346_s3, 0 }
 0x390   : > { %s5534_s2 = smov (!%p3335_p3), 0  }
 0x391   : > { %1201 = sbr.rel (%p3335_p3) target bundleno = 1179 (0x49b), region = 107 }
 0x398 LB: >> { %v4110_v58 = vld [vmem:[%s5189_s19] sm:$0xff]   ;;  %v4111_v44 = vld [vmem:[%s5189_s19 + $0x8] sm:$0xff]   ;;  %s3336_s9 = sshll.u32 %s4750_s2, 7  ;;  %v4112_v0 = vld [vmem:[%s5189_s19 + $0x10] sm:$0xff]   ;;  %s1207_s2 = sadd.s32 1, %s4750_s2   ;;  %s4750_s2 = sphi %s5534_s2, %s1207_s2  }
 0x399   : >> { %3583 = vmatprep.subr.bf16.mxu0 %v4110_v58  ;;  %3747 = vmatprep.subr.bf16.mxu1 %v4110_v58  ;;  %v4113_v26 = vld [vmem:[%s5189_s19 + $0x18] sm:$0xff]   ;;  %s5546_s7 = scalar_lea.vmem [#allocation2], %s3336_s9  ;;  %v4114_v55 = vld [vmem:[%s5189_s19 + $0x20] sm:$0xff]   ;;  %v4115_v56 = vld [vmem:[%s5189_s19 + $0x28] sm:$0xff]   ;;  %s1403_s26 = sshra.s32 %s3336_s9, 4 }
 0x39a   : >> { %3584 = vmatpush3.bf16.msra.mxu0 %v4110_v58  ;;  %3755 = vmatpush3.bf16.msra.mxu1 %v4110_v58  ;;  %v1210_v14 = vld [vmem:[%s5546_s7] sm:$0xff]  ;;  %v1211_v6 = vld [vmem:[%s5546_s7 + $0x8] sm:$0xff]  ;;  %v4117_v46 = vld [vmem:[%s5189_s19 + $0x38] sm:$0xff]   ;;  %s3345_s10 = sshll.u32 %s1403_s26, 3  ;;  %p1204_p6 = scmp.ge.s32.totalorder %s1207_s2, 4  }
 0x39b   : >> { %3585 = vmatprep.subr.bf16.mxu0 %v4111_v44  ;;  %3748 = vmatprep.subr.bf16.mxu1 %v4111_v44  ;;  %v1218_v48 = vld [vmem:[%s5546_s7 + $0x40] sm:$0xff]  ;;  %v1226_v7 = vpack.c.bf16 %v1211_v6, %v1210_v14  ;;  %v1219_v11 = vld [vmem:[%s5546_s7 + $0x48] sm:$0xff]  ;;  %v1212_v53 = vld [vmem:[%s5546_s7 + $0x10] sm:$0xff]  ;;  %s1406_s30 = scalar_lea.vmem [#allocation3], %s3345_s10 }
 0x39c   : >> { %v1230_v12 = vpack.c.bf16 %v1219_v11, %v1218_v48  ;;  %v4116_v13 = vld [vmem:[%s5189_s19 + $0x30] sm:$0xff]   ;;  %v1213_v47 = vld [vmem:[%s5546_s7 + $0x18] sm:$0xff]  ;;  %v1220_v15 = vld [vmem:[%s5546_s7 + $0x50] sm:$0xff] }
 0x39d   : >> { %3599 = vmatprep.mubr.bf16.mxu0 %v1226_v7  ;;  %v1221_v16 = vld [vmem:[%s5546_s7 + $0x58] sm:$0xff]  ;;  %v1214_v17 = vld [vmem:[%s5546_s7 + $0x20] sm:$0xff]  ;;  %v1215_v60 = vld [vmem:[%s5546_s7 + $0x28] sm:$0xff]  ;;  %v1227_v3 = vpack.c.bf16 %v1213_v47, %v1212_v53 }
 0x39e   : >> { %3586 = vmatpush3.bf16.msra.mxu0 %v4111_v44  ;;  %3756 = vmatpush3.bf16.msra.mxu1 %v4111_v44  ;;  %v1222_v18 = vld [vmem:[%s5546_s7 + $0x60] sm:$0xff]  ;;  %v1223_v51 = vld [vmem:[%s5546_s7 + $0x68] sm:$0xff]  ;;  %v1231_v4 = vpack.c.bf16 %v1221_v16, %v1220_v15  ;;  %v1228_v19 = vpack.c.bf16 %v1215_v60, %v1214_v17  ;;  %v1216_v9 = vld [vmem:[%s5546_s7 + $0x30] sm:$0xff] }
 0x39f   : >> { %3587 = vmatprep.subr.bf16.mxu0 %v4112_v0  ;;  %3749 = vmatprep.subr.bf16.mxu1 %v4112_v0  ;;  %v1232_v22 = vpack.c.bf16 %v1223_v51, %v1222_v18  ;;  %v1217_v5 = vld [vmem:[%s5546_s7 + $0x38] sm:$0xff]  ;;  %v1224_v49 = vld [vmem:[%s5546_s7 + $0x70] sm:$0xff] }
 0x3a0   : >> { %3607 = vmatprep.mubr.bf16.mxu1 %v1230_v12  ;;  %v1225_v8 = vld [vmem:[%s5546_s7 + $0x78] sm:$0xff]  ;;  %v1229_v31 = vpack.c.bf16 %v1217_v5, %v1216_v9 }
 0x3a1   : >> { %v1233_v32 = vpack.c.bf16 %v1225_v8, %v1224_v49 }
 0x3a2   : >> { %3588 = vmatpush3.bf16.msra.mxu0 %v4112_v0  ;;  %3757 = vmatpush3.bf16.msra.mxu1 %v4112_v0 }
 0x3a3   : >> { %3589 = vmatprep.subr.bf16.mxu0 %v4113_v26  ;;  %3750 = vmatprep.subr.bf16.mxu1 %v4113_v26 }
 0x3a6   : >> { %3590 = vmatpush3.bf16.msra.mxu0 %v4113_v26  ;;  %3758 = vmatpush3.bf16.msra.mxu1 %v4113_v26 }
 0x3a7   : >> { %3591 = vmatprep.subr.bf16.mxu0 %v4114_v55  ;;  %3751 = vmatprep.subr.bf16.mxu1 %v4114_v55 }
 0x3aa   : >> { %3592 = vmatpush3.bf16.msra.mxu0 %v4114_v55  ;;  %3759 = vmatpush3.bf16.msra.mxu1 %v4114_v55 }
 0x3ab   : >> { %3593 = vmatprep.subr.bf16.mxu0 %v4115_v56  ;;  %3752 = vmatprep.subr.bf16.mxu1 %v4115_v56 }
 0x3ae   : >> { %3594 = vmatpush3.bf16.msra.mxu0 %v4115_v56  ;;  %3760 = vmatpush3.bf16.msra.mxu1 %v4115_v56 }
 0x3af   : >> { %3595 = vmatprep.subr.bf16.mxu0 %v4116_v13  ;;  %3753 = vmatprep.subr.bf16.mxu1 %v4116_v13 }
 0x3b2   : >> { %3596 = vmatpush3.bf16.msra.mxu0 %v4116_v13  ;;  %3761 = vmatpush3.bf16.msra.mxu1 %v4116_v13 }
 0x3b3   : >> { %3597 = vmatprep.subr.bf16.mxu0 %v4117_v46  ;;  %3754 = vmatprep.subr.bf16.mxu1 %v4117_v46 }
 0x3b6   : >> { %3598 = vmatpush3.bf16.msra.mxu0 %v4117_v46  ;;  %3762 = vmatpush3.bf16.msra.mxu1 %v4117_v46 }
 0x3b9   : >> { %3600 = vmatmul.mubr.bf16.vlgmr.msra.gmra.mrb[0].mxu0 %v1227_v3  ;;  %3608 = vmatmul.mubr.bf16.vlgmr.msra.gmra.mrb[0].mxu1 %v1231_v4 }
 0x3ba   : >> { %3603 = vmatprep.mubr.bf16.mxu0 %v1228_v19  ;;  %3611 = vmatprep.mubr.bf16.mxu1 %v1232_v22 }
 0x3c1   : >> { %3604 = vmatmul.mubr.bf16.gmra.mrb[4].mxu0 %v1229_v31  ;;  %3612 = vmatmul.mubr.bf16.gmra.mrb[4].mxu1 %v1233_v32 }
 0x48c   : >> { %v3601_v2 = vpop.f32.mrb[0].mxu0  ;;  %v3609_v33 = vpop.f32.mrb[0].mxu1 }
 0x48d   : >> { %v1332_v34 = vpop.f32.mrb[1].mxu0  ;;  %v1364_v59 = vpop.f32.mrb[1].mxu1 }
 0x48e   : >> { %v3602_v35 = vpop.f32.mrb[2].mxu0  ;;  %v3610_v10 = vpop.f32.mrb[2].mxu1 }
 0x48f   : >> { %v1396_v20 = vpack.c.bf16 %v3602_v35, %v3601_v2  ;;  %v1400_v36 = vpack.c.bf16 %v3610_v10, %v3609_v33  ;;  %v1335_v27 = vpop.f32.mrb[3].mxu0  ;;  %v1367_v38 = vpop.f32.mrb[3].mxu1 }
 0x490   : >> { %v1395_v29 = vpack.c.bf16 %v1335_v27, %v1332_v34  ;;  %v1399_v21 = vpack.c.bf16 %v1367_v38, %v1364_v59 }
 0x491   : >> { %1408 = vst [vmem:[%s1406_s30 + $0x8] sm:$0xff] %v1396_v20  ;;  %1412 = vst [vmem:[%s1406_s30 + $0x28] sm:$0xff] %v1400_v36 }
 0x492   : >> { %1407 = vst [vmem:[%s1406_s30] sm:$0xff] %v1395_v29  ;;  %1411 = vst [vmem:[%s1406_s30 + $0x20] sm:$0xff] %v1399_v21 }
 0x494   : >> { %v3605_v25 = vpop.f32.mrb[4].mxu0  ;;  %v3613_v28 = vpop.f32.mrb[4].mxu1  ;;  %1206 = sbr.rel (!%p1204_p6) target bundleno = 920 (0x398), region = 192 }
 0x495   : >> { %v1348_v40 = vpop.f32.mrb[5].mxu0  ;;  %v1380_v1 = vpop.f32.mrb[5].mxu1 }
 0x496   : >> { %v3606_v43 = vpop.f32.mrb[6].mxu0  ;;  %v3614_v24 = vpop.f32.mrb[6].mxu1 }
 0x497   : >> { %v1398_v57 = vpack.c.bf16 %v3606_v43, %v3605_v25  ;;  %v1402_v23 = vpack.c.bf16 %v3614_v24, %v3613_v28  ;;  %v1351_v45 = vpop.f32.mrb[7].mxu0  ;;  %v1383_v61 = vpop.f32.mrb[7].mxu1 }
 0x498   : >> { %v1397_v30 = vpack.c.bf16 %v1351_v45, %v1348_v40  ;;  %v1401_v41 = vpack.c.bf16 %v1383_v61, %v1380_v1 }
 0x499   : >> { %1410 = vst [vmem:[%s1406_s30 + $0x18] sm:$0xff] %v1398_v57  ;;  %1414 = vst [vmem:[%s1406_s30 + $0x38] sm:$0xff] %v1402_v23 }
 0x49a   : >> { %1409 = vst [vmem:[%s1406_s30 + $0x10] sm:$0xff] %v1397_v30  ;;  %1413 = vst [vmem:[%s1406_s30 + $0x30] sm:$0xff] %v1401_v41 }
 0x49b PF: > { %s6347_s12 = sld [smem:[#allocation31_spill]] }
 0x4a1   : > { %p3346_p2 = scmp.ne.s32.totalorder %s6347_s12, 0 }
 0x4a2   : > { %s6348_s23 = sld [smem:[#allocation30_spill]] (!%p3346_p2)  ;;  %v1418_v54 = vld [vmem:[%s5204_s6] sm:$0xff] (!%p3346_p2)  ;;  %v1419_v50 = vld [vmem:[%s5204_s6 + $0x8] sm:$0xff] (!%p3346_p2)  ;;  %v1420_v39 = vld [vmem:[%s5204_s6 + $0x10] sm:$0xff] (!%p3346_p2) }
 0x4a3   : > { %1417 = sbr.rel (%p3346_p2) target bundleno = 1196 (0x4ac), region = 118  ;;  %v1421_v52 = vld [vmem:[%s5204_s6 + $0x18] sm:$0xff] (!%p3346_p2) }
 0x4a8   : > { %s3444_s8 = sshll.u32 (!%p3346_p2), %s6348_s23, 5 }
 0x4a9   : > { %s1424_s3 = scalar_lea.vmem (!%p3346_p2), [#allocation5], %s3444_s8 }
 0x4aa   : > { %1425 = vst [vmem:[%s1424_s3] sm:$0xff] %v1418_v54  ;;  %1426 = vst [vmem:[%s1424_s3 + $0x8] sm:$0xff] %v1419_v50 }
 0x4ab   : > { %1427 = vst [vmem:[%s1424_s3 + $0x10] sm:$0xff] %v1420_v39  ;;  %1428 = vst [vmem:[%s1424_s3 + $0x18] sm:$0xff] %v1421_v52 }
 0x4ac PF: > { %s6349_s19 = sld [smem:[#allocation30_spill]] }
 0x4b2   : > { %s3445_s2 = sshll.u32 %s6349_s19, 5  ;;  %s1436_s9 = sld [smem:[#allocation9 + %s6349_s19]] }
 0x4b3   : > { %s1431_s7 = scalar_lea.vmem [#allocation5], %s3445_s2 }
 0x4b4   : > { %v5581_v42 = vld [vmem:[%s1431_s7] sm:$0xff]  ;;  %v5583_v37 = vld [vmem:[%s1431_s7 + $0x8] sm:$0xff]  ;;  %v5585_v62 = vld [vmem:[%s1431_s7 + $0x10] sm:$0xff] }
 0x4b5   : > { %v5587_v63 = vld [vmem:[%s1431_s7 + $0x18] sm:$0xff] }
 0x4b8   : > { %p3351_p12 = scmp.ne.s32.totalorder %s1436_s9, 1 }
 0x4b9   : > { %v4769_v58 = vmov (!%p3351_p12), 0.0  }
 0x4ba   : > { %1440 = sbr.rel (%p3351_p12) target bundleno = 1218 (0x4c2), region = 122  ;;  %1441 = vst [vmem:[#allocation4] sm:$0xff] (!%p3351_p12), %v4769_v58  ;;  %1442 = vst [vmem:[#allocation4 + $0x8] sm:$0xff] (!%p3351_p12), %v4769_v58 }
 0x4bb   : > { %1443 = vst [vmem:[#allocation4 + $0x10] sm:$0xff] (!%p3351_p12), %v4769_v58  ;;  %1444 = vst [vmem:[#allocation4 + $0x18] sm:$0xff] (!%p3351_p12), %v4769_v58 }
 0x4bc   : > { %1445 = vst [vmem:[#allocation4 + $0x20] sm:$0xff] (!%p3351_p12), %v4769_v58  ;;  %1446 = vst [vmem:[#allocation4 + $0x28] sm:$0xff] (!%p3351_p12), %v4769_v58 }
 0x4bd   : > { %1447 = vst [vmem:[#allocation4 + $0x30] sm:$0xff] (!%p3351_p12), %v4769_v58  ;;  %1448 = vst [vmem:[#allocation4 + $0x38] sm:$0xff] (!%p3351_p12), %v4769_v58 }
 0x4be   : > { %1449 = vst [vmem:[#allocation4 + $0x40] sm:$0xff] (!%p3351_p12), %v4769_v58  ;;  %1450 = vst [vmem:[#allocation4 + $0x48] sm:$0xff] (!%p3351_p12), %v4769_v58 }
 0x4bf   : > { %1451 = vst [vmem:[#allocation4 + $0x50] sm:$0xff] (!%p3351_p12), %v4769_v58  ;;  %1452 = vst [vmem:[#allocation4 + $0x58] sm:$0xff] (!%p3351_p12), %v4769_v58 }
 0x4c0   : > { %1453 = vst [vmem:[#allocation4 + $0x60] sm:$0xff] (!%p3351_p12), %v4769_v58  ;;  %1454 = vst [vmem:[#allocation4 + $0x68] sm:$0xff] (!%p3351_p12), %v4769_v58 }
 0x4c1   : > { %1455 = vst [vmem:[#allocation4 + $0x70] sm:$0xff] %v4769_v58  ;;  %1456 = vst [vmem:[#allocation4 + $0x78] sm:$0xff] %v4769_v58 }
 0x4c2 PF: > { %s1481_s6 = sshra.s32 %s3296_s16, 4  ;;  %v1473_v44 = vunpack.c.l.s8.bf16 %v5581_v42  ;;  %v1477_v0 = vunpack.c.l.s8.bf16 %v5585_v62  ;;  %s6350_s18 = sld [smem:[#allocation30_spill]]  ;;  %v1474_v56 = vunpack.c.h.s8.bf16 %v5581_v42  ;;  %v1478_v13 = vunpack.c.h.s8.bf16 %v5585_v62  ;;  %v1457_v60 = vld [vmem:[#allocation4] sm:$0xff]  ;;  %v1458_v8 = vld [vmem:[#allocation4 + $0x8] sm:$0xff] }
 0x4c3   : > { %s3352_s26 = sshll.u32 %s1481_s6, 3  ;;  %v1475_v46 = vunpack.c.l.s8.bf16 %v5583_v37  ;;  %v1479_v53 = vunpack.c.l.s8.bf16 %v5587_v63  ;;  %v1476_v47 = vunpack.c.h.s8.bf16 %v5583_v37  ;;  %v1480_v15 = vunpack.c.h.s8.bf16 %v5587_v63  ;;  %v1459_v16 = vld [vmem:[#allocation4 + $0x10] sm:$0xff]  ;;  %v1460_v4 = vld [vmem:[#allocation4 + $0x18] sm:$0xff] }
 0x4c4   : > { %3631 = vmatprep.mubr.bf16.mxu0 %v1473_v44  ;;  %3639 = vmatprep.mubr.bf16.mxu1 %v1477_v0  ;;  %s5593_s10 = scalar_lea.vmem [#allocation3], %s3352_s26  ;;  %v1461_v21 = vld [vmem:[#allocation4 + $0x20] sm:$0xff]  ;;  %v1462_v61 = vld [vmem:[#allocation4 + $0x28] sm:$0xff] }
 0x4c5   : > { %v1485_v26 = vld [vmem:[%s5593_s10] sm:$0xff]  ;;  %v1486_v14 = vld [vmem:[%s5593_s10 + $0x8] sm:$0xff]  ;;  %v1487_v6 = vld [vmem:[%s5593_s10 + $0x10] sm:$0xff] }
 0x4c6   : > { %3615 = vmatprep.subr.bf16.mxu0 %v1485_v26  ;;  %3763 = vmatprep.subr.bf16.mxu1 %v1485_v26  ;;  %v1488_v48 = vld [vmem:[%s5593_s10 + $0x18] sm:$0xff]  ;;  %v1489_v7 = vld [vmem:[%s5593_s10 + $0x20] sm:$0xff]  ;;  %v1490_v11 = vld [vmem:[%s5593_s10 + $0x28] sm:$0xff] }
 0x4c7   : > { %3616 = vmatpush3.bf16.msra.mxu0 %v1485_v26  ;;  %3771 = vmatpush3.bf16.msra.mxu1 %v1485_v26  ;;  %v1491_v12 = vld [vmem:[%s5593_s10 + $0x30] sm:$0xff]  ;;  %v1492_v55 = vld [vmem:[%s5593_s10 + $0x38] sm:$0xff]  ;;  %v1467_v17 = vld [vmem:[#allocation4 + $0x50] sm:$0xff] }
 0x4c8   : > { %3617 = vmatprep.subr.bf16.mxu0 %v1486_v14  ;;  %3764 = vmatprep.subr.bf16.mxu1 %v1486_v14  ;;  %s5610_s16 = sld [smem:[#allocation10 + %s6350_s18]]  ;;  %v1465_v18 = vld [vmem:[#allocation4 + $0x40] sm:$0xff]  ;;  %v1468_v19 = vld [vmem:[#allocation4 + $0x58] sm:$0xff]  ;;  %v1466_v31 = vld [vmem:[#allocation4 + $0x48] sm:$0xff] }
 0x4c9   : > { %v1463_v38 = vld [vmem:[#allocation4 + $0x30] sm:$0xff]  ;;  %v1469_v25 = vld [vmem:[#allocation4 + $0x60] sm:$0xff]  ;;  %v1464_v1 = vld [vmem:[#allocation4 + $0x38] sm:$0xff] }
 0x4ca   : > { %v1471_v29 = vld [vmem:[#allocation4 + $0x70] sm:$0xff]  ;;  %v1472_v43 = vld [vmem:[#allocation4 + $0x78] sm:$0xff]  ;;  %v1470_v30 = vld [vmem:[#allocation4 + $0x68] sm:$0xff] }
 0x4cb   : > { %3618 = vmatpush3.bf16.msra.mxu0 %v1486_v14  ;;  %3772 = vmatpush3.bf16.msra.mxu1 %v1486_v14 }
 0x4cc   : > { %3619 = vmatprep.subr.bf16.mxu0 %v1487_v6  ;;  %3765 = vmatprep.subr.bf16.mxu1 %v1487_v6 }
 0x4ce   : > { %p3353_p0 = scmp.ne.s32.totalorder %s5610_s16, 1 }
 0x4cf   : > { %3620 = vmatpush3.bf16.msra.mxu0 %v1487_v6  ;;  %3773 = vmatpush3.bf16.msra.mxu1 %v1487_v6 }
 0x4d0   : > { %3621 = vmatprep.subr.bf16.mxu0 %v1488_v48  ;;  %3766 = vmatprep.subr.bf16.mxu1 %v1488_v48 }
 0x4d3   : > { %3622 = vmatpush3.bf16.msra.mxu0 %v1488_v48  ;;  %3774 = vmatpush3.bf16.msra.mxu1 %v1488_v48 }
 0x4d4   : > { %3623 = vmatprep.subr.bf16.mxu0 %v1489_v7  ;;  %3767 = vmatprep.subr.bf16.mxu1 %v1489_v7 }
 0x4d7   : > { %3624 = vmatpush3.bf16.msra.mxu0 %v1489_v7  ;;  %3775 = vmatpush3.bf16.msra.mxu1 %v1489_v7 }
 0x4d8   : > { %3625 = vmatprep.subr.bf16.mxu0 %v1490_v11  ;;  %3768 = vmatprep.subr.bf16.mxu1 %v1490_v11 }
 0x4db   : > { %3626 = vmatpush3.bf16.msra.mxu0 %v1490_v11  ;;  %3776 = vmatpush3.bf16.msra.mxu1 %v1490_v11 }
 0x4dc   : > { %3627 = vmatprep.subr.bf16.mxu0 %v1491_v12  ;;  %3769 = vmatprep.subr.bf16.mxu1 %v1491_v12 }
 0x4df   : > { %3628 = vmatpush3.bf16.msra.mxu0 %v1491_v12  ;;  %3777 = vmatpush3.bf16.msra.mxu1 %v1491_v12 }
 0x4e0   : > { %3629 = vmatprep.subr.bf16.mxu0 %v1492_v55  ;;  %3770 = vmatprep.subr.bf16.mxu1 %v1492_v55 }
 0x4e3   : > { %3630 = vmatpush3.bf16.msra.mxu0 %v1492_v55  ;;  %3778 = vmatpush3.bf16.msra.mxu1 %v1492_v55 }
 0x4e6   : > { %3632 = vmatmul.mubr.bf16.vlgmr.msra.gmra.mrb[0].mxu0 %v1474_v56  ;;  %3640 = vmatmul.mubr.bf16.vlgmr.msra.gmra.mrb[0].mxu1 %v1478_v13 }
 0x4e7   : > { %3635 = vmatprep.mubr.bf16.mxu0 %v1475_v46  ;;  %3643 = vmatprep.mubr.bf16.mxu1 %v1479_v53 }
 0x4ee   : > { %3636 = vmatmul.mubr.bf16.gmra.mrb[4].mxu0 %v1476_v47  ;;  %3644 = vmatmul.mubr.bf16.gmra.mrb[4].mxu1 %v1480_v15 }
 0x5b9   : > { %v3633_v51 = vpop.f32.mrb[0].mxu0  ;;  %v3641_v3 = vpop.f32.mrb[0].mxu1 }
 0x5ba   : > { %v1592_v22 = vadd.f32 %v3633_v51, %v1459_v16  ;;  %v1600_v9 = vadd.f32 %v3641_v3, %v1467_v17  ;;  %v1527_v5 = vpop.f32.mrb[1].mxu0  ;;  %v1559_v49 = vpop.f32.mrb[1].mxu1 }
 0x5bb   : > { %v1590_v32 = vadd.f32 %v1527_v5, %v1457_v60  ;;  %v1598_v2 = vadd.f32 %v1559_v49, %v1465_v18  ;;  %v3634_v33 = vpop.f32.mrb[2].mxu0  ;;  %v3642_v34 = vpop.f32.mrb[2].mxu1 }
 0x5bc   : > { %1608 = vst [vmem:[#allocation4 + $0x10] sm:$0xff] %v1592_v22  ;;  %1616 = vst [vmem:[#allocation4 + $0x50] sm:$0xff] %v1600_v9  ;;  %v1593_v59 = vadd.f32 %v3634_v33, %v1460_v4  ;;  %v1601_v35 = vadd.f32 %v3642_v34, %v1468_v19  ;;  %v1530_v10 = vpop.f32.mrb[3].mxu0  ;;  %v1562_v20 = vpop.f32.mrb[3].mxu1 }
 0x5bd   : > { %1606 = vst [vmem:[#allocation4] sm:$0xff] %v1590_v32  ;;  %1614 = vst [vmem:[#allocation4 + $0x40] sm:$0xff] %v1598_v2  ;;  %v1591_v36 = vadd.f32 %v1530_v10, %v1458_v8  ;;  %v1599_v27 = vadd.f32 %v1562_v20, %v1466_v31 }
 0x5be   : > { %1609 = vst [vmem:[#allocation4 + $0x18] sm:$0xff] %v1593_v59  ;;  %1617 = vst [vmem:[#allocation4 + $0x58] sm:$0xff] %v1601_v35 }
 0x5bf   : > { %1607 = vst [vmem:[#allocation4 + $0x8] sm:$0xff] %v1591_v36  ;;  %1615 = vst [vmem:[#allocation4 + $0x48] sm:$0xff] %v1599_v27 }
 0x5c1   : > { %v3637_v28 = vpop.f32.mrb[4].mxu0  ;;  %v3645_v40 = vpop.f32.mrb[4].mxu1  ;;  %1626 = sbr.rel (%p3353_p0) target bundleno = 1877 (0x755), region = 126 }
 0x5c2   : > { %v1596_v24 = vadd.f32 %v3637_v28, %v1463_v38  ;;  %v1604_v57 = vadd.f32 %v3645_v40, %v1471_v29  ;;  %v1543_v23 = vpop.f32.mrb[5].mxu0  ;;  %v1575_v45 = vpop.f32.mrb[5].mxu1 }
 0x5c3   : > { %v1594_v41 = vadd.f32 %v1543_v23, %v1461_v21  ;;  %v1602_v54 = vadd.f32 %v1575_v45, %v1469_v25  ;;  %v3638_v50 = vpop.f32.mrb[6].mxu0  ;;  %v3646_v39 = vpop.f32.mrb[6].mxu1 }
 0x5c4   : > { %1612 = vst [vmem:[#allocation4 + $0x30] sm:$0xff] %v1596_v24  ;;  %1620 = vst [vmem:[#allocation4 + $0x70] sm:$0xff] %v1604_v57  ;;  %v1597_v52 = vadd.f32 %v3638_v50, %v1464_v1  ;;  %v1605_v42 = vadd.f32 %v3646_v39, %v1472_v43  ;;  %v1546_v37 = vpop.f32.mrb[7].mxu0  ;;  %v1578_v62 = vpop.f32.mrb[7].mxu1 }
 0x5c5   : > { %1610 = vst [vmem:[#allocation4 + $0x20] sm:$0xff] %v1594_v41  ;;  %1618 = vst [vmem:[#allocation4 + $0x60] sm:$0xff] %v1602_v54  ;;  %v1595_v63 = vadd.f32 %v1546_v37, %v1462_v61  ;;  %v1603_v58 = vadd.f32 %v1578_v62, %v1470_v30 }
 0x5c6   : > { %1613 = vst [vmem:[#allocation4 + $0x38] sm:$0xff] %v1597_v52  ;;  %1621 = vst [vmem:[#allocation4 + $0x78] sm:$0xff] %v1605_v42 }
 0x5c7   : > { %1611 = vst [vmem:[#allocation4 + $0x28] sm:$0xff] %v1595_v63  ;;  %1619 = vst [vmem:[#allocation4 + $0x68] sm:$0xff] %v1603_v58 }
 0x5c8   : > { %v4118_v44 = vld [vmem:[#allocation17 + $0x4] ss:$12 sps:$4 sm:$0xff]   ;;  %v4120_v0 = vld [vmem:[#allocation17] ss:$12 sps:$4 sm:$0xff]   ;;  %v4770_v26 = vmov 0   ;;  %v1647_v32 = vld [vmem:[#allocation4 + $0x18] sm:$0xff] }
 0x5c9   : > { %1877 = vmatprep.mubr.bf16.mxu0 %v4770_v26  ;;  %1917 = vmatprep.mubr.bf16.mxu1 %v4770_v26  ;;  %v4121_v14 = vld [vmem:[#allocation17 + $0x1c] ss:$12 sps:$4 sm:$0xff]   ;;  %v4123_v6 = vld [vmem:[#allocation17 + $0x18] ss:$12 sps:$4 sm:$0xff]   ;;  %v4124_v48 = vld [vmem:[#allocation17 + $0x34] ss:$12 sps:$4 sm:$0xff]  }
 0x5ca   : > { %1845 = vmatprep.subr.bf16.mxu0 %v4118_v44  ;;  %3779 = vmatprep.subr.bf16.mxu1 %v4118_v44  ;;  %v4126_v7 = vld [vmem:[#allocation17 + $0x30] ss:$12 sps:$4 sm:$0xff]   ;;  %v4127_v11 = vld [vmem:[#allocation17 + $0x4c] ss:$12 sps:$4 sm:$0xff]   ;;  %v4129_v12 = vld [vmem:[#allocation17 + $0x48] ss:$12 sps:$4 sm:$0xff]  }
 0x5cb   : > { %1846 = vmatpush1.bf16.msra.mxu0 %v4120_v0  ;;  %3787 = vmatpush1.bf16.msra.mxu1 %v4120_v0  ;;  %v4130_v55 = vld [vmem:[#allocation17 + $0x64] ss:$12 sps:$4 sm:$0xff]   ;;  %v4132_v56 = vld [vmem:[#allocation17 + $0x60] ss:$12 sps:$4 sm:$0xff]   ;;  %v4133_v13 = vld [vmem:[#allocation17 + $0x7c] ss:$12 sps:$4 sm:$0xff]  }
 0x5cc   : > { %1847 = vmatprep.subr.bf16.mxu0 %v4121_v14  ;;  %3780 = vmatprep.subr.bf16.mxu1 %v4121_v14  ;;  %v4135_v46 = vld [vmem:[#allocation17 + $0x78] ss:$12 sps:$4 sm:$0xff]   ;;  %v4136_v53 = vld [vmem:[#allocation17 + $0x94] ss:$12 sps:$4 sm:$0xff]   ;;  %v4138_v47 = vld [vmem:[#allocation17 + $0x90] ss:$12 sps:$4 sm:$0xff]  }
 0x5cd   : > { %v4139_v15 = vld [vmem:[#allocation17 + $0xac] ss:$12 sps:$4 sm:$0xff]   ;;  %v4141_v16 = vld [vmem:[#allocation17 + $0xa8] ss:$12 sps:$4 sm:$0xff]   ;;  %v1644_v17 = vld [vmem:[#allocation4] sm:$0xff]  ;;  %s5641_s30 = scalar_lea.vmem [#allocation2], %s3295_s15 }
 0x5ce   : > { %v1645_v60 = vld [vmem:[#allocation4 + $0x8] sm:$0xff]  ;;  %v1652_v18 = vld [vmem:[#allocation4 + $0x40] sm:$0xff]  ;;  %v1646_v31 = vld [vmem:[#allocation4 + $0x10] sm:$0xff]  ;;  %s6359_s8 = sld [smem:[#allocation53_spill]]  ;;  %s6364_s2 = sld [smem:[#allocation54_spill]] }
 0x5cf   : > { %1848 = vmatpush1.bf16.msra.mxu0 %v4123_v6  ;;  %3788 = vmatpush1.bf16.msra.mxu1 %v4123_v6  ;;  %v1653_v51 = vld [vmem:[#allocation4 + $0x48] sm:$0xff]  ;;  %v4145_v4 = vld [vmem:[#allocation18 + $0x4] ss:$12 sps:$4 sm:$0xff]   ;;  %v5615_v19 = vpack.c.bf16 %v1645_v60, %v1644_v17  ;;  %v1655_v33 = vld [vmem:[#allocation4 + $0x58] sm:$0xff]  ;;  %v5623_v35 = vpack.c.bf16 %v1647_v32, %v1646_v31 }
 0x5d0   : > { %1849 = vmatprep.subr.bf16.mxu0 %v4124_v48  ;;  %3781 = vmatprep.subr.bf16.mxu1 %v4124_v48  ;;  %v4142_v3 = vld [vmem:[#allocation17 + $0x8] ss:$12 sps:$4 sm:$0xff]   ;;  %v5617_v22 = vpack.c.bf16 %v1653_v51, %v1652_v18  ;;  %v4143_v9 = vld [vmem:[#allocation18] ss:$12 sps:$4 sm:$0xff]   ;;  %v4147_v8 = vld [vmem:[#allocation18 + $0x18] ss:$12 sps:$4 sm:$0xff]  }
 0x5d1   : > { %v4146_v5 = vld [vmem:[#allocation17 + $0x20] ss:$12 sps:$4 sm:$0xff]   ;;  %v4149_v49 = vld [vmem:[#allocation18 + $0x1c] ss:$12 sps:$4 sm:$0xff]   ;;  %v1654_v2 = vld [vmem:[#allocation4 + $0x50] sm:$0xff] }
 0x5d2   : > { %v4150_v34 = vld [vmem:[#allocation17 + $0x38] ss:$12 sps:$4 sm:$0xff]   ;;  %v4153_v59 = vld [vmem:[#allocation18 + $0x34] ss:$12 sps:$4 sm:$0xff]   ;;  %v5625_v10 = vpack.c.bf16 %v1655_v33, %v1654_v2  ;;  %v4151_v20 = vld [vmem:[#allocation18 + $0x30] ss:$12 sps:$4 sm:$0xff]  }
 0x5d3   : > { %1850 = vmatpush1.bf16.msra.mxu0 %v4126_v7  ;;  %3789 = vmatpush1.bf16.msra.mxu1 %v4126_v7  ;;  %v4154_v36 = vld [vmem:[#allocation17 + $0x50] ss:$12 sps:$4 sm:$0xff]   ;;  %v4157_v27 = vld [vmem:[#allocation18 + $0x4c] ss:$12 sps:$4 sm:$0xff]   ;;  %v4155_v38 = vld [vmem:[#allocation18 + $0x48] ss:$12 sps:$4 sm:$0xff]  }
 0x5d4   : > { %1851 = vmatprep.subr.bf16.mxu0 %v4127_v11  ;;  %3782 = vmatprep.subr.bf16.mxu1 %v4127_v11  ;;  %v1648_v29 = vld [vmem:[#allocation4 + $0x20] sm:$0xff]  ;;  %v1649_v21 = vld [vmem:[#allocation4 + $0x28] sm:$0xff]  ;;  %v1650_v30 = vld [vmem:[#allocation4 + $0x30] sm:$0xff] }
 0x5d5   : > { %v1656_v25 = vld [vmem:[#allocation4 + $0x60] sm:$0xff]  ;;  %v1657_v28 = vld [vmem:[#allocation4 + $0x68] sm:$0xff]  ;;  %v1662_v43 = vpack.c.bf16 %v1649_v21, %v1648_v29  ;;  %v1651_v41 = vld [vmem:[#allocation4 + $0x38] sm:$0xff] }
 0x5d6   : > { %v4158_v40 = vld [vmem:[#allocation17 + $0x68] ss:$12 sps:$4 sm:$0xff]   ;;  %v4161_v1 = vld [vmem:[#allocation18 + $0x64] ss:$12 sps:$4 sm:$0xff]   ;;  %v5631_v24 = vpack.c.bf16 %v1657_v28, %v1656_v25  ;;  %v4159_v57 = vld [vmem:[#allocation18 + $0x60] ss:$12 sps:$4 sm:$0xff]   ;;  %v1663_v42 = vpack.c.bf16 %v1651_v41, %v1650_v30  ;;  %v1702_v28 = vlaneseq }
 0x5d7   : > { %1852 = vmatpush1.bf16.msra.mxu0 %v4129_v12  ;;  %3790 = vmatpush1.bf16.msra.mxu1 %v4129_v12  ;;  %v4162_v23 = vld [vmem:[#allocation17 + $0x80] ss:$12 sps:$4 sm:$0xff]   ;;  %v4165_v45 = vld [vmem:[#allocation18 + $0x7c] ss:$12 sps:$4 sm:$0xff]   ;;  %v4163_v61 = vld [vmem:[#allocation18 + $0x78] ss:$12 sps:$4 sm:$0xff]  }
 0x5d8   : > { %1853 = vmatprep.subr.bf16.mxu0 %v4130_v55  ;;  %3783 = vmatprep.subr.bf16.mxu1 %v4130_v55  ;;  %v1658_v54 = vld [vmem:[#allocation4 + $0x70] sm:$0xff]  ;;  %v1659_v50 = vld [vmem:[#allocation4 + $0x78] sm:$0xff]  ;;  %v5644_v0 = vld [vmem:[%s5641_s30] sm:$0xff] }
 0x5d9   : > { %v4166_v39 = vld [vmem:[#allocation17 + $0x98] ss:$12 sps:$4 sm:$0xff]   ;;  %v4169_v52 = vld [vmem:[#allocation18 + $0x94] ss:$12 sps:$4 sm:$0xff]   ;;  %v5636_v37 = vpack.c.bf16 %v1659_v50, %v1658_v54  ;;  %v4167_v62 = vld [vmem:[#allocation18 + $0x90] ss:$12 sps:$4 sm:$0xff]  }
 0x5da   : > { %v4170_v63 = vld [vmem:[#allocation17 + $0xb0] ss:$12 sps:$4 sm:$0xff]   ;;  %v4173_v58 = vld [vmem:[#allocation18 + $0xac] ss:$12 sps:$4 sm:$0xff]   ;;  %v4171_v44 = vld [vmem:[#allocation18 + $0xa8] ss:$12 sps:$4 sm:$0xff]  }
 0x5db   : > { %1854 = vmatpush1.bf16.msra.mxu0 %v4132_v56  ;;  %3791 = vmatpush1.bf16.msra.mxu1 %v4132_v56  ;;  %v5647_v14 = vld [vmem:[%s5641_s30 + $0x8] sm:$0xff]  ;;  %v4175_v7 = vld [vmem:[#allocation18 + $0x20] ss:$12 sps:$4 sm:$0xff]   ;;  %v5655_v11 = vld [vmem:[%s5641_s30 + $0x10] sm:$0xff] }
 0x5dc   : > { %1855 = vmatprep.subr.bf16.mxu0 %v4133_v13  ;;  %3784 = vmatprep.subr.bf16.mxu1 %v4133_v13  ;;  %v4174_v6 = vld [vmem:[#allocation18 + $0x8] ss:$12 sps:$4 sm:$0xff]   ;;  %v2055_v48 = vpack.c.bf16 %v5647_v14, %v5644_v0  ;;  %v5658_v12 = vld [vmem:[%s5641_s30 + $0x18] sm:$0xff]  ;;  %v4177_v13 = vld [vmem:[#allocation18 + $0x50] ss:$12 sps:$4 sm:$0xff]  }
 0x5dd   : > { %v4176_v55 = vld [vmem:[#allocation18 + $0x38] ss:$12 sps:$4 sm:$0xff]   ;;  %v2056_v56 = vpack.c.bf16 %v5658_v12, %v5655_v11  ;;  %v5708_v31 = vld [vmem:[%s5641_s30 + $0x68] sm:$0xff] }
 0x5de   : > { %v5676_v17 = vld [vmem:[%s5641_s30 + $0x30] sm:$0xff]  ;;  %v5679_v60 = vld [vmem:[%s5641_s30 + $0x38] sm:$0xff]  ;;  %6356 = vst [vmem:[#allocation38_spill] sm:$0xff] %v5708_v31 }
 0x5df   : > { %1856 = vmatpush1.bf16.msra.mxu0 %v4135_v46  ;;  %3792 = vmatpush1.bf16.msra.mxu1 %v4135_v46  ;;  %v5665_v46 = vld [vmem:[%s5641_s30 + $0x20] sm:$0xff]  ;;  %v4180_v18 = vld [vmem:[#allocation18 + $0x98] ss:$12 sps:$4 sm:$0xff]   ;;  %v2058_v51 = vpack.c.bf16 %v5679_v60, %v5676_v17 }
 0x5e0   : > { %1857 = vmatprep.subr.bf16.mxu0 %v4136_v53  ;;  %3785 = vmatprep.subr.bf16.mxu1 %v4136_v53  ;;  %v5668_v53 = vld [vmem:[%s5641_s30 + $0x28] sm:$0xff]  ;;  %v5714_v2 = vld [vmem:[%s5641_s30 + $0x70] sm:$0xff]  ;;  %v5717_v33 = vld [vmem:[%s5641_s30 + $0x78] sm:$0xff] }
 0x5e1   : > { %6357 = vst [vmem:[#allocation39_spill] sm:$0xff] %v5714_v2  ;;  %6358 = vst [vmem:[#allocation40_spill] sm:$0xff] %v5717_v33 }
 0x5e3   : > { %1858 = vmatpush1.bf16.msra.mxu0 %v4138_v47  ;;  %3793 = vmatpush1.bf16.msra.mxu1 %v4138_v47  ;;  %v4178_v47 = vld [vmem:[#allocation18 + $0x68] ss:$12 sps:$4 sm:$0xff]  }
 0x5e4   : > { %1859 = vmatprep.subr.bf16.mxu0 %v4139_v15  ;;  %3786 = vmatprep.subr.bf16.mxu1 %v4139_v15  ;;  %v2057_v15 = vpack.c.bf16 %v5668_v53, %v5665_v46 }
 0x5e7   : > { %1860 = vmatpush1.bf16.msra.mxu0 %v4141_v16  ;;  %3794 = vmatpush1.bf16.msra.mxu1 %v4141_v16  ;;  %v4179_v16 = vld [vmem:[#allocation18 + $0x80] ss:$12 sps:$4 sm:$0xff]  }
 0x5e8   : > { %3647 = vmatprep.subr.bf16.mxu1 %v4142_v3  ;;  %2223 = vmatprep.subr.bf16.mxu0 %v4145_v4  ;;  %v5687_v4 = vld [vmem:[%s5641_s30 + $0x40] sm:$0xff] }
 0x5e9   : > { %6351 = vst [vmem:[#allocation33_spill] sm:$0xff] %v5687_v4 }
 0x5ea   : > { %1878 = vmatmul.mubr.bf16.vlgmr.msra.gmra.mrb[0].mxu0 %v5615_v19  ;;  %1918 = vmatmul.mubr.bf16.vlgmr.msra.gmra.mrb[0].mxu1 %v5617_v22 }
 0x5eb   : > { %3648 = vmatpush3.bf16.msra.mxu1 %v4142_v3  ;;  %2224 = vmatpush1.bf16.msra.mxu0 %v4143_v9  ;;  %v4181_v3 = vld [vmem:[#allocation18 + $0xb0] ss:$12 sps:$4 sm:$0xff]  }
 0x5ec   : > { %3649 = vmatprep.subr.bf16.mxu1 %v4146_v5  ;;  %2225 = vmatprep.subr.bf16.mxu0 %v4149_v49  ;;  %v5696_v9 = vld [vmem:[%s5641_s30 + $0x50] sm:$0xff] }
 0x5ed   : > { %1887 = vmatprep.mubr.bf16.mxu0 %v4770_v26  ;;  %1927 = vmatprep.mubr.bf16.mxu1 %v4770_v26  ;;  %6353 = vst [vmem:[#allocation35_spill] sm:$0xff] %v5696_v9 }
 0x5ef   : > { %3650 = vmatpush3.bf16.msra.mxu1 %v4146_v5  ;;  %2226 = vmatpush1.bf16.msra.mxu0 %v4147_v8  ;;  %v5699_v5 = vld [vmem:[%s5641_s30 + $0x58] sm:$0xff]  ;;  %v5705_v8 = vld [vmem:[%s5641_s30 + $0x60] sm:$0xff] }
 0x5f0   : > { %3651 = vmatprep.subr.bf16.mxu1 %v4150_v34  ;;  %2227 = vmatprep.subr.bf16.mxu0 %v4153_v59  ;;  %6354 = vst [vmem:[#allocation36_spill] sm:$0xff] %v5699_v5  ;;  %v2060_v49 = vpack.c.bf16 %v5699_v5, %v5696_v9  ;;  %6355 = vst [vmem:[#allocation37_spill] sm:$0xff] %v5705_v8  ;;  %v2061_v32 = vpack.c.bf16 %v5708_v31, %v5705_v8 }
 0x5f2   : > { %1888 = vmatmul.mubr.bf16.gmra.mrb[4].mxu0 %v5623_v35  ;;  %1928 = vmatmul.mubr.bf16.gmra.mrb[4].mxu1 %v5625_v10 }
 0x5f3   : > { %3652 = vmatpush3.bf16.msra.mxu1 %v4150_v34  ;;  %2228 = vmatpush1.bf16.msra.mxu0 %v4151_v20  ;;  %v2062_v34 = vpack.c.bf16 %v5717_v33, %v5714_v2 }
 0x5f4   : > { %3653 = vmatprep.subr.bf16.mxu1 %v4154_v36  ;;  %2229 = vmatprep.subr.bf16.mxu0 %v4157_v27 }
 0x5f5   : > { %1897 = vmatprep.mubr.bf16.mxu0 %v4770_v26  ;;  %1937 = vmatprep.mubr.bf16.mxu1 %v4770_v26 }
 0x5f7   : > { %3654 = vmatpush3.bf16.msra.mxu1 %v4154_v36  ;;  %2230 = vmatpush1.bf16.msra.mxu0 %v4155_v38 }
 0x5f8   : > { %3655 = vmatprep.subr.bf16.mxu1 %v4158_v40  ;;  %2231 = vmatprep.subr.bf16.mxu0 %v4161_v1  ;;  %v5745_v1 = vshrl.u32 %v1702_v28, 7 }
 0x5fa   : > { %1898 = vmatmul.mubr.bf16.gmra.mrb[8].mxu0 %v1662_v43  ;;  %1938 = vmatmul.mubr.bf16.gmra.mrb[8].mxu1 %v5631_v24  ;;  %v1708_v30 = vsub.s32 1, %v5745_v1 }
 0x5fb   : > { %3656 = vmatpush3.bf16.msra.mxu1 %v4158_v40  ;;  %2232 = vmatpush1.bf16.msra.mxu0 %v4159_v57 }
 0x5fc   : > { %3657 = vmatprep.subr.bf16.mxu1 %v4162_v23  ;;  %2233 = vmatprep.subr.bf16.mxu0 %v4165_v45 }
 0x5fd   : > { %1907 = vmatprep.mubr.bf16.mxu0 %v4770_v26  ;;  %1947 = vmatprep.mubr.bf16.mxu1 %v4770_v26 }
 0x5ff   : > { %3658 = vmatpush3.bf16.msra.mxu1 %v4162_v23  ;;  %2234 = vmatpush1.bf16.msra.mxu0 %v4163_v61  ;;  %v1704_v23 = vsub.s32 0, %v5745_v1  ;;  %v5759_v61 = vld [vmem:[%s6359_s8] sm:$0x7] }
 0x600   : > { %3659 = vmatprep.subr.bf16.mxu1 %v4166_v39  ;;  %2235 = vmatprep.subr.bf16.mxu0 %v4169_v52  ;;  %v5766_v54 = vrot.slane %v5759_v61, %v1708_v30 }
 0x601   : > { %v5763_v41 = vrot.slane %v5759_v61, %v1704_v23 }
 0x602   : > { %1908 = vmatmul.mubr.bf16.gmra.mrb[12].mxu0 %v1663_v42  ;;  %1948 = vmatmul.mubr.bf16.gmra.mrb[12].mxu1 %v5636_v37 }
 0x603   : > { %3660 = vmatpush3.bf16.msra.mxu1 %v4166_v39  ;;  %2236 = vmatpush1.bf16.msra.mxu0 %v4167_v62 }
 0x604   : > { %3661 = vmatprep.subr.bf16.mxu1 %v4170_v63  ;;  %2237 = vmatprep.subr.bf16.mxu0 %v4173_v58 }
 0x605   : > { %3663 = vmatprep.mubr.bf16.mxu1 %v5615_v19  ;;  %2255 = vmatprep.mubr.bf16.mxu0 %v4770_v26  ;;  %v5690_v19 = vld [vmem:[%s5641_s30 + $0x48] sm:$0xff] }
 0x606   : > { %6352 = vst [vmem:[#allocation34_spill] sm:$0xff] %v5690_v19 }
 0x607   : > { %3662 = vmatpush3.bf16.msra.mxu1 %v4170_v63  ;;  %2238 = vmatpush1.bf16.msra.mxu0 %v4171_v44 }
 0x608   : > { %3679 = vmatprep.subr.bf16.mxu1 %v4174_v6 }
 0x60a   : > { %3664 = vmatmul.mubr.bf16.vlgmr.msra.gmra.mrb[16].mxu1 %v5623_v35  ;;  %2256 = vmatmul.mubr.bf16.vlgmr.msra.gmra.mrb[0].mxu0 %v2055_v48 }
 0x60b   : > { %3680 = vmatpush3.bf16.msra.mxu1 %v4174_v6  ;;  %3667 = vmatprep.mubr.bf16.mxu1 %v1662_v43 }
 0x60c   : > { %3681 = vmatprep.subr.bf16.mxu1 %v4175_v7  ;;  %2265 = vmatprep.mubr.bf16.mxu0 %v4770_v26 }
 0x60f   : > { %3682 = vmatpush3.bf16.msra.mxu1 %v4175_v7 }
 0x610   : > { %3683 = vmatprep.subr.bf16.mxu1 %v4176_v55 }
 0x612   : > { %3668 = vmatmul.mubr.bf16.gmra.mrb[20].mxu1 %v1663_v42  ;;  %2266 = vmatmul.mubr.bf16.gmra.mrb[4].mxu0 %v2056_v56 }
 0x613   : > { %3684 = vmatpush3.bf16.msra.mxu1 %v4176_v55  ;;  %3671 = vmatprep.mubr.bf16.mxu1 %v5617_v22  ;;  %v2059_v22 = vpack.c.bf16 %v5690_v19, %v5687_v4 }
 0x614   : > { %3685 = vmatprep.subr.bf16.mxu1 %v4177_v13  ;;  %2275 = vmatprep.mubr.bf16.mxu0 %v4770_v26 }
 0x617   : > { %3686 = vmatpush3.bf16.msra.mxu1 %v4177_v13 }
 0x618   : > { %3687 = vmatprep.subr.bf16.mxu1 %v4178_v47 }
 0x61a   : > { %3672 = vmatmul.mubr.bf16.gmra.mrb[24].mxu1 %v5625_v10  ;;  %2276 = vmatmul.mubr.bf16.gmra.mrb[8].mxu0 %v2057_v15 }
 0x61b   : > { %3688 = vmatpush3.bf16.msra.mxu1 %v4178_v47  ;;  %3675 = vmatprep.mubr.bf16.mxu1 %v5631_v24 }
 0x61c   : > { %3689 = vmatprep.subr.bf16.mxu1 %v4179_v16  ;;  %2285 = vmatprep.mubr.bf16.mxu0 %v4770_v26 }
 0x61f   : > { %3690 = vmatpush3.bf16.msra.mxu1 %v4179_v16 }
 0x620   : > { %3691 = vmatprep.subr.bf16.mxu1 %v4180_v18 }
 0x622   : > { %3676 = vmatmul.mubr.bf16.gmra.mrb[28].mxu1 %v5636_v37  ;;  %2286 = vmatmul.mubr.bf16.gmra.mrb[12].mxu0 %v2058_v51 }
 0x623   : > { %3692 = vmatpush3.bf16.msra.mxu1 %v4180_v18  ;;  %2295 = vmatprep.mubr.bf16.mxu0 %v4770_v26 }
 0x624   : > { %3693 = vmatprep.subr.bf16.mxu1 %v4181_v3  ;;  %3695 = vmatprep.mubr.bf16.mxu1 %v2055_v48 }
 0x627   : > { %3694 = vmatpush3.bf16.msra.mxu1 %v4181_v3 }
 0x62a   : > { %2296 = vmatmul.mubr.bf16.gmra.mrb[16].mxu0 %v2059_v22  ;;  %3696 = vmatmul.mubr.bf16.vlgmr.msra.gmra.mrb[32].mxu1 %v2056_v56 }
 0x62b   : > { %2305 = vmatprep.mubr.bf16.mxu0 %v4770_v26  ;;  %3699 = vmatprep.mubr.bf16.mxu1 %v2057_v15 }
 0x632   : > { %2306 = vmatmul.mubr.bf16.gmra.mrb[20].mxu0 %v2060_v49  ;;  %3700 = vmatmul.mubr.bf16.gmra.mrb[36].mxu1 %v2058_v51 }
 0x633   : > { %2315 = vmatprep.mubr.bf16.mxu0 %v4770_v26  ;;  %3703 = vmatprep.mubr.bf16.mxu1 %v2059_v22 }
 0x63a   : > { %2316 = vmatmul.mubr.bf16.gmra.mrb[24].mxu0 %v2061_v32  ;;  %3704 = vmatmul.mubr.bf16.gmra.mrb[40].mxu1 %v2060_v49 }
 0x63b   : > { %2325 = vmatprep.mubr.bf16.mxu0 %v4770_v26  ;;  %3707 = vmatprep.mubr.bf16.mxu1 %v2061_v32 }
 0x642   : > { %2326 = vmatmul.mubr.bf16.gmra.mrb[28].mxu0 %v2062_v34  ;;  %3708 = vmatmul.mubr.bf16.gmra.mrb[44].mxu1 %v2062_v34 }
 0x6bd   : > { %v5721_v59 = vpop.f32.mrb[0].mxu1 }
 0x6be   : > { %v5723_v35 = vpop.f32.mrb[1].mxu1 }
 0x6bf   : > { %v5725_v10 = vpop.f32.mrb[2].mxu1 }
 0x6c0   : > { %v5727_v20 = vpop.f32.mrb[3].mxu1 }
 0x6c5   : > { %v5729_v36 = vpop.f32.mrb[4].mxu1 }
 0x6c6   : > { %v5731_v26 = vpop.f32.mrb[5].mxu1 }
 0x6c7   : > { %v5733_v27 = vpop.f32.mrb[6].mxu1 }
 0x6c8   : > { %v5735_v38 = vpop.f32.mrb[7].mxu1 }
 0x6cd   : > { %v5737_v29 = vpop.f32.mrb[8].mxu1 }
 0x6ce   : > { %v5739_v21 = vpop.f32.mrb[9].mxu1 }
 0x6cf   : > { %v5741_v25 = vpop.f32.mrb[10].mxu1 }
 0x6d0   : > { %v5743_v40 = vpop.f32.mrb[11].mxu1 }
 0x6d5   : > { %v5747_v43 = vpop.f32.mrb[12].mxu1 }
 0x6d6   : > { %v5749_v24 = vpop.f32.mrb[13].mxu1 }
 0x6d7   : > { %v5751_v57 = vpop.f32.mrb[14].mxu1 }
 0x6d8   : > { %v5754_v45 = vpop.f32.mrb[15].mxu1 }
 0x6dd   : > { %v2257_v50 = vpop.f32.mrb[0].mxu0  ;;  %v5768_v39 = vpop.f32.mrb[16].mxu1 }
 0x6de   : > { %v3795_v52 = vadd.f32 %v2257_v50, %v5763_v41  ;;  %v2259_v42 = vpop.f32.mrb[1].mxu0  ;;  %v5771_v37 = vpop.f32.mrb[17].mxu1 }
 0x6df   : > { %v3796_v62 = vadd.f32 %v2259_v42, %v5766_v54  ;;  %v2261_v63 = vpop.f32.mrb[2].mxu0  ;;  %v5774_v58 = vpop.f32.mrb[18].mxu1 }
 0x6e0   : > { %v3402_v44 = vmul.f32 -1.442695, %v3795_v52  ;;  %v3797_v6 = vadd.f32 %v2261_v63, %v5763_v41  ;;  %v2263_v48 = vpop.f32.mrb[3].mxu0  ;;  %v5777_v7 = vpop.f32.mrb[19].mxu1 }
 0x6e1   : > { %v3403_v55 = vmul.f32 -1.442695, %v3796_v62  ;;  %v3798_v56 = vadd.f32 %v2263_v48, %v5766_v54 }
 0x6e2   : > { %4182 = vpow2.f32 %v3402_v44  ;;  %v3404_v13 = vmul.f32 -1.442695, %v3797_v6 }
 0x6e3   : > { %4184 = vpow2.f32 %v3403_v55  ;;  %v3405_v47 = vmul.f32 -1.442695, %v3798_v56 }
 0x6e4   : > { %4186 = vpow2.f32 %v3404_v13 }
 0x6e5   : > { %v2267_v15 = vpop.f32.mrb[4].mxu0  ;;  %v5780_v16 = vpop.f32.mrb[20].mxu1  ;;  %4188 = vpow2.f32 %v3405_v47 }
 0x6e6   : > { %v3799_v18 = vadd.f32 %v2267_v15, %v5763_v41  ;;  %v2269_v51 = vpop.f32.mrb[5].mxu0  ;;  %v5783_v3 = vpop.f32.mrb[21].mxu1 }
 0x6e7   : > { %v3800_v22 = vadd.f32 %v2269_v51, %v5766_v54  ;;  %v2271_v49 = vpop.f32.mrb[6].mxu0  ;;  %v5786_v32 = vpop.f32.mrb[22].mxu1 }
 0x6e8   : > { %v3406_v34 = vmul.f32 -1.442695, %v3799_v18  ;;  %v3801_v28 = vadd.f32 %v2271_v49, %v5763_v41  ;;  %v2273_v23 = vpop.f32.mrb[7].mxu0  ;;  %v5789_v30 = vpop.f32.mrb[23].mxu1  ;;  %v1712_v49 = vsub.s32 2, %v5745_v1 }
 0x6e9   : > { %v3407_v50 = vmul.f32 -1.442695, %v3800_v22  ;;  %v3802_v52 = vadd.f32 %v2273_v23, %v5766_v54 }
 0x6ea   : > { %4190 = vpow2.f32 %v3406_v34  ;;  %v3408_v42 = vmul.f32 -1.442695, %v3801_v28  ;;  %v5806_v1 = vrot.slane %v5759_v61, %v1712_v49 }
 0x6eb   : > { %v3409_v62 = vmul.f32 -1.442695, %v3802_v52 }
 0x6ec   : > { %v4183_v63 = vpop.eup %4182  ;;  %4192 = vpow2.f32 %v3408_v42 }
 0x6ed   : > { %v4185_v44 = vpop.eup %4184  ;;  %v2561_v6 = vadd.f32 1.0, %v4183_v63  ;;  %4194 = vpow2.f32 %v3407_v50  ;;  %v2277_v48 = vpop.f32.mrb[8].mxu0 }
 0x6ee   : > { %v5792_v55 = vpop.f32.mrb[24].mxu1  ;;  %v2562_v56 = vadd.f32 1.0, %v4185_v44  ;;  %4196 = vpow2.f32 %v3409_v62  ;;  %v3803_v13 = vadd.f32 %v2277_v48, %v5763_v41  ;;  %v2279_v15 = vpop.f32.mrb[9].mxu0 }
 0x6ef   : > { %v5795_v47 = vpop.f32.mrb[25].mxu1  ;;  %v3804_v18 = vadd.f32 %v2279_v15, %v5766_v54  ;;  %v2281_v51 = vpop.f32.mrb[10].mxu0  ;;  %4198 = vrcp.f32 %v2561_v6  ;;  %v1922_v6 = vadd.f32 %v5723_v35, %v5766_v54  ;;  %v5823_v35 = vadd.f32 %v5727_v20, %v5766_v54 }
 0x6f0   : > { %v5798_v22 = vpop.f32.mrb[26].mxu1  ;;  %v3410_v34 = vmul.f32 -1.442695, %v3803_v13  ;;  %v3805_v28 = vadd.f32 %v2281_v51, %v5763_v41  ;;  %v2283_v23 = vpop.f32.mrb[11].mxu0  ;;  %4200 = vrcp.f32 %v2562_v56  ;;  %v1920_v13 = vadd.f32 %v5721_v59, %v5763_v41 }
 0x6f1   : > { %v5802_v50 = vpop.f32.mrb[27].mxu1  ;;  %v4187_v52 = vpop.eup %4186  ;;  %v3411_v42 = vmul.f32 -1.442695, %v3804_v18  ;;  %v3806_v62 = vadd.f32 %v2283_v23, %v5766_v54  ;;  %v5837_v20 = vadd.f32 %v5731_v26, %v5766_v54  ;;  %v5850_v26 = vadd.f32 %v5737_v29, %v5763_v41 }
 0x6f2   : > { %v3412_v63 = vmul.f32 -1.442695, %v3805_v28  ;;  %v4189_v44 = vpop.eup %4188  ;;  %4202 = vpow2.f32 %v3410_v34  ;;  %v2563_v33 = vadd.f32 1.0, %v4187_v52  ;;  %v5816_v34 = vadd.f32 %v5725_v10, %v5763_v41 }
 0x6f3   : > { %v3413_v48 = vmul.f32 -1.442695, %v3806_v62  ;;  %4204 = vpow2.f32 %v3411_v42  ;;  %v2564_v23 = vadd.f32 1.0, %v4189_v44  ;;  %v5830_v44 = vadd.f32 %v5729_v36, %v5763_v41 }
 0x6f4   : > { %v4191_v15 = vpop.eup %4190  ;;  %4206 = vpow2.f32 %v3412_v63  ;;  %v5869_v29 = vadd.f32 %v5743_v40, %v5766_v54 }
 0x6f5   : > { %v2565_v18 = vadd.f32 1.0, %v4191_v15  ;;  %v2287_v51 = vpop.f32.mrb[12].mxu0  ;;  %v5812_v56 = vpop.f32.mrb[28].mxu1  ;;  %4208 = vpow2.f32 %v3413_v48 }
 0x6f6   : > { %6360 = vst [vmem:[#allocation41_spill] sm:$0xff] %v5812_v56  ;;  %v4193_v28 = vpop.eup %4192  ;;  %v3807_v61 = vadd.f32 %v2287_v51, %v5763_v41  ;;  %v2289_v49 = vpop.f32.mrb[13].mxu0 }
 0x6f7   : > { %v5819_v52 = vpop.f32.mrb[29].mxu1  ;;  %v4195_v59 = vpop.eup %4194  ;;  %4210 = vrcp.f32 %v2565_v18  ;;  %v2567_v42 = vadd.f32 1.0, %v4193_v28  ;;  %v3808_v62 = vadd.f32 %v2289_v49, %v5766_v54  ;;  %v5842_v49 = vadd.f32 %v5733_v27, %v5763_v41 }
 0x6f8   : > { %6361 = vst [vmem:[#allocation42_spill] sm:$0xff] %v5819_v52  ;;  %v2291_v63 = vpop.f32.mrb[14].mxu0  ;;  %v5826_v15 = vpop.f32.mrb[30].mxu1  ;;  %4212 = vrcp.f32 %v2563_v33  ;;  %v3414_v48 = vmul.f32 -1.442695, %v3807_v61  ;;  %v2566_v33 = vadd.f32 1.0, %v4195_v59 }
 0x6f9   : > { %6362 = vst [vmem:[#allocation43_spill] sm:$0xff] %v5826_v15  ;;  %v4197_v10 = vpop.eup %4196  ;;  %v3809_v51 = vadd.f32 %v2291_v63, %v5763_v41  ;;  %v2293_v2 = vpop.f32.mrb[15].mxu0  ;;  %4214 = vrcp.f32 %v2567_v42  ;;  %v3415_v18 = vmul.f32 -1.442695, %v3808_v62  ;;  %v5846_v63 = vadd.f32 %v5735_v38, %v5766_v54 }
 0x6fa   : > { %v5833_v31 = vpop.f32.mrb[31].mxu1  ;;  %v3810_v28 = vadd.f32 %v2293_v2, %v5766_v54  ;;  %4216 = vrcp.f32 %v2564_v23  ;;  %v4199_v61 = vpop.eup %4198  ;;  %v2568_v42 = vadd.f32 1.0, %v4197_v10  ;;  %v5855_v2 = vld [vmem:[%s6364_s2] ss:$0 sm:$0xff]  ;;  %v5861_v23 = vadd.f32 %v5739_v21, %v5766_v54 }
 0x6fb   : > { %6363 = vst [vmem:[#allocation44_spill] sm:$0xff] %v5833_v31  ;;  %v3416_v36 = vmul.f32 -1.442695, %v3809_v51  ;;  %4218 = vpow2.f32 %v3414_v48  ;;  %v5857_v27 = vpop.eup %4200  ;;  %v5865_v38 = vadd.f32 %v5741_v25, %v5763_v41  ;;  %v5873_v62 = vadd.f32 %v5747_v43, %v5763_v41 }
 0x6fc   : > { %4220 = vpow2.f32 %v3415_v18  ;;  %v4203_v59 = vpop.eup %4202  ;;  %v5877_v10 = vadd.f32 %v5749_v24, %v5766_v54  ;;  %v3417_v21 = vmul.f32 -1.442695, %v3810_v28 }
 0x6fd   : > { %4222 = vpow2.f32 %v3416_v36  ;;  %v2297_v48 = vpop.f32.mrb[16].mxu0  ;;  %v3697_v51 = vpop.f32.mrb[32].mxu1  ;;  %v2569_v8 = vadd.f32 1.0, %v4203_v59 }
 0x6fe   : > { %v4205_v25 = vpop.eup %4204  ;;  %4224 = vrcp.f32 %v2566_v33  ;;  %v2449_v15 = vadd.f32 %v2297_v48, %v1920_v13  ;;  %v2666_v40 = vadd.f32 %v3697_v51, %v5855_v2  ;;  %v2299_v18 = vpop.f32.mrb[17].mxu0  ;;  %v1993_v51 = vadd.f32 %v5771_v37, %v5806_v1 }
 0x6ff   : > { %v2370_v56 = vpop.f32.mrb[33].mxu1  ;;  %v4207_v5 = vpop.eup %4206  ;;  %4226 = vrcp.f32 %v2568_v42  ;;  %v2570_v43 = vadd.f32 1.0, %v4205_v25  ;;  %v2450_v9 = vadd.f32 %v2299_v18, %v1922_v6  ;;  %v2004_v37 = vadd.f32 %v5774_v58, %v5806_v1 }
 0x700   : > { %v2664_v31 = vadd.f32 %v5855_v2, %v2370_v56  ;;  %v2301_v24 = vpop.f32.mrb[18].mxu0  ;;  %v3698_v19 = vpop.f32.mrb[34].mxu1  ;;  %4228 = vrcp.f32 %v2569_v8  ;;  %v2571_v28 = vadd.f32 1.0, %v4207_v5  ;;  %v3418_v52 = vmul.f32 -1.442695, %v2449_v15 }
 0x701   : > { %v4209_v36 = vpop.eup %4208  ;;  %v2451_v33 = vadd.f32 %v2301_v24, %v5816_v34  ;;  %v2303_v59 = vpop.f32.mrb[19].mxu0  ;;  %4230 = vpow2.f32 %v3417_v21  ;;  %v2001_v56 = vadd.f32 %v5768_v39, %v5806_v1  ;;  %v2667_v5 = vadd.f32 %v3698_v19, %v5855_v2 }
 0x702   : > { %v2373_v13 = vpop.f32.mrb[35].mxu1  ;;  %v4211_v48 = vpop.eup %4210  ;;  %v2572_v4 = vadd.f32 1.0, %v4209_v36  ;;  %v2680_v42 = vmul.f32 %v4199_v61, %v2664_v31  ;;  %4232 = vrcp.f32 %v2571_v28  ;;  %v5889_v34 = vadd.f32 %v5751_v57, %v5763_v41 }
 0x703   : > { %v4213_v6 = vpop.eup %4212  ;;  %v2682_v25 = vmul.f32 %v4211_v48, %v2666_v40  ;;  %4234 = vrcp.f32 %v2570_v43  ;;  %v2452_v39 = vadd.f32 %v2303_v59, %v5823_v35  ;;  %v5898_v19 = vadd.f32 %v5754_v45, %v5766_v54 }
 0x704   : > { %v4215_v8 = vpop.eup %4214  ;;  %v2696_v15 = vadd.f32 %v2680_v42, %v1993_v51  ;;  %4236 = vpow2.f32 %v3418_v52  ;;  %v3419_v57 = vmul.f32 -1.442695, %v2450_v9  ;;  %v2665_v41 = vadd.f32 %v5855_v2, %v2373_v13 }
 0x705   : > { %v5893_v21 = vpop.eup %4216  ;;  %v2698_v31 = vadd.f32 %v2682_v25, %v2001_v56  ;;  %v2683_v61 = vmul.f32 %v4215_v8, %v2667_v5  ;;  %4238 = vrcp.f32 %v2572_v4  ;;  %v2307_v18 = vpop.f32.mrb[20].mxu0  ;;  %v1996_v24 = vadd.f32 %v5777_v7, %v5806_v1 }
 0x706   : > { %v4219_v40 = vpop.eup %4218  ;;  %v3701_v43 = vpop.f32.mrb[36].mxu1  ;;  %v2681_v45 = vmul.f32 %v4213_v6, %v2665_v41  ;;  %v2453_v4 = vadd.f32 %v2307_v18, %v5830_v44  ;;  %v3420_v42 = vmul.f32 -1.442695, %v2451_v33  ;;  %v2009_v8 = vadd.f32 %v5783_v3, %v5806_v1 }
 0x707   : > { %v4221_v58 = vpop.eup %4220  ;;  %v2573_v52 = vadd.f32 1.0, %v4219_v40  ;;  %4240 = vtanh.f32 %v2698_v31  ;;  %v2699_v36 = vadd.f32 %v2683_v61, %v2004_v37  ;;  %v2309_v28 = vpop.f32.mrb[21].mxu0  ;;  %v2012_v6 = vadd.f32 %v5789_v30, %v5806_v1 }
 0x708   : > { %v2386_v35 = vpop.f32.mrb[37].mxu1  ;;  %v4223_v59 = vpop.eup %4222  ;;  %v2574_v48 = vadd.f32 1.0, %v4221_v58  ;;  %4242 = vtanh.f32 %v2696_v15  ;;  %v2454_v56 = vadd.f32 %v2309_v28, %v5837_v20  ;;  %v2697_v44 = vadd.f32 %v2681_v45, %v1996_v24 }
 0x709   : > { %v2311_v9 = vpop.f32.mrb[22].mxu0  ;;  %v3702_v54 = vpop.f32.mrb[38].mxu1  ;;  %4244 = vrcp.f32 %v2573_v52  ;;  %v2575_v51 = vadd.f32 1.0, %v4223_v59  ;;  %v3421_v15 = vmul.f32 -1.442695, %v2452_v39  ;;  %v2668_v33 = vadd.f32 %v5855_v2, %v2386_v35 }
 0x70a   : > { %v4225_v13 = vpop.eup %4224  ;;  %v2313_v7 = vpop.f32.mrb[23].mxu0  ;;  %4246 = vpow2.f32 %v3419_v57  ;;  %v2455_v31 = vadd.f32 %v2311_v9, %v5842_v49  ;;  %v2728_v61 = vsub.f32 1.0, %v5857_v27  ;;  %v3422_v57 = vmul.f32 -1.442695, %v2453_v4 }
 0x70b   : > { %v2389_v25 = vpop.f32.mrb[39].mxu1  ;;  %v5905_v5 = vpop.eup %4226  ;;  %4248 = vrcp.f32 %v2575_v51  ;;  %v2456_v40 = vadd.f32 %v2313_v7, %v5846_v63  ;;  %v2730_v18 = vsub.f32 1.0, %v4225_v13  ;;  %v2762_v30 = vmul.f32 %v4225_v13, %v5655_v11 }
 0x70c   : > { %v4229_v37 = vpop.eup %4228  ;;  %4250 = vrcp.f32 %v2574_v48  ;;  %v2669_v3 = vadd.f32 %v5855_v2, %v2389_v25  ;;  %v2670_v49 = vadd.f32 %v3701_v43, %v5855_v2  ;;  %v3423_v59 = vmul.f32 -1.442695, %v2454_v56 }
 0x70d   : > { %v4231_v20 = vpop.eup %4230  ;;  %4252 = vpow2.f32 %v3420_v42  ;;  %v2684_v39 = vmul.f32 %v4229_v37, %v2668_v33  ;;  %v2317_v52 = vpop.f32.mrb[24].mxu0  ;;  %v3424_v7 = vmul.f32 -1.442695, %v2455_v31  ;;  %v2671_v25 = vadd.f32 %v3702_v54, %v5855_v2 }
 0x70e   : > { %v4233_v41 = vpop.eup %4232  ;;  %4254 = vtanh.f32 %v2699_v36  ;;  %v5920_v28 = vpop.f32.mrb[40].mxu1  ;;  %v2576_v63 = vadd.f32 1.0, %v4231_v20  ;;  %v2457_v48 = vadd.f32 %v2317_v52, %v5850_v26  ;;  %v2760_v31 = vmul.f32 %v5857_v27, %v5644_v0 }
 0x70f   : > { %v5917_v58 = vpop.eup %4234  ;;  %v2685_v24 = vmul.f32 %v4233_v41, %v2669_v3  ;;  %4256 = vpow2.f32 %v3421_v15  ;;  %v2319_v45 = vpop.f32.mrb[25].mxu0  ;;  %v2700_v36 = vadd.f32 %v2684_v39, %v2009_v8  ;;  %v2017_v3 = vadd.f32 %v5780_v16, %v5806_v1 }
 0x710   : > { %v4237_v35 = vpop.eup %4236  ;;  %v5923_v11 = vpop.f32.mrb[41].mxu1  ;;  %4258 = vtanh.f32 %v2697_v44  ;;  %v5931_v56 = vadd.f32 %v2319_v45, %v5861_v23  ;;  %v3425_v23 = vmul.f32 -1.442695, %v2456_v40  ;;  %v2731_v27 = vsub.f32 1.0, %v5905_v5 }
 0x711   : > { %v5925_v4 = vpop.eup %4238  ;;  %v2577_v9 = vadd.f32 1.0, %v4237_v35  ;;  %v2701_v43 = vadd.f32 %v2685_v24, %v2012_v6  ;;  %v2321_v13 = vpop.f32.mrb[26].mxu0  ;;  %4260 = vpow2.f32 %v3422_v57  ;;  %v2763_v24 = vmul.f32 %v5905_v5, %v5658_v12 }
 0x712   : > { %v5927_v51 = vpop.f32.mrb[42].mxu1  ;;  %v4241_v42 = vpop.eup %4240  ;;  %v2459_v8 = vadd.f32 %v2321_v13, %v5865_v38  ;;  %v2729_v38 = vsub.f32 1.0, %v5893_v21  ;;  %v3426_v5 = vmul.f32 -1.442695, %v2457_v48 }
 0x713   : > { %v2323_v26 = vpop.f32.mrb[27].mxu0  ;;  %v5933_v37 = vpop.f32.mrb[43].mxu1  ;;  %4262 = vrcp.f32 %v2577_v9  ;;  %v2746_v33 = vmul.f32 %v4241_v42, %v2730_v18 }
 0x714   : > { %v4243_v15 = vpop.eup %4242  ;;  %v5937_v6 = vadd.f32 %v2323_v26, %v5869_v29  ;;  %4264 = vrcp.f32 %v2576_v63  ;;  %v2020_v29 = vadd.f32 %v5786_v32, %v5806_v1 }
 0x715   : > { %v4245_v44 = vpop.eup %4244  ;;  %v2744_v54 = vmul.f32 %v4243_v15, %v2728_v61  ;;  %v2778_v41 = vadd.f32 %v2762_v30, %v2746_v33  ;;  %4266 = vpow2.f32 %v3423_v59  ;;  %v2327_v40 = vpop.f32.mrb[28].mxu0  ;;  %v2761_v33 = vmul.f32 %v5893_v21, %v5647_v14 }
 0x716   : > { %v4247_v20 = vpop.eup %4246  ;;  %v2686_v18 = vmul.f32 %v4245_v44, %v2670_v49  ;;  %4268 = vpow2.f32 %v3424_v7  ;;  %v5950_v30 = vpop.f32.mrb[44].mxu1  ;;  %v2461_v32 = vadd.f32 %v2327_v40, %v5873_v62  ;;  %v2672_v44 = vadd.f32 %v5855_v2, %v5923_v11 }
 0x717   : > { %v4249_v57 = vpop.eup %4248  ;;  %v2776_v39 = vadd.f32 %v2760_v31, %v2744_v54  ;;  %2794 = vst [vmem:[%s5641_s30 + $0x10] sm:$0xff] %v2778_v41  ;;  %4270 = vtanh.f32 %v2700_v36  ;;  %v2578_v52 = vadd.f32 1.0, %v4247_v20  ;;  %v2329_v35 = vpop.f32.mrb[29].mxu0  ;;  %v3428_v20 = vmul.f32 -1.442695, %v2459_v8 }
 0x718   : > { %v5946_v0 = vpop.eup %4250  ;;  %v2702_v61 = vadd.f32 %v2686_v18, %v2017_v3  ;;  %v2687_v16 = vmul.f32 %v4249_v57, %v2671_v25  ;;  %4272 = vpow2.f32 %v3425_v23  ;;  %v5956_v63 = vpop.f32.mrb[45].mxu1  ;;  %v5959_v36 = vadd.f32 %v2329_v35, %v5877_v10 }
 0x719   : > { %v4253_v49 = vpop.eup %4252  ;;  %2792 = vst [vmem:[%s5641_s30] sm:$0xff] %v2776_v39  ;;  %v2331_v13 = vpop.f32.mrb[30].mxu0  ;;  %v2025_v10 = vadd.f32 %v5795_v47, %v5806_v1  ;;  %v3427_v47 = vmul.f32 -1.442695, %v5931_v56  ;;  %v2732_v18 = vsub.f32 1.0, %v5917_v58  ;;  %v2764_v57 = vmul.f32 %v5917_v58, %v5665_v46 }
 0x71a   : > { %v4255_v59 = vpop.eup %4254  ;;  %v2579_v45 = vadd.f32 1.0, %v4253_v49  ;;  %4274 = vtanh.f32 %v2702_v61  ;;  %v2703_v9 = vadd.f32 %v2687_v16, %v2020_v29  ;;  %v5961_v42 = vpop.f32.mrb[46].mxu1  ;;  %v2463_v25 = vadd.f32 %v2331_v13, %v5889_v34 }
 0x71b   : > { %v4257_v7 = vpop.eup %4256  ;;  %v2747_v12 = vmul.f32 %v4255_v59, %v2731_v27  ;;  %4276 = vtanh.f32 %v2701_v43  ;;  %v2333_v62 = vpop.f32.mrb[31].mxu0  ;;  %v2734_v56 = vsub.f32 1.0, %v5946_v0  ;;  %v3429_v16 = vmul.f32 -1.442695, %v5937_v6 }
 0x71c   : > { %v5964_v26 = vpop.f32.mrb[47].mxu1  ;;  %v4259_v15 = vpop.eup %4258  ;;  %4278 = vrcp.f32 %v2579_v45  ;;  %v2580_v48 = vadd.f32 1.0, %v4257_v7  ;;  %v2464_v3 = vadd.f32 %v2333_v62, %v5898_v19  ;;  %v2733_v19 = vsub.f32 1.0, %v5925_v4 }
 0x71d   : > { %v4261_v31 = vpop.eup %4260  ;;  %v2779_v43 = vadd.f32 %v2763_v24, %v2747_v12  ;;  %v2745_v54 = vmul.f32 %v4259_v15, %v2729_v38  ;;  %4280 = vtanh.f32 %v2703_v9  ;;  %v2028_v38 = vadd.f32 %v5802_v50, %v5806_v1 }
 0x71e   : > { %v4263_v34 = vpop.eup %4262  ;;  %4282 = vrcp.f32 %v2578_v52  ;;  %v2581_v23 = vadd.f32 1.0, %v4261_v31  ;;  %v3430_v58 = vmul.f32 -1.442695, %v2461_v32  ;;  %v2673_v50 = vadd.f32 %v5855_v2, %v5933_v37 }
 0x71f   : > { %v4265_v14 = vpop.eup %4264  ;;  %2795 = vst [vmem:[%s5641_s30 + $0x18] sm:$0xff] %v2779_v43  ;;  %v2777_v21 = vadd.f32 %v2761_v33, %v2745_v54  ;;  %4284 = vpow2.f32 %v3426_v5  ;;  %v2688_v41 = vmul.f32 %v4263_v34, %v2672_v44  ;;  %v2765_v24 = vmul.f32 %v5925_v4, %v5668_v53 }
 0x720   : > { %v4267_v11 = vpop.eup %4266  ;;  %4286 = vrcp.f32 %v2581_v23  ;;  %v2766_v52 = vmul.f32 %v5946_v0, %v5676_v17  ;;  %v3432_v9 = vmul.f32 -1.442695, %v2463_v25  ;;  %v2735_v32 = vsub.f32 1.0, %v4265_v14 }
 0x721   : > { %v4269_v8 = vpop.eup %4268  ;;  %4288 = vrcp.f32 %v2580_v48  ;;  %2793 = vst [vmem:[%s5641_s30 + $0x8] sm:$0xff] %v2777_v21  ;;  %v2582_v29 = vadd.f32 1.0, %v4267_v11  ;;  %v2704_v39 = vadd.f32 %v2688_v41, %v2025_v10  ;;  %v2674_v37 = vadd.f32 %v5920_v28, %v5855_v2 }
 0x722   : > { %v4271_v27 = vpop.eup %4270  ;;  %v2583_v61 = vadd.f32 1.0, %v4269_v8  ;;  %4290 = vpow2.f32 %v3428_v20  ;;  %v3431_v17 = vmul.f32 -1.442695, %v5959_v36  ;;  %v2767_v5 = vmul.f32 %v4265_v14, %v5679_v60 }
 0x723   : > { %v4273_v40 = vpop.eup %4272  ;;  %v2748_v46 = vmul.f32 %v4271_v27, %v2732_v18  ;;  %4292 = vpow2.f32 %v3427_v47  ;;  %v3433_v31 = vmul.f32 -1.442695, %v2464_v3  ;;  %v2033_v36 = vadd.f32 %v5792_v55, %v5806_v1 }
 0x724   : > { %v4275_v49 = vpop.eup %4274  ;;  %4294 = vrcp.f32 %v2583_v61  ;;  %v2584_v35 = vadd.f32 1.0, %v4273_v40  ;;  %v2675_v48 = vadd.f32 %v5927_v51, %v5855_v2  ;;  %v2036_v3 = vadd.f32 %v5798_v22, %v5806_v1  ;;  %v6365_v22 = vld [vmem:[#allocation33_spill] sm:$0xff] }
 0x725   : > { %v4277_v59 = vpop.eup %4276  ;;  %4296 = vrcp.f32 %v2582_v29  ;;  %v2750_v6 = vmul.f32 %v4275_v49, %v2734_v56  ;;  %v2780_v45 = vadd.f32 %v2764_v57, %v2748_v46  ;;  %v6366_v49 = vld [vmem:[#allocation42_spill] sm:$0xff] }
 0x726   : > { %v4279_v13 = vpop.eup %4278  ;;  %v2749_v7 = vmul.f32 %v4277_v59, %v2733_v19  ;;  %4298 = vpow2.f32 %v3429_v16  ;;  %v2676_v19 = vadd.f32 %v5855_v2, %v5956_v63  ;;  %v6367_v59 = vld [vmem:[#allocation34_spill] sm:$0xff] }
 0x727   : > { %v4281_v53 = vpop.eup %4280  ;;  %v2782_v4 = vadd.f32 %v2766_v52, %v2750_v6  ;;  %2796 = vst [vmem:[%s5641_s30 + $0x20] sm:$0xff] %v2780_v45  ;;  %4300 = vpow2.f32 %v3430_v58  ;;  %v2689_v0 = vmul.f32 %v4279_v13, %v2673_v50  ;;  %v2677_v58 = vadd.f32 %v5855_v2, %v5964_v26  ;;  %v6368_v13 = vld [vmem:[#allocation44_spill] sm:$0xff] }
 0x728   : > { %v4283_v12 = vpop.eup %4282  ;;  %4302 = vrcp.f32 %v2584_v35  ;;  %v2751_v25 = vmul.f32 %v4281_v53, %v2735_v32  ;;  %v2781_v62 = vadd.f32 %v2765_v24, %v2749_v7  ;;  %v2041_v24 = vadd.f32 %v6366_v49, %v5806_v1  ;;  %v6376_v49 = vld [vmem:[#allocation40_spill] sm:$0xff] }
 0x729   : > { %v4285_v15 = vpop.eup %4284  ;;  %2798 = vst [vmem:[%s5641_s30 + $0x30] sm:$0xff] %v2782_v4  ;;  %4304 = vpow2.f32 %v3432_v9  ;;  %v2705_v33 = vadd.f32 %v2689_v0, %v2028_v38  ;;  %v2736_v38 = vsub.f32 1.0, %v4283_v12  ;;  %v2768_v56 = vmul.f32 %v4283_v12, %v6365_v22  ;;  %v6369_v0 = vld [vmem:[#allocation35_spill] sm:$0xff] }
 0x72a   : > { %v4287_v28 = vpop.eup %4286  ;;  %v2783_v10 = vadd.f32 %v2767_v5, %v2751_v25  ;;  %2797 = vst [vmem:[%s5641_s30 + $0x28] sm:$0xff] %v2781_v62  ;;  %v2585_v44 = vadd.f32 1.0, %v4285_v15  ;;  %4306 = vtanh.f32 %v2704_v39  ;;  %v2044_v32 = vadd.f32 %v6368_v13, %v5806_v1 }
 0x72b   : > { %v4289_v43 = vpop.eup %4288  ;;  %4308 = vpow2.f32 %v3431_v17  ;;  %v2690_v60 = vmul.f32 %v4287_v28, %v2674_v37  ;;  %v2678_v4 = vadd.f32 %v5950_v30, %v5855_v2  ;;  %v6371_v30 = vld [vmem:[#allocation41_spill] sm:$0xff] }
 0x72c   : > { %v4291_v54 = vpop.eup %4290  ;;  %2799 = vst [vmem:[%s5641_s30 + $0x38] sm:$0xff] %v2783_v10  ;;  %4310 = vrcp.f32 %v2585_v44  ;;  %v2737_v40 = vsub.f32 1.0, %v4289_v43  ;;  %v2769_v6 = vmul.f32 %v4289_v43, %v6367_v59 }
 0x72d   : > { %v4293_v34 = vpop.eup %4292  ;;  %v2587_v23 = vadd.f32 1.0, %v4291_v54  ;;  %v2706_v20 = vadd.f32 %v2690_v60, %v2033_v36  ;;  %4312 = vtanh.f32 %v2705_v33  ;;  %v2049_v60 = vadd.f32 %v6371_v30, %v5806_v1 }
 0x72e   : > { %v4295_v14 = vpop.eup %4294  ;;  %4314 = vpow2.f32 %v3433_v31  ;;  %v2586_v8 = vadd.f32 1.0, %v4293_v34  ;;  %v6370_v31 = vld [vmem:[#allocation36_spill] sm:$0xff]  ;;  %v2679_v54 = vadd.f32 %v5961_v42, %v5855_v2 }
 0x72f   : > { %v4297_v21 = vpop.eup %4296  ;;  %4316 = vrcp.f32 %v2587_v23  ;;  %v2691_v55 = vmul.f32 %v4295_v14, %v2675_v48  ;;  %v6372_v14 = vld [vmem:[#allocation43_spill] sm:$0xff] }
 0x730   : > { %v4299_v47 = vpop.eup %4298  ;;  %4318 = vtanh.f32 %v2706_v20  ;;  %v2738_v7 = vsub.f32 1.0, %v4297_v21  ;;  %v2770_v12 = vmul.f32 %v4297_v21, %v6369_v0  ;;  %v2052_v21 = vadd.f32 %v6372_v14, %v5806_v1  ;;  %v6374_v1 = vld [vmem:[#allocation38_spill] sm:$0xff] }
 0x731   : > { %v4301_v41 = vpop.eup %4300  ;;  %v2707_v11 = vadd.f32 %v2691_v55, %v2036_v3  ;;  %v2588_v46 = vadd.f32 1.0, %v4299_v47 }
 0x732   : > { %v4303_v51 = vpop.eup %4302  ;;  %v2589_v18 = vadd.f32 1.0, %v4301_v41 }
 0x733   : > { %v4305_v57 = vpop.eup %4304  ;;  %4320 = vtanh.f32 %v2707_v11  ;;  %v2739_v62 = vsub.f32 1.0, %v4303_v51  ;;  %v2771_v43 = vmul.f32 %v4303_v51, %v6370_v31 }
 0x734   : > { %v4307_v29 = vpop.eup %4306  ;;  %4322 = vrcp.f32 %v2589_v18  ;;  %v2591_v39 = vadd.f32 1.0, %v4305_v57  ;;  %v6373_v18 = vld [vmem:[#allocation37_spill] sm:$0xff] }
 0x735   : > { %v4309_v27 = vpop.eup %4308  ;;  %v2752_v61 = vmul.f32 %v4307_v29, %v2736_v38 }
 0x736   : > { %v4311_v16 = vpop.eup %4310  ;;  %4324 = vrcp.f32 %v2591_v39  ;;  %v2590_v5 = vadd.f32 1.0, %v4309_v27 }
 0x737   : > { %v4313_v50 = vpop.eup %4312  ;;  %4326 = vrcp.f32 %v2586_v8  ;;  %v2784_v63 = vadd.f32 %v2768_v56, %v2752_v61  ;;  %v2692_v52 = vmul.f32 %v4311_v16, %v2676_v19  ;;  %v6375_v16 = vld [vmem:[#allocation39_spill] sm:$0xff] }
 0x738   : > { %v4315_v35 = vpop.eup %4314  ;;  %v2753_v45 = vmul.f32 %v4313_v50, %v2737_v40  ;;  %4328 = vrcp.f32 %v2588_v46 }
 0x739   : > { %v4317_v9 = vpop.eup %4316  ;;  %2800 = vst [vmem:[%s5641_s30 + $0x40] sm:$0xff] %v2784_v63  ;;  %v2708_v37 = vadd.f32 %v2692_v52, %v2041_v24  ;;  %v2592_v10 = vadd.f32 1.0, %v4315_v35 }
 0x73a   : > { %v4319_v26 = vpop.eup %4318  ;;  %v2785_v53 = vadd.f32 %v2769_v6, %v2753_v45  ;;  %v2693_v17 = vmul.f32 %v4317_v9, %v2677_v58 }
 0x73b   : > { %v2754_v25 = vmul.f32 %v4319_v26, %v2738_v7  ;;  %4330 = vtanh.f32 %v2708_v37 }
 0x73c   : > { %2801 = vst [vmem:[%s5641_s30 + $0x48] sm:$0xff] %v2785_v53  ;;  %v2709_v15 = vadd.f32 %v2693_v17, %v2044_v32 }
 0x73d   : > { %v4321_v33 = vpop.eup %4320  ;;  %v2786_v28 = vadd.f32 %v2770_v12, %v2754_v25 }
 0x73e   : > { %v4323_v44 = vpop.eup %4322  ;;  %v2755_v36 = vmul.f32 %v4321_v33, %v2739_v62  ;;  %4332 = vtanh.f32 %v2709_v15 }
 0x73f   : > { %4334 = vrcp.f32 %v2590_v5  ;;  %2802 = vst [vmem:[%s5641_s30 + $0x50] sm:$0xff] %v2786_v28  ;;  %v2694_v48 = vmul.f32 %v4323_v44, %v2678_v4 }
 0x740   : > { %v4325_v34 = vpop.eup %4324  ;;  %v2787_v23 = vadd.f32 %v2771_v43, %v2755_v36  ;;  %4336 = vrcp.f32 %v2592_v10 }
 0x741   : > { %v4327_v20 = vpop.eup %4326  ;;  %v2710_v3 = vadd.f32 %v2694_v48, %v2049_v60  ;;  %v2695_v55 = vmul.f32 %v4325_v34, %v2679_v54 }
 0x742   : > { %2803 = vst [vmem:[%s5641_s30 + $0x58] sm:$0xff] %v2787_v23  ;;  %v4329_v41 = vpop.eup %4328  ;;  %v2740_v11 = vsub.f32 1.0, %v4327_v20  ;;  %v2772_v2 = vmul.f32 %v4327_v20, %v6373_v18 }
 0x743   : > { %4338 = vtanh.f32 %v2710_v3  ;;  %v2711_v47 = vadd.f32 %v2695_v55, %v2052_v21  ;;  %v2741_v57 = vsub.f32 1.0, %v4329_v41  ;;  %v2773_v29 = vmul.f32 %v4329_v41, %v6374_v1 }
 0x745   : > { %v4331_v51 = vpop.eup %4330  ;;  %4340 = vtanh.f32 %v2711_v47 }
 0x746   : > { %v2756_v42 = vmul.f32 %v4331_v51, %v2740_v11 }
 0x748   : > { %v4333_v38 = vpop.eup %4332  ;;  %v2788_v8 = vadd.f32 %v2772_v2, %v2756_v42 }
 0x749   : > { %v4335_v19 = vpop.eup %4334  ;;  %v2757_v39 = vmul.f32 %v4333_v38, %v2741_v57 }
 0x74a   : > { %2804 = vst [vmem:[%s5641_s30 + $0x60] sm:$0xff] %v2788_v8  ;;  %v4337_v27 = vpop.eup %4336  ;;  %v2742_v56 = vsub.f32 1.0, %v4335_v19  ;;  %v2774_v40 = vmul.f32 %v4335_v19, %v6375_v16 }
 0x74b   : > { %v2789_v22 = vadd.f32 %v2773_v29, %v2757_v39  ;;  %v2743_v46 = vsub.f32 1.0, %v4337_v27  ;;  %v2775_v24 = vmul.f32 %v4337_v27, %v6376_v49 }
 0x74d   : > { %v4339_v61 = vpop.eup %4338  ;;  %2805 = vst [vmem:[%s5641_s30 + $0x68] sm:$0xff] %v2789_v22 }
 0x74e   : > { %v2758_v58 = vmul.f32 %v4339_v61, %v2742_v56 }
 0x74f   : > { %v4341_v50 = vpop.eup %4340 }
 0x750   : > { %v2790_v63 = vadd.f32 %v2774_v40, %v2758_v58  ;;  %v2759_v52 = vmul.f32 %v4341_v50, %v2743_v46 }
 0x752   : > { %2806 = vst [vmem:[%s5641_s30 + $0x70] sm:$0xff] %v2790_v63  ;;  %v2791_v35 = vadd.f32 %v2775_v24, %v2759_v52 }
 0x754   : > { %2807 = vst [vmem:[%s5641_s30 + $0x78] sm:$0xff] %v2791_v35 }
 0x755 PF: > { %s6377_s9 = sld [smem:[#allocation30_spill]] }
 0x75b   : > { %s2809_s6 = sld [smem:[#allocation10 + %s6377_s9]] }
 0x761   : > { %p2810_p5 = scmp.eq.s32.totalorder %s2809_s6, 1 }
 0x763   : > { %p2811_p11 = pnand %p2810_p5, %p581_p9 }
 0x764   : > { %s2815_s26 = scalar_lea.vmem (!%p2811_p11), [#allocation2], %s3295_s15  ;;  %vm4772_vm0 = vmmov (!%p2811_p11), 0   ;;  %s6379_s10 = sld [smem:[#allocation49_spill]] (!%p2811_p11) }
 0x765   : > { %2814 = sbr.rel (%p2811_p11) target bundleno = 2457 (0x999), region = 130  ;;  %v2816_v59 = vld [vmem:[%s2815_s26] sm:$0xff] (!%p2811_p11)  ;;  %v2818_v6 = vld [vmem:[%s2815_s26 + $0x10] sm:$0xff] (!%p2811_p11)  ;;  %v2817_v45 = vld [vmem:[%s2815_s26 + $0x8] sm:$0xff] (!%p2811_p11)  ;;  %s6380_s30 = sld [smem:[#allocation50_spill]] (!%p2811_p11) }
 0x766   : > { %2834 = vadd.xlane.f32.xlu0 (!%p2811_p11), %v2816_v59  ;;  %2838 = vadd.xlane.f32.xlu1 (!%p2811_p11), %v2818_v6  ;;  %v2819_v9 = vld [vmem:[%s2815_s26 + $0x18] sm:$0xff] (!%p2811_p11)  ;;  %v2820_v13 = vld [vmem:[%s2815_s26 + $0x20] sm:$0xff] (!%p2811_p11)  ;;  %v2821_v32 = vld [vmem:[%s2815_s26 + $0x28] sm:$0xff] (!%p2811_p11) }
 0x767   : > { %v2822_v7 = vld [vmem:[%s2815_s26 + $0x30] sm:$0xff] (!%p2811_p11)  ;;  %v2823_v37 = vld [vmem:[%s2815_s26 + $0x38] sm:$0xff] (!%p2811_p11)  ;;  %v2824_v26 = vld [vmem:[%s2815_s26 + $0x40] sm:$0xff] (!%p2811_p11) }
 0x768   : > { %v2825_v53 = vld [vmem:[%s2815_s26 + $0x48] sm:$0xff] (!%p2811_p11)  ;;  %v2826_v4 = vld [vmem:[%s2815_s26 + $0x50] sm:$0xff] (!%p2811_p11)  ;;  %v6041_v17 = vld [vmem:[%s2815_s26 + $0x58] sm:$0xff] (!%p2811_p11) }
 0x769   : > { %v6044_v0 = vld [vmem:[%s2815_s26 + $0x60] sm:$0xff] (!%p2811_p11)  ;;  %v6046_v12 = vld [vmem:[%s2815_s26 + $0x68] sm:$0xff] (!%p2811_p11)  ;;  %v6050_v5 = vld [vmem:[%s2815_s26 + $0x70] sm:$0xff] (!%p2811_p11) }
 0x76a   : > { %2836 = vadd.xlane.f32.xlu0 (!%p2811_p11), %v2817_v45  ;;  %2840 = vadd.xlane.f32.xlu1 (!%p2811_p11), %v2819_v9  ;;  %v6052_v25 = vld [vmem:[%s2815_s26 + $0x78] sm:$0xff] (!%p2811_p11) }
 0x76e   : > { %2842 = vadd.xlane.f32.xlu0 %v2820_v13  ;;  %2844 = vadd.xlane.f32.xlu1 %v2821_v32 }
 0x772   : > { %2846 = vadd.xlane.f32.xlu0 %v2822_v7  ;;  %2848 = vadd.xlane.f32.xlu1 %v2823_v37 }
 0x776   : > { %2850 = vadd.xlane.f32.xlu0 %v2824_v26  ;;  %2852 = vadd.xlane.f32.xlu1 %v2825_v53 }
 0x77a   : > { %2854 = vadd.xlane.f32.xlu0 %v2826_v4  ;;  %2856 = vadd.xlane.f32.xlu1 %v6041_v17 }
 0x77e   : > { %2858 = vadd.xlane.f32.xlu0 %v6044_v0  ;;  %2860 = vadd.xlane.f32.xlu1 %v6046_v12 }
 0x782   : > { %2862 = vadd.xlane.f32.xlu0 %v6050_v5  ;;  %2864 = vadd.xlane.f32.xlu1 %v6052_v25 }
 0x7f3   : > { %v2835_v62 = vpop.xlane.xlu0 %2834  ;;  %v2839_v15 = vpop.xlane.xlu1 %2838 }
 0x7f4   : > { %v2867_v33 = vmul.f32 0.0078125, %v2835_v62  ;;  %v2869_v28 = vmul.f32 0.0078125, %v2839_v15 }
 0x7f6   : > { %v6056_v10 = vsub.f32 %v2816_v59, %v2867_v33  ;;  %v6058_v44 = vsub.f32 %v2818_v6, %v2869_v28  ;;  %v4771_v33 = vmov 0.0  }
 0x7f7   : > { %v2837_v31 = vpop.xlane.xlu0 %2836  ;;  %v2841_v43 = vpop.xlane.xlu1 %2840  ;;  %3711 = vmatprep.subr.bf16.mxu0 %v4771_v33  ;;  %3727 = vmatprep.mubr.msk.bf16.mxu0 %vm4772_vm0, %v4771_v33 }
 0x7f8   : > { %v2868_v36 = vmul.f32 0.0078125, %v2837_v31  ;;  %v2899_v30 = vmul.f32 %v6056_v10, %v6056_v10  ;;  %v2870_v60 = vmul.f32 0.0078125, %v2841_v43  ;;  %v2901_v34 = vmul.f32 %v6058_v44, %v6058_v44 }
 0x7fa   : > { %v6062_v48 = vsub.f32 %v2817_v45, %v2868_v36  ;;  %2915 = vadd.xlane.f32.xlu0 %v2899_v30  ;;  %v6064_v54 = vsub.f32 %v2819_v9, %v2870_v60 }
 0x7fb   : > { %v2843_v23 = vpop.xlane.xlu0 %2842  ;;  %v2845_v20 = vpop.xlane.xlu1 %2844 }
 0x7fc   : > { %v2871_v14 = vmul.f32 0.0078125, %v2843_v23  ;;  %v2900_v21 = vmul.f32 %v6062_v48, %v6062_v48  ;;  %v2872_v3 = vmul.f32 0.0078125, %v2845_v20  ;;  %v2902_v41 = vmul.f32 %v6064_v54, %v6064_v54 }
 0x7fe   : > { %v6070_v55 = vsub.f32 %v2820_v13, %v2871_v14  ;;  %2919 = vadd.xlane.f32.xlu0 %v2901_v34  ;;  %2917 = vadd.xlane.f32.xlu1 %v2900_v21  ;;  %v6072_v47 = vsub.f32 %v2821_v32, %v2872_v3 }
 0x7ff   : > { %v2847_v11 = vpop.xlane.xlu0 %2846  ;;  %v2849_v51 = vpop.xlane.xlu1 %2848 }
 0x800   : > { %v2873_v18 = vmul.f32 0.0078125, %v2847_v11  ;;  %v2903_v2 = vmul.f32 %v6070_v55, %v6070_v55  ;;  %v2874_v42 = vmul.f32 0.0078125, %v2849_v51  ;;  %v2904_v8 = vmul.f32 %v6072_v47, %v6072_v47 }
 0x802   : > { %v6078_v57 = vsub.f32 %v2822_v7, %v2873_v18  ;;  %2921 = vadd.xlane.f32.xlu1 %v2902_v41  ;;  %2923 = vadd.xlane.f32.xlu0 %v2903_v2  ;;  %v6080_v38 = vsub.f32 %v2823_v37, %v2874_v42 }
 0x803   : > { %v2851_v19 = vpop.xlane.xlu0 %2850  ;;  %v2853_v1 = vpop.xlane.xlu1 %2852 }
 0x804   : > { %v2875_v29 = vmul.f32 0.0078125, %v2851_v19  ;;  %v2905_v39 = vmul.f32 %v6078_v57, %v6078_v57  ;;  %v2876_v27 = vmul.f32 0.0078125, %v2853_v1  ;;  %v2906_v61 = vmul.f32 %v6080_v38, %v6080_v38 }
 0x806   : > { %v6086_v22 = vsub.f32 %v2824_v26, %v2875_v29  ;;  %2925 = vadd.xlane.f32.xlu1 %v2904_v8  ;;  %2927 = vadd.xlane.f32.xlu0 %v2905_v39  ;;  %v6088_v56 = vsub.f32 %v2825_v53, %v2876_v27 }
 0x807   : > { %v2855_v16 = vpop.xlane.xlu0 %2854  ;;  %v2857_v40 = vpop.xlane.xlu1 %2856 }
 0x808   : > { %v2877_v46 = vmul.f32 0.0078125, %v2855_v16  ;;  %v2907_v58 = vmul.f32 %v6086_v22, %v6086_v22  ;;  %v2878_v50 = vmul.f32 0.0078125, %v2857_v40  ;;  %v2908_v63 = vmul.f32 %v6088_v56, %v6088_v56  ;;  %v6131_v16 = vld [vmem:[%s6379_s10] ss:$0 sm:$0xff] }
 0x80a   : > { %v6094_v49 = vsub.f32 %v2826_v4, %v2877_v46  ;;  %2929 = vadd.xlane.f32.xlu1 %v2906_v61  ;;  %2931 = vadd.xlane.f32.xlu0 %v2907_v58  ;;  %v6097_v24 = vsub.f32 %v6041_v17, %v2878_v50 }
 0x80b   : > { %v2859_v52 = vpop.xlane.xlu0 %2858  ;;  %v2861_v35 = vpop.xlane.xlu1 %2860 }
 0x80c   : > { %v2879_v59 = vmul.f32 0.0078125, %v2859_v52  ;;  %v2909_v6 = vmul.f32 %v6094_v49, %v6094_v49  ;;  %v2880_v45 = vmul.f32 0.0078125, %v2861_v35  ;;  %v2910_v32 = vmul.f32 %v6097_v24, %v6097_v24 }
 0x80e   : > { %v6104_v9 = vsub.f32 %v6044_v0, %v2879_v59  ;;  %2933 = vadd.xlane.f32.xlu1 %v2908_v63  ;;  %2935 = vadd.xlane.f32.xlu0 %v2909_v6  ;;  %v6107_v13 = vsub.f32 %v6046_v12, %v2880_v45  ;;  %v6138_v45 = vld [vmem:[%s6380_s30] ss:$0 sm:$0xff] }
 0x80f   : > { %v2863_v7 = vpop.xlane.xlu0 %2862  ;;  %v2865_v37 = vpop.xlane.xlu1 %2864 }
 0x810   : > { %v2881_v26 = vmul.f32 0.0078125, %v2863_v7  ;;  %v2911_v53 = vmul.f32 %v6104_v9, %v6104_v9  ;;  %v2882_v4 = vmul.f32 0.0078125, %v2865_v37  ;;  %v2912_v12 = vmul.f32 %v6107_v13, %v6107_v13 }
 0x812   : > { %v6114_v17 = vsub.f32 %v6050_v5, %v2881_v26  ;;  %2937 = vadd.xlane.f32.xlu1 %v2910_v32  ;;  %2939 = vadd.xlane.f32.xlu0 %v2911_v53  ;;  %v6117_v0 = vsub.f32 %v6052_v25, %v2882_v4 }
 0x814   : > { %v2913_v62 = vmul.f32 %v6114_v17, %v6114_v17  ;;  %v2914_v15 = vmul.f32 %v6117_v0, %v6117_v0 }
 0x816   : > { %2941 = vadd.xlane.f32.xlu1 %v2912_v12  ;;  %2943 = vadd.xlane.f32.xlu0 %v2913_v62 }
 0x81a   : > { %2945 = vadd.xlane.f32.xlu1 %v2914_v15 }
 0x887   : > { %v2916_v5 = vpop.xlane.xlu0 %2915 }
 0x888   : > { %v2947_v25 = vmul.f32 0.0078125, %v2916_v5 }
 0x88a   : > { %v2963_v28 = vadd.f32 1e-05, %v2947_v25 }
 0x88b   : > { %v2918_v31 = vpop.xlane.xlu1 %2917  ;;  %v2920_v43 = vpop.xlane.xlu0 %2919 }
 0x88c   : > { %4342 = vrsqrt.f32 %v2963_v28  ;;  %v2948_v36 = vmul.f32 0.0078125, %v2918_v31  ;;  %v2949_v30 = vmul.f32 0.0078125, %v2920_v43 }
 0x88e   : > { %v2964_v60 = vadd.f32 1e-05, %v2948_v36  ;;  %v2965_v34 = vadd.f32 1e-05, %v2949_v30 }
 0x88f   : > { %v2922_v23 = vpop.xlane.xlu1 %2921  ;;  %v2924_v20 = vpop.xlane.xlu0 %2923 }
 0x890   : > { %4344 = vrsqrt.f32 %v2964_v60  ;;  %v2950_v14 = vmul.f32 0.0078125, %v2922_v23  ;;  %v2951_v21 = vmul.f32 0.0078125, %v2924_v20 }
 0x891   : > { %4346 = vrsqrt.f32 %v2965_v34 }
 0x892   : > { %v2966_v3 = vadd.f32 1e-05, %v2950_v14  ;;  %v2967_v41 = vadd.f32 1e-05, %v2951_v21 }
 0x893   : > { %v2926_v11 = vpop.xlane.xlu1 %2925  ;;  %v2928_v51 = vpop.xlane.xlu0 %2927 }
 0x894   : > { %4348 = vrsqrt.f32 %v2966_v3  ;;  %v2952_v18 = vmul.f32 0.0078125, %v2926_v11  ;;  %v2953_v2 = vmul.f32 0.0078125, %v2928_v51 }
 0x895   : > { %4350 = vrsqrt.f32 %v2967_v41 }
 0x896   : > { %v4343_v42 = vpop.eup %4342  ;;  %v2968_v8 = vadd.f32 1e-05, %v2952_v18  ;;  %v2969_v19 = vadd.f32 1e-05, %v2953_v2 }
 0x897   : > { %v2930_v1 = vpop.xlane.xlu1 %2929  ;;  %v2932_v29 = vpop.xlane.xlu0 %2931  ;;  %v2995_v39 = vmul.f32 %v4343_v42, %v6056_v10 }
 0x898   : > { %4352 = vrsqrt.f32 %v2968_v8  ;;  %v2954_v27 = vmul.f32 0.0078125, %v2930_v1  ;;  %v2955_v61 = vmul.f32 0.0078125, %v2932_v29 }
 0x899   : > { %4354 = vrsqrt.f32 %v2969_v19  ;;  %v3017_v59 = vmul.f32 %v6131_v16, %v2995_v39 }
 0x89a   : > { %v4345_v40 = vpop.eup %4344  ;;  %v2970_v46 = vadd.f32 1e-05, %v2954_v27  ;;  %v2971_v58 = vadd.f32 1e-05, %v2955_v61 }
 0x89b   : > { %v4347_v50 = vpop.eup %4346  ;;  %v2934_v63 = vpop.xlane.xlu1 %2933  ;;  %v2996_v35 = vmul.f32 %v4345_v40, %v6062_v48  ;;  %v3039_v62 = vadd.f32 %v6138_v45, %v3017_v59 }
 0x89c   : > { %v2936_v52 = vpop.xlane.xlu0 %2935  ;;  %4356 = vrsqrt.f32 %v2970_v46  ;;  %v2956_v10 = vmul.f32 0.0078125, %v2934_v63  ;;  %v2997_v32 = vmul.f32 %v4347_v50, %v6058_v44 }
 0x89d   : > { %v2957_v6 = vmul.f32 0.0078125, %v2936_v52  ;;  %4358 = vrsqrt.f32 %v2971_v58  ;;  %v3018_v7 = vmul.f32 %v6131_v16, %v2996_v35 }
 0x89e   : > { %v4349_v37 = vpop.eup %4348  ;;  %v2972_v26 = vadd.f32 1e-05, %v2956_v10  ;;  %v3019_v25 = vmul.f32 %v6131_v16, %v2997_v32 }
 0x89f   : > { %v2973_v53 = vadd.f32 1e-05, %v2957_v6  ;;  %v4351_v4 = vpop.eup %4350  ;;  %v2938_v48 = vpop.xlane.xlu1 %2937  ;;  %v3040_v15 = vadd.f32 %v6138_v45, %v3018_v7  ;;  %v2998_v5 = vmul.f32 %v4349_v37, %v6064_v54 }
 0x8a0   : > { %v2940_v12 = vpop.xlane.xlu0 %2939  ;;  %4360 = vrsqrt.f32 %v2972_v26  ;;  %v2958_v28 = vmul.f32 0.0078125, %v2938_v48  ;;  %v2999_v36 = vmul.f32 %v4351_v4, %v6070_v55  ;;  %v3041_v54 = vadd.f32 %v6138_v45, %v3019_v25 }
 0x8a1   : > { %v2959_v44 = vmul.f32 0.0078125, %v2940_v12  ;;  %4362 = vrsqrt.f32 %v2973_v53  ;;  %v3057_v31 = vpack.c.bf16 %v3040_v15, %v3039_v62  ;;  %v3020_v43 = vmul.f32 %v6131_v16, %v2998_v5 }
 0x8a2   : > { %v4353_v30 = vpop.eup %4352  ;;  %v2974_v60 = vadd.f32 1e-05, %v2958_v28  ;;  %v3021_v41 = vmul.f32 %v6131_v16, %v2999_v36 }
 0x8a3   : > { %v2975_v34 = vadd.f32 1e-05, %v2959_v44  ;;  %v4355_v23 = vpop.eup %4354  ;;  %v2942_v20 = vpop.xlane.xlu1 %2941  ;;  %3712 = vmatpush3.bf16.msra.mxu0 %v3057_v31  ;;  %v3042_v21 = vadd.f32 %v6138_v45, %v3020_v43  ;;  %v3000_v3 = vmul.f32 %v4353_v30, %v6072_v47 }
 0x8a4   : > { %v2944_v14 = vpop.xlane.xlu0 %2943  ;;  %4364 = vrsqrt.f32 %v2974_v60  ;;  %v2960_v11 = vmul.f32 0.0078125, %v2942_v20  ;;  %3713 = vmatprep.subr.bf16.mxu0 %v4771_v33  ;;  %v3001_v55 = vmul.f32 %v4355_v23, %v6078_v57  ;;  %v3043_v47 = vadd.f32 %v6138_v45, %v3021_v41 }
 0x8a5   : > { %v2961_v51 = vmul.f32 0.0078125, %v2944_v14  ;;  %4366 = vrsqrt.f32 %v2975_v34  ;;  %v3058_v18 = vpack.c.bf16 %v3042_v21, %v3041_v54  ;;  %v3022_v2 = vmul.f32 %v6131_v16, %v3000_v3  ;;  %v3056_v54 = vld [vmem:[%s5227_s25] sm:$0xf]  ;;  %v3055_v21 = vld [vmem:[#allocation21] sm:$0xff] }
 0x8a6   : > { %v4357_v42 = vpop.eup %4356  ;;  %v2976_v8 = vadd.f32 1e-05, %v2960_v11  ;;  %v3023_v61 = vmul.f32 %v6131_v16, %v3001_v55 }
 0x8a7   : > { %v2977_v19 = vadd.f32 1e-05, %v2961_v51  ;;  %v4359_v1 = vpop.eup %4358  ;;  %v2946_v29 = vpop.xlane.xlu1 %2945  ;;  %3714 = vmatpush3.bf16.msra.mxu0 %v3058_v18  ;;  %v3044_v39 = vadd.f32 %v6138_v45, %v3022_v2  ;;  %v3002_v27 = vmul.f32 %v4357_v42, %v6080_v38 }
 0x8a8   : > { %4368 = vrsqrt.f32 %v2976_v8  ;;  %v2962_v57 = vmul.f32 0.0078125, %v2946_v29  ;;  %3715 = vmatprep.subr.bf16.mxu0 %v4771_v33  ;;  %v3003_v40 = vmul.f32 %v4359_v1, %v6086_v22  ;;  %v3045_v35 = vadd.f32 %v6138_v45, %v3023_v61 }
 0x8a9   : > { %4370 = vrsqrt.f32 %v2977_v19  ;;  %v3059_v46 = vpack.c.bf16 %v3044_v39, %v3043_v47  ;;  %v3024_v58 = vmul.f32 %v6131_v16, %v3002_v27 }
 0x8aa   : > { %v4361_v50 = vpop.eup %4360  ;;  %v2978_v63 = vadd.f32 1e-05, %v2962_v57  ;;  %v3025_v10 = vmul.f32 %v6131_v16, %v3003_v40 }
 0x8ab   : > { %v4363_v52 = vpop.eup %4362  ;;  %3716 = vmatpush3.bf16.msra.mxu0 %v3059_v46  ;;  %v3046_v38 = vadd.f32 %v6138_v45, %v3024_v58  ;;  %v3004_v59 = vmul.f32 %v4361_v50, %v6088_v56 }
 0x8ac   : > { %4372 = vrsqrt.f32 %v2978_v63  ;;  %3717 = vmatprep.subr.bf16.mxu0 %v4771_v33  ;;  %v3005_v22 = vmul.f32 %v4363_v52, %v6094_v49  ;;  %v3047_v26 = vadd.f32 %v6138_v45, %v3025_v10 }
 0x8ad   : > { %v3060_v6 = vpack.c.bf16 %v3046_v38, %v3045_v35  ;;  %v3026_v32 = vmul.f32 %v6131_v16, %v3004_v59 }
 0x8ae   : > { %v4365_v7 = vpop.eup %4364  ;;  %v3027_v56 = vmul.f32 %v6131_v16, %v3005_v22 }
 0x8af   : > { %v4367_v37 = vpop.eup %4366  ;;  %3718 = vmatpush3.bf16.msra.mxu0 %v3060_v6  ;;  %v3048_v53 = vadd.f32 %v6138_v45, %v3026_v32  ;;  %v3006_v4 = vmul.f32 %v4365_v7, %v6097_v24 }
 0x8b0   : > { %3719 = vmatprep.subr.bf16.mxu0 %v4771_v33  ;;  %v3007_v48 = vmul.f32 %v4367_v37, %v6104_v9  ;;  %v3049_v5 = vadd.f32 %v6138_v45, %v3027_v56 }
 0x8b1   : > { %v3061_v12 = vpack.c.bf16 %v3048_v53, %v3047_v26  ;;  %v3028_v49 = vmul.f32 %v6131_v16, %v3006_v4 }
 0x8b2   : > { %v4369_v62 = vpop.eup %4368  ;;  %v3029_v24 = vmul.f32 %v6131_v16, %v3007_v48 }
 0x8b3   : > { %v4371_v15 = vpop.eup %4370  ;;  %3720 = vmatpush3.bf16.msra.mxu0 %v3061_v12  ;;  %v3050_v25 = vadd.f32 %v6138_v45, %v3028_v49  ;;  %v3008_v28 = vmul.f32 %v4369_v62, %v6107_v13 }
 0x8b4   : > { %3721 = vmatprep.subr.bf16.mxu0 %v4771_v33  ;;  %v3009_v44 = vmul.f32 %v4371_v15, %v6114_v17  ;;  %v3051_v36 = vadd.f32 %v6138_v45, %v3029_v24 }
 0x8b5   : > { %v3062_v31 = vpack.c.bf16 %v3050_v25, %v3049_v5  ;;  %v3030_v9 = vmul.f32 %v6131_v16, %v3008_v28 }
 0x8b6   : > { %v4373_v43 = vpop.eup %4372  ;;  %v3031_v13 = vmul.f32 %v6131_v16, %v3009_v44 }
 0x8b7   : > { %3722 = vmatpush3.bf16.msra.mxu0 %v3062_v31  ;;  %v3052_v30 = vadd.f32 %v6138_v45, %v3030_v9  ;;  %v3010_v60 = vmul.f32 %v4373_v43, %v6117_v0 }
 0x8b8   : > { %3723 = vmatprep.subr.bf16.mxu0 %v4771_v33  ;;  %v3053_v17 = vadd.f32 %v6138_v45, %v3031_v13 }
 0x8b9   : > { %v3063_v34 = vpack.c.bf16 %v3052_v30, %v3051_v36  ;;  %v3032_v23 = vmul.f32 %v6131_v16, %v3010_v60 }
 0x8bb   : > { %3724 = vmatpush3.bf16.msra.mxu0 %v3063_v34  ;;  %v3054_v20 = vadd.f32 %v6138_v45, %v3032_v23 }
 0x8bc   : > { %3725 = vmatprep.subr.bf16.mxu0 %v4771_v33 }
 0x8bd   : > { %v3064_v14 = vpack.c.bf16 %v3054_v20, %v3053_v17 }
 0x8bf   : > { %3726 = vmatpush3.bf16.msra.mxu0 %v3064_v14 }
 0x8c2   : > { %3728 = vmatmul.mubr.bf16.vlgmr.msra.gmra.mrb[0].mxu0 %v3056_v54 }
 0x995   : > { %v3099_v0 = vpop.f32.mrb[0].mxu0 }
 0x996   : > { %v3105_v3 = vadd.f32 %v3099_v0, %v3055_v21  ;;  %v3729_v41 = vpop.f32.mrb[1].mxu0 }
 0x997   : > { %v3102_v11 = vpop.f32.mrb[2].mxu0 }
 0x998   : > { %3106 = vst [vmem:[#allocation21] sm:$0xff] %v3105_v3  ;;  %v3730_v51 = vpop.f32.mrb[3].mxu0 }
 0x999 PF: > { %p3912_p4 = scmp.eq.s32.totalorder %s4932_s13, 39  ;;  %s4773_s12 = smov [#allocation21]  }
 0x99a   : > { %s3114_s23 = sshll.u32 %s4773_s12, 4  ;;  %s3115_s23 = int_to_ptr.vmem [resolvable:$true] %s3114_s23 }
 0x99b   : > { %s4592_s8 = scalar_lea.vmem %s3115_s23, 128  ;;  %p4599_p7 = scmp.lt.s32.totalorder %s3115_s23, %s3115_s23 }
 0x99c   : > { %p4593_p8 = scmp.ne.s32.totalorder %s3115_s23, %s4592_s8  ;;  %p4600_p1 = scmp.lt.s32.totalorder %s4592_s8, %s4592_s8 }
 0x99e   : > { %p4594_p13 = pnand %p4593_p8, %p3912_p4  ;;  %p4601_p10 = por %p4600_p1, %p4599_p7 }
 0x9a0   : > { %p4595_p9 = pneg %p4594_p13 }
 0x9a2   : > { %p4602_p3 = pnand %p4601_p10, %p4595_p9 }
 0x9a4   : > { %4605 = shalt.err (!%p4602_p3)
}
 0x9a5   : > { %s6381_s19 = sld [smem:[#allocation56_spill]] }
 0x9ab   : > { %s6382_s2 = smov %s6381_s19  ;;  %s4606_s9 = scalar_lea.hbm %s6381_s19, 128 }
 0x9ac   : > { %p4607_p6 = scmp.ne.s32.totalorder %s6382_s2, %s4606_s9  ;;  %p4612_p0 = scmp.lt.u32.totalorder %s4606_s9, %s6382_s2 }
 0x9ae   : > { %p4608_p2 = pnand %p4607_p6, %p3912_p4 }
 0x9b0   : > { %p4609_p12 = pneg %p4608_p2 }
 0x9b2   : > { %p4614_p5 = pnand %p4612_p0, %p4609_p12 }
 0x9b4   : > { %4617 = shalt.err (!%p4614_p5)
}
 0x9b5   : > { %3880 = dma.vmem_to_hbm [thread:$0]  (%p3912_p4), %s3115_s23, 128, %s6382_s2, [#allocation13]  }
 0x9b6   : > { %4697 = dma.done.wait (%p3912_p4), [#allocation13], 128  }
 0x9b7   : > { %4699 = vsyncadd (%p3912_p4), [#allocation13], 4294967168 }
 0x9b8 PF: > { %s46_s22 = sadd.s32 1, %s4742_s22   ;;  %s6383_s3 = smov %s4706_s28 }
 0x9b9   : > { %p43_p11 = scmp.ge.s32.totalorder %s46_s22, 42   ;;  %s6384_s28 = smov %s4710_s29 }
 0x9ba   : > { %s6385_s29 = smov %s5146_s27  ;;  %s6386_s30 = smov %s4718_s0 }
 0x9bb   : > { %s6387_s0 = smov %s4722_s17  ;;  %s6388_s17 = smov %s5128_s24 }
 0x9bc   : > { %s6389_s18 = smov %s4734_s20  ;;  %s6390_s19 = smov %s4738_s21 }
 0x9bd   : > { %s6391_s20 = smov %s6394_s5  ;;  %s6392_s21 = smov %s6398_s1 }
 0x9be   :  { %45 = sbr.rel (!%p43_p11) target bundleno = 62 (0x3e), region = 203 }
 0x9c5   :  { %3127 = vsyncpa [#allocation12], 1 }
 0x9c6   :  { %3129 = vsyncpa [#allocation12 + $0x1], 1 }
 0x9c7   :  { %3130 = vsyncpa [#allocation15], 1 }
 0x9c8   :  { %3131 = vsyncpa [#allocation19], 1 }
 0x9c9   :  { %3132 = vsyncpa [#allocation13], 1 }
 0x9ca   :  { %3134 = vsyncpa [#allocation13 + $0x1], 1 }

</bundles_post_ra>
